<compile_context>
chip_gen: v5e
topology: v5e:2x2
jax: 0.10.0
libtpu: 0.0.40
codegen_flags: <defaults>
</compile_context>

<pallas_src>
import functools

import numpy as np
import jax
import jax.numpy as jnp
from jax.experimental import pallas as pl
from jax.experimental.pallas import tpu as pltpu


def _round_up(x: int, m: int) -> int:
    return -(-x // m) * m


# ----------------------- shared per-node relaxation --------------------------
def _relaxation(l, u):
    """Per-node ReLU6 DeepPoly relaxation (fresh alphas).

    Returns (dl, du, bl, bu, case_b):
      dl/du : diagonal entries of the abstract lower/upper matrices
      bl/bu : last-row (constant) entries
      case_b: mask for 0 < u <= 6 (concrete upper bound is exactly u there)
    """
    case_hi = u > 6.0
    case_b = jnp.logical_and(u > 0.0, jnp.logical_not(case_hi))       # 0 < u <= 6
    case_b1 = jnp.logical_and(case_b, l >= 0.0)                       # stably active
    case_b2 = jnp.logical_and(case_b, l < 0.0)                        # crosses 0
    case_c = jnp.logical_and(case_hi, l <= 0.0)                       # crosses 0 and 6
    case_d = jnp.logical_and(case_hi, jnp.logical_and(l > 0.0, l <= 6.0))  # crosses 6
    case_e = jnp.logical_and(case_hi, l > 6.0)                        # saturated at 6
    # (u <= 0 -> everything stays zero)

    # safe intermediates; one divide shared between lam and al_d
    den_ul = jnp.where(u - l != 0.0, u - l, 1.0)
    inv_ul = 1.0 / den_ul
    lam = u * inv_ul                                   # B2 upper slope
    alpha_b2 = jnp.where(u < -l, 1e-5, 1.0)            # B2 lower slope (fresh alpha)

    upper_tight = (u - 6.0) < (6.0 - l)
    den_6l = jnp.where(6.0 - l != 0.0, 6.0 - l, 1.0)
    au_c = jnp.where(upper_tight, 6.0 / den_6l, 1e-5)  # C upper slope
    den_u = jnp.where(u != 0.0, u, 1.0)
    al_c = jnp.where(u < -l, 1e-5, 6.0 / den_u)        # C lower slope
    au_d = jnp.where(upper_tight, 1.0, 1e-5)           # D upper slope
    al_d = (6.0 - l) * inv_ul                          # D lower slope

    # diagonal entries
    dl = jnp.where(case_b1, 1.0,
         jnp.where(case_b2, alpha_b2,
         jnp.where(case_c, al_c,
         jnp.where(case_d, al_d, 0.0))))
    du = jnp.where(case_b1, 1.0,
         jnp.where(case_b2, lam,
         jnp.where(case_c, au_c,
         jnp.where(case_d, au_d, 0.0))))

    # last-row (constant) entries; saturated case contributes 6
    e6 = jnp.where(case_e, 6.0, 0.0)
    bl = jnp.where(case_d, l * (1.0 - al_d), e6)
    bu = jnp.where(case_b2, -lam * l,
         jnp.where(case_c, 6.0 * (1.0 - au_c),
         jnp.where(case_d, 6.0 * (1.0 - au_d), e6)))
    return dl, du, bl, bu, case_b


# ------------------ pass 1: concrete output bounds (C, H, W) -----------------
def _concrete_bounds_kernel(l_ref, u_ref, cl_ref, cu_ref):
    l = l_ref[...]
    u = u_ref[...]
    dl, du, bl, bu, case_b = _relaxation(l, u)
    # FMA form (identical algebra); keep cu == u exact for 0 < u <= 6.
    cl_ref[...] = dl * l + bl
    cu_ref[...] = jnp.where(case_b, u, du * u + bu)


# ------------- pass 2: tiled writer for the dense (N, N) matrices -----------
def _abs_matrix_writer_kernel(l_ref, u_ref, out_l_ref, out_u_ref, *, last_row):
    """Writes one (tr, tc) tile of each abstract matrix: diag + last row."""
    tr, tc = out_l_ref.shape
    r0 = pl.program_id(0) * tr
    c0 = pl.program_id(1) * tc

    # Does this tile touch the diagonal band or the last (constant) row?
    diag_hit = jnp.logical_and(r0 < c0 + tc, c0 < r0 + tr)
    last_hit = (r0 + tr) > last_row
    needed = jnp.logical_or(diag_hit, last_hit)

    @pl.when(jnp.logical_not(needed))
    def _():
        out_l_ref[...] = jnp.zeros_like(out_l_ref)
        out_u_ref[...] = jnp.zeros_like(out_u_ref)

    @pl.when(needed)
    def _():
        # Relaxation for this tile's columns, recomputed in-kernel (cheap:
        # only ~2 tiles per column block take this branch).
        l = l_ref[...]                                    # (1, tc)
        u = u_ref[...]
        dl, du, bl, bu, _ = _relaxation(l, u)
        col = c0 + jax.lax.broadcasted_iota(jnp.int32, (1, tc), 1)   # (1, tc)
        is_last_col = col == last_row
        bl = jnp.where(is_last_col, 1.0, bl)              # [-1, -1] = 1.0
        bu = jnp.where(is_last_col, 1.0, bu)
        row = r0 + jax.lax.broadcasted_iota(jnp.int32, (tr, 1), 0)   # (tr, 1)
        on_last = row == last_row                          # (tr, 1)
        on_diag = col == row                               # (tr, tc) via broadcast
        out_l_ref[...] = jnp.where(on_last, bl, jnp.where(on_diag, dl, 0.0))
        out_u_ref[...] = jnp.where(on_last, bu, jnp.where(on_diag, du, 0.0))


def _writer_config():
    """Per-generation pass-2 tile sizes and scoped-VMEM budget (safe fallback)."""
    try:
        kind = jax.devices()[0].device_kind.lower()
    except Exception:  # pragma: no cover - defensive
        kind = ""
    if ("v6" in kind) or ("v7" in kind):
        # 2 outs x 2 bufs x 512*2048*4B = 16 MiB of pipeline buffers (+ temps).
        return 512, 2048, 48 * 1024 * 1024
    # v5e (16 MiB scoped default) and unknown chips: smaller, always-safe tiles.
    return 512, 1024, 32 * 1024 * 1024


@functools.partial(jax.jit,
                   static_argnames=("mat_row_tile", "mat_col_tile",
                                    "conc_block_elems"))
def relu6_abstract_forward(concrete_lower, concrete_upper, *,
                           mat_row_tile=None, mat_col_tile=None,
                           conc_block_elems=256 * 1024):
    """Equivalent of ReLU6.forward for prev_layer_name == 'conv2d'.

    Args:
      concrete_lower, concrete_upper: (C, H, W) float32 concrete input bounds.
    Returns:
      ((lower (C,H,W), upper (C,H,W)), (abs_lower (N,N), abs_upper (N,N)))
      with N = C*H*W + 1, matching the PyTorch module (modulo f32 vs f64).
    """
    C, H, W = concrete_lower.shape
    M = C * H * W
    N = M + 1

    l3 = concrete_lower.astype(jnp.float32)
    u3 = concrete_upper.astype(jnp.float32)

    # ---- pass 1: elementwise concrete bounds, native (C, H, W) layout ----
    hw_pad = _round_up(H, 8) * _round_up(W, 128)       # VMEM footprint per channel
    c_blk = max(1, min(C, conc_block_elems // max(1, hw_pad)))
    grid_c = -(-C // c_blk)
    conc_spec = pl.BlockSpec((c_blk, H, W), lambda i: (i, 0, 0))
    cl, cu = pl.pallas_call(
        _concrete_bounds_kernel,
        out_shape=(jax.ShapeDtypeStruct((C, H, W), jnp.float32),
                   jax.ShapeDtypeStruct((C, H, W), jnp.float32)),
        grid=(grid_c,),
        in_specs=[conc_spec, conc_spec],
        out_specs=(conc_spec, conc_spec),
        compiler_params=pltpu.CompilerParams(
            dimension_semantics=("parallel",)),
    )(l3, u3)

    # ---- pass 2: tiled writer for the dense (N, N) abstract matrices ----
    d_tr, d_tc, vmem_bytes = _writer_config()
    tr_cfg = mat_row_tile if mat_row_tile is not None else d_tr
    tc_cfg = mat_col_tile if mat_col_tile is not None else d_tc
    # Block dims: never larger than the array; multiples of (8, 128) or full dim.
    tr_m = min(tr_cfg, (N // 8) * 8) if N >= 8 else N
    tc_m = min(tc_cfg, (N // 128) * 128) if N >= 128 else N
    n_row_blocks = -(-N // tr_m)
    n_col_blocks = -(-N // tc_m)
    NC = n_col_blocks * tc_m                            # padded column-vector length

    # Single pad per input; fill -1 lands in the u<=0 case -> all-zero outputs,
    # and the bias column (index M) is overridden to 1.0 in-kernel.
    l_vec = jnp.pad(l3.reshape(1, M), ((0, 0), (0, NC - M)), constant_values=-1.0)
    u_vec = jnp.pad(u3.reshape(1, M), ((0, 0), (0, NC - M)), constant_values=-1.0)

    vec_spec = pl.BlockSpec((1, tc_m), lambda i, j: (0, j))
    mat_spec = pl.BlockSpec((tr_m, tc_m), lambda i, j: (i, j))

    abs_lower, abs_upper = pl.pallas_call(
        functools.partial(_abs_matrix_writer_kernel, last_row=N - 1),
        out_shape=(jax.ShapeDtypeStruct((N, N), jnp.float32),
                   jax.ShapeDtypeStruct((N, N), jnp.float32)),
        grid=(n_row_blocks, n_col_blocks),
        in_specs=[vec_spec, vec_spec],
        out_specs=(mat_spec, mat_spec),
        compiler_params=pltpu.CompilerParams(
            dimension_semantics=("parallel", "parallel"),
            vmem_limit_bytes=int(vmem_bytes)),
    )(l_vec, u_vec)

    return (cl, cu), (abs_lower, abs_upper)


# ----------------------------- verification ----------------------------------
def _reference_numpy(l_np, u_np):
    """Pure-numpy port of create_relu6_node (fresh alphas), for verification."""
    C, H, W = l_np.shape
    M = C * H * W
    N = M + 1
    al = np.zeros((N, N), np.float64)
    au = np.zeros((N, N), np.float64)
    al[-1, -1] = 1.0
    au[-1, -1] = 1.0
    cl = np.zeros_like(l_np, np.float64)
    cu = np.zeros_like(u_np, np.float64)
    lf = l_np.reshape(-1).astype(np.float64)
    uf = u_np.reshape(-1).astype(np.float64)
    for i in range(M):
        l, u = lf[i], uf[i]
        if u <= 0:
            continue
        elif u <= 6:
            if l >= 0:
                al[i, i] = 1.0; au[i, i] = 1.0
                cl.reshape(-1)[i] = l; cu.reshape(-1)[i] = u
            else:
                alpha = 1e-5 if u < -l else 1.0
                lam = u / (u - l)
                al[i, i] = alpha; au[i, i] = lam; au[-1, i] = -lam * l
                cl.reshape(-1)[i] = alpha * l; cu.reshape(-1)[i] = u
        elif l <= 0:
            a_up = 6.0 / (6.0 - l) if (u - 6.0 < 6.0 - l) else 1e-5
            au[i, i] = a_up; au[-1, i] = 6.0 * (1.0 - a_up)
            cu.reshape(-1)[i] = 6.0 + a_up * (u - 6.0)
            a_lo = 1e-5 if u < -l else 6.0 / u
            al[i, i] = a_lo
            cl.reshape(-1)[i] = a_lo * l
        elif l <= 6:
            a_up = 1.0 if (u - 6.0 < 6.0 - l) else 1e-5
            au[i, i] = a_up; au[-1, i] = 6.0 * (1.0 - a_up)
            cu.reshape(-1)[i] = 6.0 + a_up * (u - 6.0)
            a_lo = (6.0 - l) / (u - l)
            al[i, i] = a_lo; al[-1, i] = l * (1.0 - a_lo)
            cl.reshape(-1)[i] = l
        else:
            cl.reshape(-1)[i] = 6.0; cu.reshape(-1)[i] = 6.0
            al[-1, i] = 6.0; au[-1, i] = 6.0
    return (cl, cu), (al, au)


if __name__ == "__main__":
    key = jax.random.PRNGKey(0)
    C, H, W = 4, 8, 8  # small conv2d-shaped concrete bounds
    k1, k2 = jax.random.split(key)
    lower = jax.random.uniform(k1, (C, H, W), jnp.float32, minval=-8.0, maxval=8.0)
    width = jax.random.uniform(k2, (C, H, W), jnp.float32, minval=0.0, maxval=10.0)
    upper = lower + width

    (cl, cu), (abs_l, abs_u) = relu6_abstract_forward(lower, upper)
    jax.block_until_ready((cl, cu, abs_l, abs_u))

    # verify against a pure-numpy port of the PyTorch logic
    (rcl, rcu), (ral, rau) = _reference_numpy(np.asarray(lower), np.asarray(upper))
    np.testing.assert_allclose(np.asarray(cl), rcl, rtol=1e-5, atol=1e-5)
    np.testing.assert_allclose(np.asarray(cu), rcu, rtol=1e-5, atol=1e-5)
    np.testing.assert_allclose(np.asarray(abs_l), ral, rtol=1e-5, atol=1e-5)
    np.testing.assert_allclose(np.asarray(abs_u), rau, rtol=1e-5, atol=1e-5)

    print("KERNEL_OK")
</pallas_src>

<mosaic_0001>
module attributes {stable_mosaic.version = 11 : i64} {
  func.func @_abs_matrix_writer_kernel(%arg0: i32, %arg1: i32, %arg2: memref<1x256xf32, #tpu.memory_space<vmem>>, %arg3: memref<1x256xf32, #tpu.memory_space<vmem>>, %arg4: memref<256x256xf32, #tpu.memory_space<vmem>>, %arg5: memref<256x256xf32, #tpu.memory_space<vmem>>) attributes {dimension_semantics = [#tpu.dimension_semantics<parallel>, #tpu.dimension_semantics<parallel>], iteration_bounds = array<i64: 2, 2>, scalar_prefetch = 0 : i64, scratch_operands = 0 : i64, tpu.core_type = #tpu.core_type<tc>, window_params = [{transform_indices = @transform_0, window_bounds = array<i64: 1, 256>}, {transform_indices = @transform_1, window_bounds = array<i64: 1, 256>}, {transform_indices = @transform_2, window_bounds = array<i64: 256, 256>}, {transform_indices = @transform_3, window_bounds = array<i64: 256, 256>}]} {
    %c256_i32 = arith.constant 256 : i32
    %0 = arith.muli %arg0, %c256_i32 : i32
    %c256_i32_0 = arith.constant 256 : i32
    %1 = arith.muli %arg1, %c256_i32_0 : i32
    %c256_i32_1 = arith.constant 256 : i32
    %2 = arith.addi %1, %c256_i32_1 : i32
    %3 = arith.cmpi slt, %0, %2 : i32
    %c256_i32_2 = arith.constant 256 : i32
    %4 = arith.addi %0, %c256_i32_2 : i32
    %5 = arith.cmpi slt, %1, %4 : i32
    %6 = arith.andi %3, %5 : i1
    %c256_i32_3 = arith.constant 256 : i32
    %7 = arith.addi %0, %c256_i32_3 : i32
    %c256_i32_4 = arith.constant 256 : i32
    %8 = arith.cmpi sgt, %7, %c256_i32_4 : i32
    %9 = arith.ori %6, %8 : i1
    %true = arith.constant true
    %10 = arith.xori %9, %true : i1
    %11 = arith.extui %10 : i1 to i32
    %c0_i32 = arith.constant 0 : i32
    %12 = arith.cmpi ne, %11, %c0_i32 : i32
    scf.if %12 {
      %cst = arith.constant 0.000000e+00 : f32
      %15 = vector.broadcast %cst : f32 to vector<256x256xf32>
      %c0 = arith.constant 0 : index
      %c0_6 = arith.constant 0 : index
      %16 = vector.load %arg4[%c0, %c0_6] : memref<256x256xf32, #tpu.memory_space<vmem>>, vector<256x256xf32>
      tpu.vector_store %arg4[%c0, %c0_6], %15 {strides = array<i32>} : memref<256x256xf32, #tpu.memory_space<vmem>>, vector<256x256xf32>,
      %cst_7 = arith.constant 0.000000e+00 : f32
      %17 = vector.broadcast %cst_7 : f32 to vector<256x256xf32>
      %c0_8 = arith.constant 0 : index
      %c0_9 = arith.constant 0 : index
      %18 = vector.load %arg5[%c0_8, %c0_9] : memref<256x256xf32, #tpu.memory_space<vmem>>, vector<256x256xf32>
      tpu.vector_store %arg5[%c0_8, %c0_9], %17 {strides = array<i32>} : memref<256x256xf32, #tpu.memory_space<vmem>>, vector<256x256xf32>,
    } else {
    }
    %13 = arith.extui %9 : i1 to i32
    %c0_i32_5 = arith.constant 0 : i32
    %14 = arith.cmpi ne, %13, %c0_i32_5 : i32
    scf.if %14 {
      %c0 = arith.constant 0 : index
      %c0_6 = arith.constant 0 : index
      %15 = vector.load %arg2[%c0, %c0_6] : memref<1x256xf32, #tpu.memory_space<vmem>>, vector<1x256xf32>
      %c0_7 = arith.constant 0 : index
      %c0_8 = arith.constant 0 : index
      %16 = vector.load %arg3[%c0_7, %c0_8] : memref<1x256xf32, #tpu.memory_space<vmem>>, vector<1x256xf32>
      %cst = arith.constant 6.000000e+00 : f32
      %17 = vector.broadcast %cst : f32 to vector<1x256xf32>
      %18 = arith.cmpf ogt, %16, %17 : vector<1x256xf32>
      %cst_9 = arith.constant 0.000000e+00 : f32
      %19 = vector.broadcast %cst_9 : f32 to vector<1x256xf32>
      %20 = arith.cmpf ogt, %16, %19 : vector<1x256xf32>
      %cst_10 = arith.constant dense<true> : vector<1x256xi1>
      %21 = arith.xori %18, %cst_10 : vector<1x256xi1>
      %22 = arith.andi %20, %21 : vector<1x256xi1>
      %cst_11 = arith.constant 0.000000e+00 : f32
      %23 = vector.broadcast %cst_11 : f32 to vector<1x256xf32>
      %24 = arith.cmpf oge, %15, %23 : vector<1x256xf32>
      %25 = arith.andi %22, %24 : vector<1x256xi1>
      %cst_12 = arith.constant 0.000000e+00 : f32
      %26 = vector.broadcast %cst_12 : f32 to vector<1x256xf32>
      %27 = arith.cmpf olt, %15, %26 : vector<1x256xf32>
      %28 = arith.andi %22, %27 : vector<1x256xi1>
      %cst_13 = arith.constant 0.000000e+00 : f32
      %29 = vector.broadcast %cst_13 : f32 to vector<1x256xf32>
      %30 = arith.cmpf ole, %15, %29 : vector<1x256xf32>
      %31 = arith.andi %18, %30 : vector<1x256xi1>
      %cst_14 = arith.constant 0.000000e+00 : f32
      %32 = vector.broadcast %cst_14 : f32 to vector<1x256xf32>
      %33 = arith.cmpf ogt, %15, %32 : vector<1x256xf32>
      %cst_15 = arith.constant 6.000000e+00 : f32
      %34 = vector.broadcast %cst_15 : f32 to vector<1x256xf32>
      %35 = arith.cmpf ole, %15, %34 : vector<1x256xf32>
      %36 = arith.andi %33, %35 : vector<1x256xi1>
      %37 = arith.andi %18, %36 : vector<1x256xi1>
      %cst_16 = arith.constant 6.000000e+00 : f32
      %38 = vector.broadcast %cst_16 : f32 to vector<1x256xf32>
      %39 = arith.cmpf ogt, %15, %38 : vector<1x256xf32>
      %40 = arith.andi %18, %39 : vector<1x256xi1>
      %41 = arith.subf %16, %15 : vector<1x256xf32>
      %cst_17 = arith.constant 0.000000e+00 : f32
      %42 = vector.broadcast %cst_17 : f32 to vector<1x256xf32>
      %43 = arith.cmpf one, %41, %42 : vector<1x256xf32>
      %44 = arith.subf %16, %15 : vector<1x256xf32>
      %cst_18 = arith.constant 1.000000e+00 : f32
      %45 = vector.broadcast %cst_18 : f32 to vector<1x256xf32>
      %46 = arith.select %43, %44, %45 : vector<1x256xi1>, vector<1x256xf32>
      %cst_19 = arith.constant 1.000000e+00 : f32
      %47 = vector.broadcast %cst_19 : f32 to vector<1x256xf32>
      %48 = arith.divf %47, %46 : vector<1x256xf32>
      %49 = arith.mulf %16, %48 : vector<1x256xf32>
      %cst_20 = arith.constant 0.000000e+00 : f32
      %50 = vector.broadcast %cst_20 : f32 to vector<1x256xf32>
      %51 = arith.subf %50, %15 : vector<1x256xf32>
      %52 = arith.cmpf olt, %16, %51 : vector<1x256xf32>
      %cst_21 = arith.constant 9.99999974E-6 : f32
      %cst_22 = arith.constant 1.000000e+00 : f32
      %53 = vector.broadcast %cst_21 : f32 to vector<1x256xf32>
      %54 = vector.broadcast %cst_22 : f32 to vector<1x256xf32>
      %55 = arith.select %52, %53, %54 : vector<1x256xi1>, vector<1x256xf32>
      %cst_23 = arith.constant 6.000000e+00 : f32
      %56 = vector.broadcast %cst_23 : f32 to vector<1x256xf32>
      %57 = arith.subf %16, %56 : vector<1x256xf32>
      %cst_24 = arith.constant 6.000000e+00 : f32
      %58 = vector.broadcast %cst_24 : f32 to vector<1x256xf32>
      %59 = arith.subf %58, %15 : vector<1x256xf32>
      %60 = arith.cmpf olt, %57, %59 : vector<1x256xf32>
      %cst_25 = arith.constant 6.000000e+00 : f32
      %61 = vector.broadcast %cst_25 : f32 to vector<1x256xf32>
      %62 = arith.subf %61, %15 : vector<1x256xf32>
      %cst_26 = arith.constant 0.000000e+00 : f32
      %63 = vector.broadcast %cst_26 : f32 to vector<1x256xf32>
      %64 = arith.cmpf one, %62, %63 : vector<1x256xf32>
      %cst_27 = arith.constant 6.000000e+00 : f32
      %65 = vector.broadcast %cst_27 : f32 to vector<1x256xf32>
      %66 = arith.subf %65, %15 : vector<1x256xf32>
      %cst_28 = arith.constant 1.000000e+00 : f32
      %67 = vector.broadcast %cst_28 : f32 to vector<1x256xf32>
      %68 = arith.select %64, %66, %67 : vector<1x256xi1>, vector<1x256xf32>
      %cst_29 = arith.constant 6.000000e+00 : f32
      %69 = vector.broadcast %cst_29 : f32 to vector<1x256xf32>
      %70 = arith.divf %69, %68 : vector<1x256xf32>
      %cst_30 = arith.constant 9.99999974E-6 : f32
      %71 = vector.broadcast %cst_30 : f32 to vector<1x256xf32>
      %72 = arith.select %60, %70, %71 : vector<1x256xi1>, vector<1x256xf32>
      %cst_31 = arith.constant 0.000000e+00 : f32
      %73 = vector.broadcast %cst_31 : f32 to vector<1x256xf32>
      %74 = arith.cmpf one, %16, %73 : vector<1x256xf32>
      %cst_32 = arith.constant 1.000000e+00 : f32
      %75 = vector.broadcast %cst_32 : f32 to vector<1x256xf32>
      %76 = arith.select %74, %16, %75 : vector<1x256xi1>, vector<1x256xf32>
      %cst_33 = arith.constant 0.000000e+00 : f32
      %77 = vector.broadcast %cst_33 : f32 to vector<1x256xf32>
      %78 = arith.subf %77, %15 : vector<1x256xf32>
      %79 = arith.cmpf olt, %16, %78 : vector<1x256xf32>
      %cst_34 = arith.constant 6.000000e+00 : f32
      %80 = vector.broadcast %cst_34 : f32 to vector<1x256xf32>
      %81 = arith.divf %80, %76 : vector<1x256xf32>
      %cst_35 = arith.constant 9.99999974E-6 : f32
      %82 = vector.broadcast %cst_35 : f32 to vector<1x256xf32>
      %83 = arith.select %79, %82, %81 : vector<1x256xi1>, vector<1x256xf32>
      %cst_36 = arith.constant 1.000000e+00 : f32
      %cst_37 = arith.constant 9.99999974E-6 : f32
      %84 = vector.broadcast %cst_36 : f32 to vector<1x256xf32>
      %85 = vector.broadcast %cst_37 : f32 to vector<1x256xf32>
      %86 = arith.select %60, %84, %85 : vector<1x256xi1>, vector<1x256xf32>
      %cst_38 = arith.constant 6.000000e+00 : f32
      %87 = vector.broadcast %cst_38 : f32 to vector<1x256xf32>
      %88 = arith.subf %87, %15 : vector<1x256xf32>
      %89 = arith.mulf %88, %48 : vector<1x256xf32>
      %cst_39 = arith.constant 0.000000e+00 : f32
      %90 = vector.broadcast %cst_39 : f32 to vector<1x256xf32>
      %91 = arith.select %37, %89, %90 : vector<1x256xi1>, vector<1x256xf32>
      %92 = arith.select %31, %83, %91 : vector<1x256xi1>, vector<1x256xf32>
      %93 = arith.select %28, %55, %92 : vector<1x256xi1>, vector<1x256xf32>
      %cst_40 = arith.constant 1.000000e+00 : f32
      %94 = vector.broadcast %cst_40 : f32 to vector<1x256xf32>
      %95 = arith.select %25, %94, %93 : vector<1x256xi1>, vector<1x256xf32>
      %cst_41 = arith.constant 0.000000e+00 : f32
      %96 = vector.broadcast %cst_41 : f32 to vector<1x256xf32>
      %97 = arith.select %37, %86, %96 : vector<1x256xi1>, vector<1x256xf32>
      %98 = arith.select %31, %72, %97 : vector<1x256xi1>, vector<1x256xf32>
      %99 = arith.select %28, %49, %98 : vector<1x256xi1>, vector<1x256xf32>
      %cst_42 = arith.constant 1.000000e+00 : f32
      %100 = vector.broadcast %cst_42 : f32 to vector<1x256xf32>
      %101 = arith.select %25, %100, %99 : vector<1x256xi1>, vector<1x256xf32>
      %cst_43 = arith.constant 6.000000e+00 : f32
      %cst_44 = arith.constant 0.000000e+00 : f32
      %102 = vector.broadcast %cst_43 : f32 to vector<1x256xf32>
      %103 = vector.broadcast %cst_44 : f32 to vector<1x256xf32>
      %104 = arith.select %40, %102, %103 : vector<1x256xi1>, vector<1x256xf32>
      %cst_45 = arith.constant 1.000000e+00 : f32
      %105 = vector.broadcast %cst_45 : f32 to vector<1x256xf32>
      %106 = arith.subf %105, %89 : vector<1x256xf32>
      %107 = arith.mulf %15, %106 : vector<1x256xf32>
      %108 = arith.select %37, %107, %104 : vector<1x256xi1>, vector<1x256xf32>
      %cst_46 = arith.constant 0.000000e+00 : f32
      %109 = vector.broadcast %cst_46 : f32 to vector<1x256xf32>
      %110 = arith.subf %109, %49 : vector<1x256xf32>
      %111 = arith.mulf %110, %15 : vector<1x256xf32>
      %cst_47 = arith.constant 1.000000e+00 : f32
      %112 = vector.broadcast %cst_47 : f32 to vector<1x256xf32>
      %113 = arith.subf %112, %72 : vector<1x256xf32>
      %cst_48 = arith.constant 6.000000e+00 : f32
      %114 = vector.broadcast %cst_48 : f32 to vector<1x256xf32>
      %115 = arith.mulf %114, %113 : vector<1x256xf32>
      %cst_49 = arith.constant 1.000000e+00 : f32
      %116 = vector.broadcast %cst_49 : f32 to vector<1x256xf32>
      %117 = arith.subf %116, %86 : vector<1x256xf32>
      %cst_50 = arith.constant 6.000000e+00 : f32
      %118 = vector.broadcast %cst_50 : f32 to vector<1x256xf32>
      %119 = arith.mulf %118, %117 : vector<1x256xf32>
      %120 = arith.select %37, %119, %104 : vector<1x256xi1>, vector<1x256xf32>
      %121 = arith.select %31, %115, %120 : vector<1x256xi1>, vector<1x256xf32>
      %122 = arith.select %28, %111, %121 : vector<1x256xi1>, vector<1x256xf32>
      %123 = tpu.iota {dimensions = array<i32: 1>} : vector<1x256xi32>
      %124 = vector.broadcast %1 : i32 to vector<1x256xi32>
      %125 = arith.addi %124, %123 : vector<1x256xi32>
      %c256_i32_51 = arith.constant 256 : i32
      %126 = vector.broadcast %c256_i32_51 : i32 to vector<1x256xi32>
      %127 = arith.cmpi eq, %125, %126 : vector<1x256xi32>
      %cst_52 = arith.constant 1.000000e+00 : f32
      %128 = vector.broadcast %cst_52 : f32 to vector<1x256xf32>
      %129 = arith.select %127, %128, %108 : vector<1x256xi1>, vector<1x256xf32>
      %cst_53 = arith.constant 1.000000e+00 : f32
      %130 = vector.broadcast %cst_53 : f32 to vector<1x256xf32>
      %131 = arith.select %127, %130, %122 : vector<1x256xi1>, vector<1x256xf32>
      %132 = tpu.iota {dimensions = array<i32: 0>} : vector<256x1xi32>
      %133 = vector.broadcast %0 : i32 to vector<256x1xi32>
      %134 = arith.addi %133, %132 : vector<256x1xi32>
      %c256_i32_54 = arith.constant 256 : i32
      %135 = vector.broadcast %c256_i32_54 : i32 to vector<256x1xi32>
      %136 = arith.cmpi eq, %134, %135 : vector<256x1xi32>
      %137 = vector.broadcast %125 : vector<1x256xi32> to vector<256x256xi32>
      %138 = vector.broadcast %134 : vector<256x1xi32> to vector<256x256xi32>
      %139 = arith.cmpi eq, %137, %138 : vector<256x256xi32>
      %cst_55 = arith.constant 0.000000e+00 : f32
      %140 = vector.shape_cast %95 : vector<1x256xf32> to vector<1x256xf32>
      %141 = vector.broadcast %140 : vector<1x256xf32> to vector<256x256xf32>
      %142 = vector.broadcast %cst_55 : f32 to vector<256x256xf32>
      %143 = arith.select %139, %141, %142 : vector<256x256xi1>, vector<256x256xf32>
      %144 = vector.shape_cast %136 : vector<256x1xi1> to vector<256x1xi1>
      %145 = vector.broadcast %144 : vector<256x1xi1> to vector<256x256xi1>
      %146 = vector.shape_cast %129 : vector<1x256xf32> to vector<1x256xf32>
      %147 = vector.broadcast %146 : vector<1x256xf32> to vector<256x256xf32>
      %148 = arith.select %145, %147, %143 : vector<256x256xi1>, vector<256x256xf32>
      %c0_56 = arith.constant 0 : index
      %c0_57 = arith.constant 0 : index
      %149 = vector.load %arg4[%c0_56, %c0_57] : memref<256x256xf32, #tpu.memory_space<vmem>>, vector<256x256xf32>
      tpu.vector_store %arg4[%c0_56, %c0_57], %148 {strides = array<i32>} : memref<256x256xf32, #tpu.memory_space<vmem>>, vector<256x256xf32>,
      %cst_58 = arith.constant 0.000000e+00 : f32
      %150 = vector.shape_cast %101 : vector<1x256xf32> to vector<1x256xf32>
      %151 = vector.broadcast %150 : vector<1x256xf32> to vector<256x256xf32>
      %152 = vector.broadcast %cst_58 : f32 to vector<256x256xf32>
      %153 = arith.select %139, %151, %152 : vector<256x256xi1>, vector<256x256xf32>
      %154 = vector.shape_cast %136 : vector<256x1xi1> to vector<256x1xi1>
      %155 = vector.broadcast %154 : vector<256x1xi1> to vector<256x256xi1>
      %156 = vector.shape_cast %131 : vector<1x256xf32> to vector<1x256xf32>
      %157 = vector.broadcast %156 : vector<1x256xf32> to vector<256x256xf32>
      %158 = arith.select %155, %157, %153 : vector<256x256xi1>, vector<256x256xf32>
      %c0_59 = arith.constant 0 : index
      %c0_60 = arith.constant 0 : index
      %159 = vector.load %arg5[%c0_59, %c0_60] : memref<256x256xf32, #tpu.memory_space<vmem>>, vector<256x256xf32>
      tpu.vector_store %arg5[%c0_59, %c0_60], %158 {strides = array<i32>} : memref<256x256xf32, #tpu.memory_space<vmem>>, vector<256x256xf32>,
    } else {
    }
    return
  }
  func.func @transform_0(%arg0: i32, %arg1: i32) -> (i32, i32) {
    %c0_i32 = arith.constant 0 : i32
    %c0_i32_0 = arith.constant 0 : i32
    return %c0_i32, %arg1 : i32, i32
  }
  func.func @transform_1(%arg0: i32, %arg1: i32) -> (i32, i32) {
    %c0_i32 = arith.constant 0 : i32
    %c0_i32_0 = arith.constant 0 : i32
    return %c0_i32, %arg1 : i32, i32
  }
  func.func @transform_2(%arg0: i32, %arg1: i32) -> (i32, i32) {
    %c0_i32 = arith.constant 0 : i32
    return %arg0, %arg1 : i32, i32
  }
  func.func @transform_3(%arg0: i32, %arg1: i32) -> (i32, i32) {
    %c0_i32 = arith.constant 0 : i32
    return %arg0, %arg1 : i32, i32
  }
}

module attributes {stable_mosaic.version = 11 : i64} {
  func.func @_concrete_bounds_kernel(%arg0: i32, %arg1: memref<4x8x8xf32, #tpu.memory_space<vmem>>, %arg2: memref<4x8x8xf32, #tpu.memory_space<vmem>>, %arg3: memref<4x8x8xf32, #tpu.memory_space<vmem>>, %arg4: memref<4x8x8xf32, #tpu.memory_space<vmem>>) attributes {dimension_semantics = [#tpu.dimension_semantics<parallel>], iteration_bounds = array<i64: 1>, scalar_prefetch = 0 : i64, scratch_operands = 0 : i64, tpu.core_type = #tpu.core_type<tc>, window_params = [{transform_indices = @transform_0, window_bounds = array<i64: 4, 8, 8>}, {transform_indices = @transform_1, window_bounds = array<i64: 4, 8, 8>}, {transform_indices = @transform_2, window_bounds = array<i64: 4, 8, 8>}, {transform_indices = @transform_3, window_bounds = array<i64: 4, 8, 8>}]} {
    %c0 = arith.constant 0 : index
    %c0_0 = arith.constant 0 : index
    %c0_1 = arith.constant 0 : index
    %0 = vector.load %arg1[%c0, %c0_0, %c0_1] : memref<4x8x8xf32, #tpu.memory_space<vmem>>, vector<4x8x8xf32>
    %c0_2 = arith.constant 0 : index
    %c0_3 = arith.constant 0 : index
    %c0_4 = arith.constant 0 : index
    %1 = vector.load %arg2[%c0_2, %c0_3, %c0_4] : memref<4x8x8xf32, #tpu.memory_space<vmem>>, vector<4x8x8xf32>
    %cst = arith.constant 6.000000e+00 : f32
    %2 = vector.broadcast %cst : f32 to vector<4x8x8xf32>
    %3 = arith.cmpf ogt, %1, %2 : vector<4x8x8xf32>
    %cst_5 = arith.constant 0.000000e+00 : f32
    %4 = vector.broadcast %cst_5 : f32 to vector<4x8x8xf32>
    %5 = arith.cmpf ogt, %1, %4 : vector<4x8x8xf32>
    %cst_6 = arith.constant dense<true> : vector<4x8x8xi1>
    %6 = arith.xori %3, %cst_6 : vector<4x8x8xi1>
    %7 = arith.andi %5, %6 : vector<4x8x8xi1>
    %cst_7 = arith.constant 0.000000e+00 : f32
    %8 = vector.broadcast %cst_7 : f32 to vector<4x8x8xf32>
    %9 = arith.cmpf oge, %0, %8 : vector<4x8x8xf32>
    %10 = arith.andi %7, %9 : vector<4x8x8xi1>
    %cst_8 = arith.constant 0.000000e+00 : f32
    %11 = vector.broadcast %cst_8 : f32 to vector<4x8x8xf32>
    %12 = arith.cmpf olt, %0, %11 : vector<4x8x8xf32>
    %13 = arith.andi %7, %12 : vector<4x8x8xi1>
    %cst_9 = arith.constant 0.000000e+00 : f32
    %14 = vector.broadcast %cst_9 : f32 to vector<4x8x8xf32>
    %15 = arith.cmpf ole, %0, %14 : vector<4x8x8xf32>
    %16 = arith.andi %3, %15 : vector<4x8x8xi1>
    %cst_10 = arith.constant 0.000000e+00 : f32
    %17 = vector.broadcast %cst_10 : f32 to vector<4x8x8xf32>
    %18 = arith.cmpf ogt, %0, %17 : vector<4x8x8xf32>
    %cst_11 = arith.constant 6.000000e+00 : f32
    %19 = vector.broadcast %cst_11 : f32 to vector<4x8x8xf32>
    %20 = arith.cmpf ole, %0, %19 : vector<4x8x8xf32>
    %21 = arith.andi %18, %20 : vector<4x8x8xi1>
    %22 = arith.andi %3, %21 : vector<4x8x8xi1>
    %cst_12 = arith.constant 6.000000e+00 : f32
    %23 = vector.broadcast %cst_12 : f32 to vector<4x8x8xf32>
    %24 = arith.cmpf ogt, %0, %23 : vector<4x8x8xf32>
    %25 = arith.andi %3, %24 : vector<4x8x8xi1>
    %26 = arith.subf %1, %0 : vector<4x8x8xf32>
    %cst_13 = arith.constant 0.000000e+00 : f32
    %27 = vector.broadcast %cst_13 : f32 to vector<4x8x8xf32>
    %28 = arith.cmpf one, %26, %27 : vector<4x8x8xf32>
    %29 = arith.subf %1, %0 : vector<4x8x8xf32>
    %cst_14 = arith.constant 1.000000e+00 : f32
    %30 = vector.broadcast %cst_14 : f32 to vector<4x8x8xf32>
    %31 = arith.select %28, %29, %30 : vector<4x8x8xi1>, vector<4x8x8xf32>
    %cst_15 = arith.constant 1.000000e+00 : f32
    %32 = vector.broadcast %cst_15 : f32 to vector<4x8x8xf32>
    %33 = arith.divf %32, %31 : vector<4x8x8xf32>
    %34 = arith.mulf %1, %33 : vector<4x8x8xf32>
    %cst_16 = arith.constant 0.000000e+00 : f32
    %35 = vector.broadcast %cst_16 : f32 to vector<4x8x8xf32>
    %36 = arith.subf %35, %0 : vector<4x8x8xf32>
    %37 = arith.cmpf olt, %1, %36 : vector<4x8x8xf32>
    %cst_17 = arith.constant 9.99999974E-6 : f32
    %cst_18 = arith.constant 1.000000e+00 : f32
    %38 = vector.broadcast %cst_17 : f32 to vector<4x8x8xf32>
    %39 = vector.broadcast %cst_18 : f32 to vector<4x8x8xf32>
    %40 = arith.select %37, %38, %39 : vector<4x8x8xi1>, vector<4x8x8xf32>
    %cst_19 = arith.constant 6.000000e+00 : f32
    %41 = vector.broadcast %cst_19 : f32 to vector<4x8x8xf32>
    %42 = arith.subf %1, %41 : vector<4x8x8xf32>
    %cst_20 = arith.constant 6.000000e+00 : f32
    %43 = vector.broadcast %cst_20 : f32 to vector<4x8x8xf32>
    %44 = arith.subf %43, %0 : vector<4x8x8xf32>
    %45 = arith.cmpf olt, %42, %44 : vector<4x8x8xf32>
    %cst_21 = arith.constant 6.000000e+00 : f32
    %46 = vector.broadcast %cst_21 : f32 to vector<4x8x8xf32>
    %47 = arith.subf %46, %0 : vector<4x8x8xf32>
    %cst_22 = arith.constant 0.000000e+00 : f32
    %48 = vector.broadcast %cst_22 : f32 to vector<4x8x8xf32>
    %49 = arith.cmpf one, %47, %48 : vector<4x8x8xf32>
    %cst_23 = arith.constant 6.000000e+00 : f32
    %50 = vector.broadcast %cst_23 : f32 to vector<4x8x8xf32>
    %51 = arith.subf %50, %0 : vector<4x8x8xf32>
    %cst_24 = arith.constant 1.000000e+00 : f32
    %52 = vector.broadcast %cst_24 : f32 to vector<4x8x8xf32>
    %53 = arith.select %49, %51, %52 : vector<4x8x8xi1>, vector<4x8x8xf32>
    %cst_25 = arith.constant 6.000000e+00 : f32
    %54 = vector.broadcast %cst_25 : f32 to vector<4x8x8xf32>
    %55 = arith.divf %54, %53 : vector<4x8x8xf32>
    %cst_26 = arith.constant 9.99999974E-6 : f32
    %56 = vector.broadcast %cst_26 : f32 to vector<4x8x8xf32>
    %57 = arith.select %45, %55, %56 : vector<4x8x8xi1>, vector<4x8x8xf32>
    %cst_27 = arith.constant 0.000000e+00 : f32
    %58 = vector.broadcast %cst_27 : f32 to vector<4x8x8xf32>
    %59 = arith.cmpf one, %1, %58 : vector<4x8x8xf32>
    %cst_28 = arith.constant 1.000000e+00 : f32
    %60 = vector.broadcast %cst_28 : f32 to vector<4x8x8xf32>
    %61 = arith.select %59, %1, %60 : vector<4x8x8xi1>, vector<4x8x8xf32>
    %cst_29 = arith.constant 0.000000e+00 : f32
    %62 = vector.broadcast %cst_29 : f32 to vector<4x8x8xf32>
    %63 = arith.subf %62, %0 : vector<4x8x8xf32>
    %64 = arith.cmpf olt, %1, %63 : vector<4x8x8xf32>
    %cst_30 = arith.constant 6.000000e+00 : f32
    %65 = vector.broadcast %cst_30 : f32 to vector<4x8x8xf32>
    %66 = arith.divf %65, %61 : vector<4x8x8xf32>
    %cst_31 = arith.constant 9.99999974E-6 : f32
    %67 = vector.broadcast %cst_31 : f32 to vector<4x8x8xf32>
    %68 = arith.select %64, %67, %66 : vector<4x8x8xi1>, vector<4x8x8xf32>
    %cst_32 = arith.constant 1.000000e+00 : f32
    %cst_33 = arith.constant 9.99999974E-6 : f32
    %69 = vector.broadcast %cst_32 : f32 to vector<4x8x8xf32>
    %70 = vector.broadcast %cst_33 : f32 to vector<4x8x8xf32>
    %71 = arith.select %45, %69, %70 : vector<4x8x8xi1>, vector<4x8x8xf32>
    %cst_34 = arith.constant 6.000000e+00 : f32
    %72 = vector.broadcast %cst_34 : f32 to vector<4x8x8xf32>
    %73 = arith.subf %72, %0 : vector<4x8x8xf32>
    %74 = arith.mulf %73, %33 : vector<4x8x8xf32>
    %cst_35 = arith.constant 0.000000e+00 : f32
    %75 = vector.broadcast %cst_35 : f32 to vector<4x8x8xf32>
    %76 = arith.select %22, %74, %75 : vector<4x8x8xi1>, vector<4x8x8xf32>
    %77 = arith.select %16, %68, %76 : vector<4x8x8xi1>, vector<4x8x8xf32>
    %78 = arith.select %13, %40, %77 : vector<4x8x8xi1>, vector<4x8x8xf32>
    %cst_36 = arith.constant 1.000000e+00 : f32
    %79 = vector.broadcast %cst_36 : f32 to vector<4x8x8xf32>
    %80 = arith.select %10, %79, %78 : vector<4x8x8xi1>, vector<4x8x8xf32>
    %cst_37 = arith.constant 0.000000e+00 : f32
    %81 = vector.broadcast %cst_37 : f32 to vector<4x8x8xf32>
    %82 = arith.select %22, %71, %81 : vector<4x8x8xi1>, vector<4x8x8xf32>
    %83 = arith.select %16, %57, %82 : vector<4x8x8xi1>, vector<4x8x8xf32>
    %84 = arith.select %13, %34, %83 : vector<4x8x8xi1>, vector<4x8x8xf32>
    %cst_38 = arith.constant 1.000000e+00 : f32
    %85 = vector.broadcast %cst_38 : f32 to vector<4x8x8xf32>
    %86 = arith.select %10, %85, %84 : vector<4x8x8xi1>, vector<4x8x8xf32>
    %cst_39 = arith.constant 6.000000e+00 : f32
    %cst_40 = arith.constant 0.000000e+00 : f32
    %87 = vector.broadcast %cst_39 : f32 to vector<4x8x8xf32>
    %88 = vector.broadcast %cst_40 : f32 to vector<4x8x8xf32>
    %89 = arith.select %25, %87, %88 : vector<4x8x8xi1>, vector<4x8x8xf32>
    %cst_41 = arith.constant 1.000000e+00 : f32
    %90 = vector.broadcast %cst_41 : f32 to vector<4x8x8xf32>
    %91 = arith.subf %90, %74 : vector<4x8x8xf32>
    %92 = arith.mulf %0, %91 : vector<4x8x8xf32>
    %93 = arith.select %22, %92, %89 : vector<4x8x8xi1>, vector<4x8x8xf32>
    %cst_42 = arith.constant 0.000000e+00 : f32
    %94 = vector.broadcast %cst_42 : f32 to vector<4x8x8xf32>
    %95 = arith.subf %94, %34 : vector<4x8x8xf32>
    %96 = arith.mulf %95, %0 : vector<4x8x8xf32>
    %cst_43 = arith.constant 1.000000e+00 : f32
    %97 = vector.broadcast %cst_43 : f32 to vector<4x8x8xf32>
    %98 = arith.subf %97, %57 : vector<4x8x8xf32>
    %cst_44 = arith.constant 6.000000e+00 : f32
    %99 = vector.broadcast %cst_44 : f32 to vector<4x8x8xf32>
    %100 = arith.mulf %99, %98 : vector<4x8x8xf32>
    %cst_45 = arith.constant 1.000000e+00 : f32
    %101 = vector.broadcast %cst_45 : f32 to vector<4x8x8xf32>
    %102 = arith.subf %101, %71 : vector<4x8x8xf32>
    %cst_46 = arith.constant 6.000000e+00 : f32
    %103 = vector.broadcast %cst_46 : f32 to vector<4x8x8xf32>
    %104 = arith.mulf %103, %102 : vector<4x8x8xf32>
    %105 = arith.select %22, %104, %89 : vector<4x8x8xi1>, vector<4x8x8xf32>
    %106 = arith.select %16, %100, %105 : vector<4x8x8xi1>, vector<4x8x8xf32>
    %107 = arith.select %13, %96, %106 : vector<4x8x8xi1>, vector<4x8x8xf32>
    %108 = arith.mulf %80, %0 : vector<4x8x8xf32>
    %109 = arith.addf %108, %93 : vector<4x8x8xf32>
    %c0_47 = arith.constant 0 : index
    %c0_48 = arith.constant 0 : index
    %c0_49 = arith.constant 0 : index
    %110 = vector.load %arg3[%c0_47, %c0_48, %c0_49] : memref<4x8x8xf32, #tpu.memory_space<vmem>>, vector<4x8x8xf32>
    tpu.vector_store %arg3[%c0_47, %c0_48, %c0_49], %109 {strides = array<i32>} : memref<4x8x8xf32, #tpu.memory_space<vmem>>, vector<4x8x8xf32>,
    %111 = arith.mulf %86, %1 : vector<4x8x8xf32>
    %112 = arith.addf %111, %107 : vector<4x8x8xf32>
    %113 = arith.select %7, %1, %112 : vector<4x8x8xi1>, vector<4x8x8xf32>
    %c0_50 = arith.constant 0 : index
    %c0_51 = arith.constant 0 : index
    %c0_52 = arith.constant 0 : index
    %114 = vector.load %arg4[%c0_50, %c0_51, %c0_52] : memref<4x8x8xf32, #tpu.memory_space<vmem>>, vector<4x8x8xf32>
    tpu.vector_store %arg4[%c0_50, %c0_51, %c0_52], %113 {strides = array<i32>} : memref<4x8x8xf32, #tpu.memory_space<vmem>>, vector<4x8x8xf32>,
    return
  }
  func.func @transform_0(%arg0: i32) -> (i32, i32, i32) {
    %c0_i32 = arith.constant 0 : i32
    %c0_i32_0 = arith.constant 0 : i32
    %c0_i32_1 = arith.constant 0 : i32
    return %arg0, %c0_i32, %c0_i32_0 : i32, i32, i32
  }
  func.func @transform_1(%arg0: i32) -> (i32, i32, i32) {
    %c0_i32 = arith.constant 0 : i32
    %c0_i32_0 = arith.constant 0 : i32
    %c0_i32_1 = arith.constant 0 : i32
    return %arg0, %c0_i32, %c0_i32_0 : i32, i32, i32
  }
  func.func @transform_2(%arg0: i32) -> (i32, i32, i32) {
    %c0_i32 = arith.constant 0 : i32
    %c0_i32_0 = arith.constant 0 : i32
    %c0_i32_1 = arith.constant 0 : i32
    return %arg0, %c0_i32, %c0_i32_0 : i32, i32, i32
  }
  func.func @transform_3(%arg0: i32) -> (i32, i32, i32) {
    %c0_i32 = arith.constant 0 : i32
    %c0_i32_0 = arith.constant 0 : i32
    %c0_i32_1 = arith.constant 0 : i32
    return %arg0, %c0_i32, %c0_i32_0 : i32, i32, i32
  }
}

</mosaic_0001>

<bundles_post_ra>
// kernel: relu6_abstract_forward.2
= control target key start
LH: loop header
LB: loop body
LE: loop exit
PB: predicated region body
PF: predicated region fallthrough
CT: control target
= control target key end

     0   :  { %9 = vsyncpa [#allocation3], 0  ;;  %s1550_s0 = inlined_call_operand.vmem [shape: f32[4,8,8], index: 0, kind: input, shape index: {}]   ;;  %s1551_s1 = inlined_call_operand.vmem [shape: f32[4,8,8], index: 1, kind: input, shape index: {}]   ;;  %s1552_s2 = inlined_call_operand.hbm [shape: f32[4,8,8], index: 2, kind: output, shape index: {0}]   ;;  %s1553_s3 = inlined_call_operand.hbm [shape: f32[4,8,8], index: 3, kind: output, shape index: {1}]  }
   0x1   :  { %v607_v0 = vld [vmem:[%s1550_s0] sm:$0xff] }
   0x2   :  { %v612_v1 = vld [vmem:[%s1551_s1] sm:$0xff]  ;;  %v617_v3 = vsub.f32 6.0, %v607_v0  ;;  %v163_v5 = vsub.f32 0.0, %v607_v0  ;;  %vm63_vm4 = vcmp.gt.f32.partialorder %v607_v0, 0.0  ;;  %vm67_vm5 = vcmp.le.f32.partialorder %v607_v0, 6.0 }
   0x3   :  { %v87_v2 = vsub.f32 %v612_v1, %v607_v0  ;;  %vm259_vm0 = vcmp.ne.f32.partialorder %v612_v1, 0.0  ;;  %v627_v8 = vadd.f32 -6.0, %v612_v1 }
   0x4   :  { %vm187_vm2 = vcmp.ne.f32.partialorder %v617_v3, 0.0  ;;  %v624_v7 = vsel %vm259_vm0, %v612_v1, 1.0  ;;  %vm631_vm3 = vcmp.lt.f32.partialorder %v612_v1, %v163_v5 }
   0x5   :  { %vm91_vm1 = vcmp.ne.f32.partialorder %v87_v2, 0.0  ;;  %v191_v6 = vsel %vm187_vm2, %v617_v3, 1.0 }
   0x6   :  { %v95_v4 = vsel %vm91_vm1, %v87_v2, 1.0 }
   0x7   :  { %500 = vrcp.f32 %v95_v4  ;;  %v108_v9 = vand.u32 2147483647, %v95_v4  ;;  %v110_v11 = vand.u32 2147483648, %v95_v4 }
   0x8   :  { %502 = vrcp.f32 %v191_v6 }
   0x9   :  { %504 = vrcp.f32 %v624_v7 }
   0xa   :  { %10 = vsyncpa [#allocation5], 0  ;;  %vm23_vm6 = vcmp.gt.f32.partialorder %v612_v1, 6.0  ;;  %vm79_vm7 = vcmp.gt.f32.partialorder %v607_v0, 6.0  ;;  %v642_v12 = vld [vmem:[%s1551_s1 + $0x8] sm:$0xff]  ;;  %vm104_vm9 = vweird.f32 %v95_v4  ;;  %v1561_v14 = vmov 1.0  }
   0xb   :  { %v648_v15 = vsel %vm631_vm3, 1e-05, %v1561_v14  ;;  %vm183_vm10 = vcmp.lt.f32.partialorder %v627_v8, %v617_v3  ;;  %vm200_vm11 = vweird.f32 %v191_v6  ;;  %vm656_vm12 = vmand %vm63_vm4, %vm67_vm5  ;;  %vm660_vm13 = vcmp.eq.f32.partialorder %v108_v9, 8.507059e+37  ;;  %v667_v22 = vld [vmem:[%s1550_s0 + $0x8] sm:$0xff]  ;;  %s471_s30 = sshll.u32 %s1553_s3, 4  ;;  %s581_s4 = smov [#allocation2]   ;;  %s472_s30 = int_to_ptr.hbm [resolvable:$true] %s471_s30 }
   0xc   :  { %v204_v20 = vand.u32 2147483647, %v191_v6  ;;  %v206_v21 = vand.u32 2147483648, %v191_v6  ;;  %v111_v24 = vor.u32 1.1754944e-38, %v110_v11  ;;  %v88_v26 = vsub.f32 %v642_v12, %v667_v22  ;;  %vm689_vm14 = vmand %vm23_vm6, %vm656_vm12  ;;  %s456_s5 = sshll.u32 %s581_s4, 4  ;;  %s458_s8 = sshll.u32 %s1552_s2, 4  ;;  %s457_s5 = int_to_ptr.vmem [resolvable:$true] %s456_s5  ;;  %s459_s8 = int_to_ptr.hbm [resolvable:$true] %s458_s8 }
   0xd   :  { %v501_v13 = vpop.eup %500  ;;  %vm1554_vm0 = vmmov 1   ;;  %v276_v30 = vand.u32 2147483647, %v624_v7  ;;  %v278_v33 = vand.u32 2147483648, %v624_v7  ;;  %vm699_vm8 = vmand %vm23_vm6, %vm79_vm7  ;;  %v578_v41 = vmov 1e-05  }
   0xe   :  { %v652_v16 = vpop.eup %502  ;;  %v100_v18 = vmul.f32 %v501_v13, %v95_v4  ;;  %vm677_vm1 = vmxor %vm23_vm6, %vm1554_vm0  ;;  %vm105_vm4 = vweird.f32 %v501_v13  ;;  %vm92_vm2 = vcmp.ne.f32.partialorder %v88_v26, 0.0  ;;  %vm711_vm15 = vcmp.eq.f32.partialorder %v204_v20, 8.507059e+37  ;;  %s582_s2 = smov 128   ;;  %s583_s3 = smov 8  }
   0xf   :  { %v505_v23 = vpop.eup %504  ;;  %v196_v25 = vmul.f32 %v652_v16, %v191_v6  ;;  %vm201_vm0 = vweird.f32 %v652_v16  ;;  %v703_v37 = vsel %vm92_vm2, %v88_v26, 1.0  ;;  %vm706_vm5 = vmor %vm104_vm9, %vm105_vm4  ;;  %v719_v42 = vsel %vm183_vm10, 1.0, %v578_v41 }
  0x10   :  { %v101_v28 = vsub.f32 1.0, %v100_v18  ;;  %v268_v29 = vmul.f32 %v505_v23, %v624_v7  ;;  %vm273_vm12 = vweird.f32 %v505_v23  ;;  %506 = vrcp.f32 %v703_v37  ;;  %vm725_vm7 = vmor %vm200_vm11, %vm201_vm0 }
  0x11   :  { %v197_v32 = vsub.f32 1.0, %v196_v25  ;;  %v207_v45 = vor.u32 1.1754944e-38, %v206_v21  ;;  %v730_v47 = vsub.f32 6.0, %v667_v22  ;;  %vm1583_vm9 = vweird.f32 %v624_v7 }
  0x12   :  { %v102_v35 = vmul.f32 %v501_v13, %v101_v28  ;;  %v269_v36 = vsub.f32 1.0, %v268_v29  ;;  %vm735_vm2 = vmor %vm1583_vm9, %vm273_vm12  ;;  %v279_v50 = vor.u32 1.1754944e-38, %v278_v33  ;;  %v579_v51 = vmov 0.0  }
  0x13   :  { %v198_v39 = vmul.f32 %v652_v16, %v197_v32  ;;  %v742_v52 = vsel %vm699_vm8, 6.0, %v579_v51  ;;  %vm260_vm11 = vcmp.ne.f32.partialorder %v642_v12, 0.0  ;;  %vm277_vm0 = vcmp.eq.f32.partialorder %v276_v30, 8.507059e+37 }
  0x14   :  { %v103_v43 = vadd.f32 %v501_v13, %v102_v35  ;;  %v270_v46 = vmul.f32 %v505_v23, %v269_v36  ;;  %v355_v55 = vsel %vm689_vm14, %v719_v42, 0.0  ;;  %vm188_vm8 = vcmp.ne.f32.partialorder %v730_v47, 0.0 }
  0x15   :  { %v199_v48 = vadd.f32 %v652_v16, %v198_v39  ;;  %v759_v58 = vsel %vm260_vm11, %v642_v12, 1.0  ;;  %vm1586_vm4 = vcmp.gt.f32.partialorder %v612_v1, 0.0  ;;  %v1587_v59 = vmov 0 }
  0x16   :  { %v107_v53 = vsel %vm706_vm5, %v501_v13, %v103_v43  ;;  %v271_v54 = vadd.f32 %v505_v23, %v270_v46  ;;  %vm765_vm5 = vmand %vm1586_vm4, %vm677_vm1  ;;  %v403_v62 = vsub.f32 1.0, %v719_v42  ;;  %v164_v63 = vsub.f32 0.0, %v667_v22  ;;  %v507_v2 = vpop.eup %506 }
  0x17   :  { %v752_v56 = vsel %vm660_vm13, %v111_v24, %v107_v53  ;;  %v203_v57 = vsel %vm725_vm7, %v652_v16, %v199_v48  ;;  %v1588_v59 = vsel %vm765_vm5, 4294967295, %v1587_v59  ;;  %v779_v6 = vsel %vm188_vm8, %v730_v47, 1.0 }
  0x18   :  { %v275_v60 = vsel %vm735_vm2, %v505_v23, %v271_v54  ;;  %v335_v61 = vmul.f32 %v617_v3, %v752_v56  ;;  %v208_v4 = vsel %vm711_vm15, %v207_v45, %v203_v57  ;;  %508 = vrcp.f32 %v759_v58 }
  0x19   :  { %v280_v5 = vsel %vm277_vm0, %v279_v50, %v275_v60  ;;  %vm1589_vm12 = vcmp.le.f32.partialorder %v607_v0, 0.0  ;;  %v115_v16 = vmul.f32 %v507_v2, %v703_v37  ;;  %vm1592_vm15 = vcmp.lt.f32.partialorder %v607_v0, 0.0 }
  0x1a   :  { %vm786_vm7 = vmand %vm23_vm6, %vm1589_vm12  ;;  %v281_v9 = vmul.f32 6.0, %v280_v5  ;;  %v339_v11 = vsel %vm689_vm14, %v335_v61, 0.0  ;;  %v375_v13 = vsub.f32 1.0, %v335_v61  ;;  %v1593_v17 = vmov 0 }
  0x1b   :  { %vm797_vm9 = vmand %vm765_vm5, %vm1592_vm15  ;;  %vm64_vm6 = vcmp.gt.f32.partialorder %v667_v22, 0.0  ;;  %vm68_vm2 = vcmp.le.f32.partialorder %v667_v22, 6.0  ;;  %v123_v18 = vand.u32 2147483647, %v703_v37  ;;  %510 = vrcp.f32 %v779_v6 }
  0x1c   :  { %v1594_v17 = vsel %vm797_vm9, 4294967295, %v1593_v17  ;;  %vm1595_vm11 = vcmp.ge.f32.partialorder %v607_v0, 0.0  ;;  %v209_v20 = vmul.f32 6.0, %v208_v4  ;;  %v327_v21 = vsel %vm631_vm3, 1e-05, %v281_v9 }
  0x1d   :  { %vm809_vm0 = vmand %vm765_vm5, %vm1595_vm11  ;;  %v379_v23 = vmul.f32 %v375_v13, %v607_v0  ;;  %v125_v24 = vand.u32 2147483648, %v703_v37  ;;  %v343_v25 = vsel %vm786_vm7, %v327_v21, %v339_v11  ;;  %v116_v26 = vsub.f32 1.0, %v115_v16 }
  0x1e   :  { %vm119_vm4 = vweird.f32 %v703_v37  ;;  %vm120_vm12 = vweird.f32 %v507_v2  ;;  %v347_v27 = vsel %vm797_vm9, %v648_v15, %v343_v25  ;;  %v824_v28 = vmul.f32 6.0, %v403_v62  ;;  %v509_v30 = vpop.eup %508 }
  0x1f   :  { %vm828_vm15 = vcmp.lt.f32.partialorder %v642_v12, %v164_v63  ;;  %v833_v29 = vadd.f32 -6.0, %v642_v12  ;;  %v351_v32 = vsel %vm809_vm0, 1.0, %v347_v27  ;;  %v383_v15 = vsel %vm689_vm14, %v379_v23, %v742_v52  ;;  %vm853_vm8 = vmor %vm119_vm4, %vm120_vm12 }
  0x20   :  { %v117_v33 = vmul.f32 %v507_v2, %v116_v26  ;;  %vm840_vm11 = vcmp.eq.f32.partialorder %v123_v18, 8.507059e+37  ;;  %v847_v35 = vsel %vm183_vm10, %v209_v20, 1e-05  ;;  %v423_v36 = vmul.f32 %v351_v32, %v607_v0  ;;  %vm867_vm4 = vmand %vm64_vm6, %vm68_vm2  ;;  %v933_v18 = vld [vmem:[%s1551_s1 + $0x10] sm:$0xff] }
  0x21   :  { %v126_v39 = vor.u32 1.1754944e-38, %v125_v24  ;;  %v283_v40 = vmul.f32 %v509_v30, %v759_v58  ;;  %v511_v43 = vpop.eup %510  ;;  %v293_v3 = vand.u32 2147483648, %v759_v58  ;;  %v291_v46 = vand.u32 2147483647, %v759_v58 }
  0x22   :  { %v118_v44 = vadd.f32 %v507_v2, %v117_v33  ;;  %v427_v8 = vadd.f32 %v423_v36, %v383_v15  ;;  %v211_v45 = vmul.f32 %v511_v43, %v779_v6  ;;  %vm215_vm12 = vweird.f32 %v779_v6  ;;  %v973_v15 = vld [vmem:[%s1550_s0 + $0x10] sm:$0xff] }
  0x23   :  { %v284_v37 = vsub.f32 1.0, %v283_v40  ;;  %v219_v50 = vand.u32 2147483647, %v779_v6  ;;  %v221_v53 = vand.u32 2147483648, %v779_v6  ;;  %vm1606_vm1 = vcmask 64512  }
  0x24   :  { %v122_v49 = vsel %vm853_vm8, %v507_v2, %v118_v44  ;;  %432 = vst.msk [vmem:[#allocation2] sm:$0xff] %vm1606_vm1, %v427_v8  ;;  %vm1607_vm3 = vmmov 1   ;;  %vm1608_vm10 = vcmp.gt.f32.partialorder %v642_v12, 6.0  ;;  %v212_v60 = vsub.f32 1.0, %v211_v45 }
  0x25   :  { %vm880_vm13 = vmxor %vm1608_vm10, %vm1607_vm3  ;;  %v127_v57 = vsel %vm840_vm11, %v126_v39, %v122_v49  ;;  %vm216_vm6 = vweird.f32 %v511_v43  ;;  %v285_v61 = vmul.f32 %v509_v30, %v284_v37  ;;  %v888_v62 = vmul.f32 %v752_v56, %v612_v1 }
  0x26   :  { %vm1611_vm2 = vweird.f32 %v509_v30  ;;  %vm1612_vm8 = vweird.f32 %v759_v58  ;;  %v294_v2 = vor.u32 1.1754944e-38, %v293_v3  ;;  %v336_v4 = vmul.f32 %v730_v47, %v127_v57  ;;  %vm926_vm5 = vmor %vm215_vm12, %vm216_vm6 }
  0x27   :  { %vm895_vm10 = vmor %vm1612_vm8, %vm1611_vm2  ;;  %v359_v56 = vsel %vm786_vm7, %v847_v35, %v355_v55  ;;  %vm1615_vm11 = vcmp.gt.f32.partialorder %v642_v12, 6.0  ;;  %v1616_v58 = vmov 0  ;;  %v213_v5 = vmul.f32 %v511_v43, %v212_v60 }
  0x28   :  { %vm911_vm1 = vmand %vm1615_vm11, %vm867_vm4  ;;  %v286_v9 = vadd.f32 %v509_v30, %v285_v61  ;;  %vm915_vm2 = vcmp.eq.f32.partialorder %v291_v46, 8.507059e+37  ;;  %v411_v42 = vsel %vm689_vm14, %v824_v28, %v742_v52  ;;  %v222_v13 = vor.u32 1.1754944e-38, %v221_v53 }
  0x29   :  { %v1617_v58 = vsel %vm911_vm1, 4294967295, %v1616_v58  ;;  %v376_v16 = vsub.f32 1.0, %v336_v4  ;;  %vm1622_vm4 = vcmp.gt.f32.partialorder %v642_v12, 0.0  ;;  %v1623_v20 = vmov 0 }
  0x2a   :  { %vm939_vm11 = vmand %vm1622_vm4, %vm880_vm13  ;;  %v214_v6 = vadd.f32 %v511_v43, %v213_v5  ;;  %vm943_vm12 = vcmp.eq.f32.partialorder %v219_v50, 8.507059e+37  ;;  %v290_v23 = vsel %vm895_vm10, %v509_v30, %v286_v9  ;;  %vm1627_vm6 = vcmp.lt.f32.partialorder %v833_v29, %v730_v47 }
  0x2b   :  { %v1624_v20 = vsel %vm939_vm11, 4294967295, %v1623_v20  ;;  %v332_v24 = vsel %vm1627_vm6, 1.0, %v578_v41  ;;  %v363_v25 = vsel %vm797_vm9, %v888_v62, %v359_v56  ;;  %v395_v26 = vsub.f32 1.0, %v847_v35 }
  0x2c   :  { %vm1628_vm13 = vcmp.le.f32.partialorder %v667_v22, 0.0  ;;  %vm1629_vm4 = vcmp.gt.f32.partialorder %v642_v12, 6.0  ;;  %v1630_v27 = vmov 0  ;;  %v172_v30 = vsel %vm828_vm15, 1e-05, %v1561_v14 }
  0x2d   :  { %vm961_vm8 = vmand %vm1629_vm4, %vm1628_vm13  ;;  %v295_v32 = vsel %vm915_vm2, %v294_v2, %v290_v23  ;;  %vm1632_vm10 = vcmp.gt.f32.partialorder %v667_v22, 6.0  ;;  %v218_v34 = vsel %vm926_vm5, %v511_v43, %v214_v6  ;;  %v340_v38 = vsel %vm911_vm1, %v336_v4, 0.0 }
  0x2e   :  { %v1631_v27 = vsel %vm961_vm8, 4294967295, %v1630_v27  ;;  %vm1633_vm6 = vmmov %vm1629_vm4  ;;  %v296_v36 = vmul.f32 6.0, %v295_v32  ;;  %v89_v39 = vsub.f32 %v933_v18, %v973_v15  ;;  %vm1636_vm2 = vcmp.lt.f32.partialorder %v667_v22, 0.0 }
  0x2f   :  { %vm979_vm13 = vmand %vm1633_vm6, %vm1632_vm10  ;;  %v1637_v40 = vmov 0  ;;  %v223_v44 = vsel %vm943_vm12, %v222_v13, %v218_v34  ;;  %v356_v43 = vsel %vm911_vm1, %v332_v24, 0.0  ;;  %v380_v3 = vmul.f32 %v376_v16, %v667_v22 }
  0x30   :  { %vm993_vm4 = vmand %vm939_vm11, %vm1636_vm2  ;;  %v404_v8 = vsub.f32 1.0, %v332_v24  ;;  %vm1639_vm5 = vcmp.ge.f32.partialorder %v667_v22, 0.0  ;;  %v224_v37 = vmul.f32 6.0, %v223_v44  ;;  %v328_v46 = vsel %vm828_vm15, 1e-05, %v296_v36 }
  0x31   :  { %v1638_v40 = vsel %vm993_vm4, 4294967295, %v1637_v40  ;;  %vm1006_vm10 = vmand %vm939_vm11, %vm1639_vm5  ;;  %vm93_vm6 = vcmp.ne.f32.partialorder %v89_v39, 0.0  ;;  %v1014_v48 = vsub.f32 6.0, %v973_v15  ;;  %v344_v49 = vsel %vm961_vm8, %v328_v46, %v340_v38 }
  0x32   :  { %v1021_v50 = vsel %vm979_vm13, 6.0, %v579_v51  ;;  %v97_v53 = vsel %vm93_vm6, %v89_v39, 1.0  ;;  %v165_v54 = vsub.f32 0.0, %v973_v15  ;;  %vm1642_vm15 = vcmp.lt.f32.partialorder %v833_v29, %v730_v47 }
  0x33   :  { %v1027_v10 = vsel %vm1642_vm15, %v224_v37, 1e-05  ;;  %v348_v60 = vsel %vm993_vm4, %v172_v30, %v344_v49  ;;  %512 = vrcp.f32 %v97_v53  ;;  %v1032_v61 = vadd.f32 -6.0, %v933_v18 }
  0x34   :  { %v1035_v63 = vmul.f32 %v127_v57, %v642_v12  ;;  %v352_v2 = vsel %vm1006_vm10, 1.0, %v348_v60  ;;  %v384_v4 = vsel %vm911_vm1, %v380_v3, %v1021_v50  ;;  %v1042_v47 = vmul.f32 6.0, %v404_v8  ;;  %v1118_v3 = vld [vmem:[%s1551_s1 + $0x18] sm:$0xff] }
  0x35   :  { %v424_v29 = vmul.f32 %v352_v2, %v667_v22  ;;  %vm65_vm13 = vcmp.gt.f32.partialorder %v973_v15, 0.0  ;;  %vm69_vm2 = vcmp.le.f32.partialorder %v973_v15, 6.0  ;;  %vm189_vm5 = vcmp.ne.f32.partialorder %v1014_v48, 0.0 }
  0x36   :  { %v360_v57 = vsel %vm961_vm8, %v1027_v10, %v356_v43  ;;  %vm1052_vm6 = vcmp.lt.f32.partialorder %v933_v18, %v165_v54  ;;  %v1057_v5 = vsel %vm189_vm5, %v1014_v48, 1.0  ;;  %vm261_vm15 = vcmp.ne.f32.partialorder %v933_v18, 0.0  ;;  %vm73_vm12 = vmand %vm65_vm13, %vm69_vm2 }
  0x37   :  { %v1062_v9 = vsel %vm809_vm0, 1.0, %v363_v25  ;;  %v428_v11 = vadd.f32 %v424_v29, %v384_v4  ;;  %514 = vrcp.f32 %v1057_v5  ;;  %v138_v13 = vand.u32 2147483647, %v97_v53  ;;  %v1140_v4 = vld [vmem:[%s1550_s0 + $0x18] sm:$0xff]  ;;  %s580_s0 = smov [#allocation4]  }
  0x38   :  { %v1073_v16 = vsel %vm261_vm15, %v933_v18, 1.0  ;;  %v364_v6 = vsel %vm993_vm4, %v1035_v63, %v360_v57  ;;  %vm1645_vm0 = vcmask 64512   ;;  %v140_v21 = vand.u32 2147483648, %v97_v53  ;;  %s469_s27 = sshll.u32 %s580_s0, 4  ;;  %s470_s27 = int_to_ptr.vmem [resolvable:$true] %s469_s27 }
  0x39   :  { %v513_v19 = vpop.eup %512  ;;  %433 = vst.msk [vmem:[#allocation2 + $0x8] sm:$0xff] %vm1645_vm0, %v428_v11  ;;  %v1086_v23 = vsel %vm1052_vm6, 1e-05, %v1561_v14  ;;  %516 = vrcp.f32 %v1073_v16  ;;  %v234_v25 = vand.u32 2147483647, %v1057_v5  ;;  %v236_v30 = vand.u32 2147483648, %v1057_v5 }
  0x3a   :  { %v130_v24 = vmul.f32 %v513_v19, %v97_v53  ;;  %vm1646_vm15 = vcmp.lt.f32.partialorder %v1032_v61, %v1014_v48  ;;  %v306_v34 = vand.u32 2147483647, %v1073_v16  ;;  %v308_v36 = vand.u32 2147483648, %v1073_v16 }
  0x3b   :  { %v1095_v32 = vsel %vm1646_vm15, 1.0, %v578_v41  ;;  %v1102_v38 = vsel %vm1006_vm10, 1.0, %v364_v6  ;;  %vm1647_vm0 = vcmp.gt.f32.partialorder %v933_v18, 6.0  ;;  %vm1111_vm11 = vcmp.eq.f32.partialorder %v138_v13, 8.507059e+37 }
  0x3c   :  { %vm1107_vm5 = vmand %vm1647_vm0, %vm73_vm12  ;;  %v131_v44 = vsub.f32 1.0, %v130_v24  ;;  %v141_v45 = vor.u32 1.1754944e-38, %v140_v21  ;;  %v405_v37 = vsub.f32 1.0, %v1095_v32  ;;  %vm1652_vm2 = vcmp.gt.f32.partialorder %v973_v15, 6.0 }
  0x3d   :  { %v515_v8 = vpop.eup %514  ;;  %vm1653_vm13 = vmmov %vm1647_vm0  ;;  %vm1133_vm4 = vcmp.eq.f32.partialorder %v234_v25, 8.507059e+37  ;;  %v237_v2 = vor.u32 1.1754944e-38, %v236_v30  ;;  %vm1658_vm10 = vweird.f32 %v513_v19  ;;  %vm1659_vm0 = vweird.f32 %v97_v53 }
  0x3e   :  { %vm1128_vm15 = vmand %vm1653_vm13, %vm1652_vm2  ;;  %v132_v49 = vmul.f32 %v513_v19, %v131_v44  ;;  %v226_v54 = vmul.f32 %v515_v8, %v1057_v5  ;;  %vm1148_vm2 = vcmp.eq.f32.partialorder %v306_v34, 8.507059e+37  ;;  %v309_v13 = vor.u32 1.1754944e-38, %v308_v36 }
  0x3f   :  { %v517_v29 = vpop.eup %516  ;;  %vm1144_vm13 = vmor %vm1659_vm0, %vm1658_vm10  ;;  %v357_v6 = vsel %vm1107_vm5, %v1095_v32, 0.0  ;;  %v90_v21 = vsub.f32 %v1118_v3, %v1140_v4  ;;  %vm231_vm10 = vweird.f32 %v515_v8  ;;  %v1163_v30 = vsel %vm1128_vm15, 6.0, %v579_v51 }
  0x40   :  { %v133_v24 = vadd.f32 %v513_v19, %v132_v49  ;;  %v227_v53 = vsub.f32 1.0, %v226_v54  ;;  %v298_v25 = vmul.f32 %v517_v29, %v1073_v16  ;;  %v1165_v34 = vmul.f32 6.0, %v405_v37 }
  0x41   :  { %vm94_vm1 = vcmp.ne.f32.partialorder %v90_v21, 0.0  ;;  %vm1664_vm0 = vweird.f32 %v1057_v5  ;;  %vm1677_vm15 = vcmp.le.f32.partialorder %v973_v15, 0.0  ;;  %vm1678_vm8 = vcmp.gt.f32.partialorder %v933_v18, 6.0 }
  0x42   :  { %v137_v32 = vsel %vm1144_vm13, %v513_v19, %v133_v24  ;;  %v228_v36 = vmul.f32 %v515_v8, %v227_v53  ;;  %v299_v44 = vsub.f32 1.0, %v298_v25  ;;  %v1169_v49 = vsel %vm94_vm1, %v90_v21, 1.0  ;;  %vm1175_vm12 = vmor %vm1664_vm0, %vm231_vm10 }
  0x43   :  { %v142_v54 = vsel %vm1111_vm11, %v141_v45, %v137_v32  ;;  %518 = vrcp.f32 %v1169_v49  ;;  %vm1667_vm13 = vcmp.gt.f32.partialorder %v933_v18, 6.0  ;;  %vm1670_vm11 = vweird.f32 %v517_v29  ;;  %vm1233_vm9 = vmand %vm1678_vm8, %vm1677_vm15 }
  0x44   :  { %vm1185_vm1 = vmxor %vm1667_vm13, %vm1607_vm3  ;;  %v229_v43 = vadd.f32 %v515_v8, %v228_v36  ;;  %v300_v45 = vmul.f32 %v517_v29, %v299_v44  ;;  %v337_v5 = vmul.f32 %v1014_v48, %v142_v54  ;;  %vm1671_vm10 = vweird.f32 %v1073_v16 }
  0x45   :  { %vm1194_vm0 = vmor %vm1671_vm10, %vm1670_vm11  ;;  %v153_v21 = vand.u32 2147483647, %v1169_v49  ;;  %v1205_v24 = vadd.f32 -6.0, %v1118_v3  ;;  %v1208_v53 = vsub.f32 6.0, %v1140_v4  ;;  %v155_v36 = vand.u32 2147483648, %v1169_v49 }
  0x46   :  { %v233_v16 = vsel %vm1175_vm12, %v515_v8, %v229_v43  ;;  %v301_v25 = vadd.f32 %v517_v29, %v300_v45  ;;  %v377_v32 = vsub.f32 1.0, %v337_v5  ;;  %vm1674_vm10 = vcmp.gt.f32.partialorder %v933_v18, 0.0 }
  0x47   :  { %vm1218_vm13 = vmand %vm1674_vm10, %vm1185_vm1  ;;  %v1675_v44 = vmov 0  ;;  %v1223_v57 = vmul.f32 %v142_v54, %v933_v18  ;;  %v238_v14 = vsel %vm1133_vm4, %v237_v2, %v233_v16  ;;  %vm149_vm12 = vweird.f32 %v1169_v49 }
  0x48   :  { %v1676_v44 = vsel %vm1218_vm13, 4294967295, %v1675_v44  ;;  %vm190_vm11 = vcmp.ne.f32.partialorder %v1208_v53, 0.0  ;;  %v239_v19 = vmul.f32 6.0, %v238_v14  ;;  %v305_v54 = vsel %vm1194_vm0, %v517_v29, %v301_v25 }
  0x49   :  { %v381_v43 = vmul.f32 %v377_v32, %v973_v15  ;;  %v1241_v60 = vsel %vm190_vm11, %v1208_v53, 1.0  ;;  %v519_v2 = vpop.eup %518  ;;  %v310_v45 = vsel %vm1148_vm2, %v309_v13, %v305_v54  ;;  %v341_v16 = vsel %vm1107_vm5, %v337_v5, 0.0 }
  0x4a   :  { %vm1247_vm8 = vcmp.eq.f32.partialorder %v153_v21, 8.507059e+37  ;;  %520 = vrcp.f32 %v1241_v60  ;;  %vm1683_vm4 = vcmp.lt.f32.partialorder %v1032_v61, %v1014_v48  ;;  %v311_v46 = vmul.f32 6.0, %v310_v45 }
  0x4b   :  { %v1255_v29 = vsel %vm1683_vm4, %v239_v19, 1e-05  ;;  %v145_v25 = vmul.f32 %v519_v2, %v1169_v49  ;;  %v156_v32 = vor.u32 1.1754944e-38, %v155_v36  ;;  %vm1684_vm2 = vcmp.lt.f32.partialorder %v973_v15, 0.0 }
  0x4c   :  { %vm1262_vm15 = vmand %vm1218_vm13, %vm1684_vm2  ;;  %v1685_v11 = vmov 0  ;;  %v361_v13 = vsel %vm1233_vm9, %v1255_v29, %v357_v6  ;;  %v249_v48 = vand.u32 2147483647, %v1241_v60  ;;  %vm1687_vm10 = vcmp.ge.f32.partialorder %v973_v15, 0.0 }
  0x4d   :  { %v1686_v11 = vsel %vm1262_vm15, 4294967295, %v1685_v11  ;;  %vm1278_vm4 = vmand %vm1218_vm13, %vm1687_vm10  ;;  %v329_v6 = vsel %vm1052_vm6, 1e-05, %v311_v46  ;;  %v385_v5 = vsel %vm1107_vm5, %v381_v43, %v1163_v30  ;;  %v146_v21 = vsub.f32 1.0, %v145_v25 }
  0x4e   :  { %vm150_vm2 = vweird.f32 %v519_v2  ;;  %v345_v36 = vsel %vm1233_vm9, %v329_v6, %v341_v16  ;;  %vm1690_vm1 = vcmp.le.f32.partialorder %v1140_v4, 6.0  ;;  %vm1691_vm10 = vcmp.gt.f32.partialorder %v1140_v4, 0.0 }
  0x4f   :  { %vm1294_vm11 = vmand %vm1691_vm10, %vm1690_vm1  ;;  %v251_v56 = vand.u32 2147483648, %v1241_v60  ;;  %vm262_vm6 = vcmp.ne.f32.partialorder %v1118_v3, 0.0  ;;  %v349_v54 = vsel %vm1262_vm15, %v1086_v23, %v345_v36  ;;  %v365_v43 = vsel %vm1262_vm15, %v1223_v57, %v361_v13 }
  0x50   :  { %v147_v45 = vmul.f32 %v519_v2, %v146_v21  ;;  %v1308_v16 = vsel %vm262_vm6, %v1118_v3, 1.0  ;;  %v521_v46 = vpop.eup %520  ;;  %v353_v25 = vsel %vm1278_vm4, 1.0, %v349_v54  ;;  %vm1315_vm10 = vmor %vm149_vm12, %vm150_vm2  ;;  %vm1319_vm13 = vcmp.eq.f32.partialorder %v249_v48, 8.507059e+37 }
  0x51   :  { %522 = vrcp.f32 %v1308_v16  ;;  %vm1698_vm6 = vcmp.lt.f32.partialorder %v1205_v24, %v1208_v53  ;;  %v425_v21 = vmul.f32 %v353_v25, %v973_v15  ;;  %vm1699_vm12 = vcmp.gt.f32.partialorder %v1118_v3, 6.0 }
  0x52   :  { %v1328_v6 = vsel %vm1698_vm6, 1.0, %v578_v41  ;;  %vm1335_vm2 = vmand %vm1699_vm12, %vm1294_vm11  ;;  %v148_v48 = vadd.f32 %v519_v2, %v147_v45  ;;  %v241_v36 = vmul.f32 %v521_v46, %v1241_v60  ;;  %v321_v54 = vand.u32 2147483647, %v1308_v16 }
  0x53   :  { %v369_v14 = vsel %vm1278_vm4, 1.0, %v365_v43  ;;  %vm1702_vm1 = vcmp.gt.f32.partialorder %v1140_v4, 6.0  ;;  %vm1703_vm0 = vmmov %vm1699_vm12  ;;  %vm246_vm11 = vweird.f32 %v521_v46  ;;  %v252_v19 = vor.u32 1.1754944e-38, %v251_v56 }
  0x54   :  { %vm1348_vm15 = vmand %vm1703_vm0, %vm1702_vm1  ;;  %vm317_vm12 = vweird.f32 %v1308_v16  ;;  %v429_v45 = vadd.f32 %v425_v21, %v385_v5  ;;  %v152_v25 = vsel %vm1315_vm10, %v519_v2, %v148_v48  ;;  %v242_v61 = vsub.f32 1.0, %v241_v36 }
  0x55   :  { %v323_v43 = vand.u32 2147483648, %v1308_v16  ;;  %vm1706_vm4 = vmmov %vm1703_vm0  ;;  %v157_v37 = vsel %vm1247_vm8, %v156_v32, %v152_v25  ;;  %v406_v56 = vsub.f32 1.0, %v1328_v6  ;;  %v387_v5 = vsub.f32 0.0, %v888_v62 }
  0x56   :  { %vm1359_vm6 = vmxor %vm1706_vm4, %vm1607_vm3  ;;  %v399_v2 = vmul.f32 6.0, %v395_v26  ;;  %vm1709_vm0 = vcmask 64512   ;;  %v243_v23 = vmul.f32 %v521_v46, %v242_v61  ;;  %vm1370_vm1 = vcmp.eq.f32.partialorder %v321_v54, 8.507059e+37 }
  0x57   :  { %434 = vst.msk [vmem:[#allocation2 + $0x10] sm:$0xff] %vm1709_vm0, %v429_v45  ;;  %v1375_v48 = vmul.f32 %v1208_v53, %v157_v37  ;;  %v358_v55 = vsel %vm1335_vm2, %v1328_v6, 0.0  ;;  %v1383_v62 = vsel %vm1348_vm15, 6.0, %v579_v51  ;;  %v523_v35 = vpop.eup %522  ;;  %vm1712_vm3 = vweird.f32 %v1241_v60 }
  0x58   :  { %vm1388_vm8 = vmor %vm1712_vm3, %vm246_vm11  ;;  %v391_v32 = vmul.f32 %v387_v5, %v607_v0  ;;  %v415_v6 = vsel %vm786_vm7, %v399_v2, %v411_v42  ;;  %v436_v51 = vmul.f32 %v1062_v9, %v612_v1  ;;  %v388_v36 = vsub.f32 0.0, %v1035_v63 }
  0x59   :  { %vm1715_vm15 = vcmp.gt.f32.partialorder %v1118_v3, 0.0  ;;  %v162_v0 = vmul.f32 %v157_v37, %v1118_v3  ;;  %v1718_v31 = vsub.f32 0.0, %v1140_v4  ;;  %v244_v7 = vadd.f32 %v521_v46, %v243_v23 }
  0x5a   :  { %vm1407_vm10 = vmand %vm1715_vm15, %vm1359_vm6  ;;  %v313_v28 = vmul.f32 %v523_v35, %v1308_v16  ;;  %v324_v42 = vor.u32 1.1754944e-38, %v323_v43  ;;  %vm318_vm7 = vweird.f32 %v523_v35  ;;  %v410_v63 = vmul.f32 6.0, %v406_v56 }
  0x5b   :  { %vm1415_vm14 = vcmp.lt.f32.partialorder %v1118_v3, %v1718_v31  ;;  %vm1721_vm6 = vnez %v1594_v17  ;;  %v392_v33 = vmul.f32 %v388_v36, %v667_v22  ;;  %v248_v37 = vsel %vm1388_vm8, %v521_v46, %v244_v7 }
  0x5c   :  { %v419_v9 = vsel %vm1721_vm6, %v391_v32, %v415_v6  ;;  %v314_v54 = vsub.f32 1.0, %v313_v28  ;;  %v1722_v45 = vsub.f32 1.0, %v1027_v10  ;;  %vm1723_vm11 = vcmp.lt.f32.partialorder %v1140_v4, 0.0 }
  0x5d   :  { %v440_v41 = vadd.f32 %v436_v51, %v419_v9  ;;  %vm1431_vm4 = vmand %vm1407_vm10, %vm1723_vm11  ;;  %v253_v17 = vsel %vm1319_vm13, %v252_v19, %v248_v37  ;;  %v378_v22 = vsub.f32 1.0, %v1375_v48  ;;  %v437_v46 = vmul.f32 %v1102_v38, %v642_v12 }
  0x5e   :  { %v400_v25 = vmul.f32 6.0, %v1722_v45  ;;  %v389_v43 = vsub.f32 0.0, %v1223_v57  ;;  %vm1726_vm0 = vcmp.le.f32.partialorder %v1140_v4, 0.0  ;;  %vm1727_vm3 = vcmp.gt.f32.partialorder %v1118_v3, 6.0  ;;  %vm1462_vm11 = vmor %vm317_vm12, %vm318_vm7 }
  0x5f   :  { %vm1445_vm8 = vmand %vm1727_vm3, %vm1726_vm0  ;;  %v254_v56 = vmul.f32 6.0, %v253_v17  ;;  %v315_v5 = vmul.f32 %v523_v35, %v314_v54  ;;  %vm1730_vm13 = vnez %v1588_v59  ;;  %vm1731_vm15 = vnez %v1617_v58 }
  0x60   :  { %v444_v13 = vsel %vm1730_vm13, %v612_v1, %v440_v41  ;;  %v1732_v38 = vsel %vm1731_vm15, %v1042_v47, %v1021_v50  ;;  %vm1733_vm6 = vnez %v1631_v27  ;;  %v414_v59 = vsel %vm1335_vm2, %v410_v63, %v1383_v62 }
  0x61   :  { %v416_v57 = vsel %vm1733_vm6, %v400_v25, %v1732_v38  ;;  %vm1736_vm0 = vcmask 64512   ;;  %vm1737_vm3 = vnez %v1638_v40  ;;  %v393_v58 = vmul.f32 %v389_v43, %v973_v15 }
  0x62   :  { %448 = vst.msk [vmem:[#allocation4] sm:$0xff] %vm1736_vm0, %v444_v13  ;;  %v420_v1 = vsel %vm1737_vm3, %v392_v33, %v416_v57  ;;  %v1738_v27 = vsub.f32 1.0, %v1255_v29  ;;  %vm1739_vm13 = vcmp.ge.f32.partialorder %v1140_v4, 0.0  ;;  %vm1742_vm7 = vcmp.lt.f32.partialorder %v1205_v24, %v1208_v53 }
  0x63   :  { %vm1479_vm12 = vmand %vm1407_vm10, %vm1739_vm13  ;;  %v258_v16 = vsel %vm1742_vm7, %v254_v56, 1e-05  ;;  %v316_v2 = vadd.f32 %v523_v35, %v315_v5  ;;  %v441_v40 = vadd.f32 %v437_v46, %v420_v1  ;;  %v438_v23 = vmul.f32 %v369_v14, %v933_v18 }
  0x64   :  { %v401_v50 = vmul.f32 6.0, %v1738_v27  ;;  %v362_v15 = vsel %vm1445_vm8, %v258_v16, %v358_v55  ;;  %v398_v29 = vsub.f32 1.0, %v258_v16  ;;  %v1743_v26 = vsel %vm1107_vm5, %v1165_v34, %v1163_v30 }
  0x65   :  { %v390_v6 = vsub.f32 0.0, %v162_v0  ;;  %v320_v24 = vsel %vm1462_vm11, %v523_v35, %v316_v2  ;;  %v366_v53 = vsel %vm1431_vm4, %v162_v0, %v362_v15  ;;  %vm1744_vm15 = vnez %v1624_v20 }
  0x66   :  { %v417_v32 = vsel %vm1233_vm9, %v401_v50, %v1743_v26  ;;  %v445_v14 = vsel %vm1744_vm15, %v642_v12, %v441_v40  ;;  %vm1745_vm6 = vnez %v1686_v11  ;;  %v325_v30 = vsel %vm1370_vm1, %v324_v42, %v320_v24  ;;  %vm1746_vm9 = vmmov %vm1736_vm0 }
  0x67   :  { %v421_v39 = vsel %vm1745_vm6, %v393_v58, %v417_v32  ;;  %v370_v34 = vsel %vm1479_vm12, 1.0, %v366_v53  ;;  %449 = vst.msk [vmem:[#allocation4 + $0x8] sm:$0xff] %vm1746_vm9, %v445_v14  ;;  %v394_v55 = vmul.f32 %v390_v6, %v1140_v4  ;;  %v326_v35 = vmul.f32 6.0, %v325_v30  ;;  %vm1749_vm1 = vmmov %vm1736_vm0 }
  0x68   :  { %v442_v8 = vadd.f32 %v438_v23, %v421_v39  ;;  %v342_v20 = vsel %vm1335_vm2, %v1375_v48, 0.0  ;;  %v402_v12 = vmul.f32 6.0, %v398_v29  ;;  %v439_v11 = vmul.f32 %v370_v34, %v1118_v3 }
  0x69   :  { %v1747_v51 = vmov 1.0   ;;  %v382_v36 = vmul.f32 %v378_v22, %v1140_v4  ;;  %vm1748_vm5 = vnez %v1676_v44  ;;  %v330_v31 = vsel %vm1415_vm14, 1e-05, %v326_v35 }
  0x6a   :  { %v174_v21 = vsel %vm1415_vm14, 1e-05, %v1747_v51  ;;  %v446_v0 = vsel %vm1748_vm5, %v933_v18, %v442_v8  ;;  %v418_v48 = vsel %vm1445_vm8, %v402_v12, %v414_v59  ;;  %v346_v7 = vsel %vm1445_vm8, %v330_v31, %v342_v20  ;;  %vm1750_vm14 = vmmov %vm1736_vm0 }
  0x6b   :  { %450 = vst.msk [vmem:[#allocation4 + $0x10] sm:$0xff] %vm1749_vm1, %v446_v0  ;;  %v422_v18 = vsel %vm1431_vm4, %v394_v55, %v418_v48  ;;  %v350_v44 = vsel %vm1431_vm4, %v174_v21, %v346_v7  ;;  %v386_v42 = vsel %vm1335_vm2, %v382_v36, %v1383_v62  ;;  %vm1751_vm4 = vmmov %vm1736_vm0 }
  0x6c   :  { %v443_v52 = vadd.f32 %v439_v11, %v422_v18  ;;  %v354_v28 = vsel %vm1479_vm12, 1.0, %v350_v44 }
  0x6d   :  { %v426_v63 = vmul.f32 %v354_v28, %v1140_v4 }
  0x6e   :  { %v447_v9 = vsel %vm1407_vm10, %v1118_v3, %v443_v52 }
  0x6f   :  { %451 = vst.msk [vmem:[#allocation4 + $0x18] sm:$0xff] %vm1750_vm14, %v447_v9  ;;  %v430_v33 = vadd.f32 %v426_v63, %v386_v42 }
  0x70   :  { %477 = dma.vmem_to_hbm [thread:$0]  %s470_s27, 512, %s472_s30, [#allocation5], %s582_s2, %s582_s2, %s583_s3  }
  0x71   :  { %435 = vst.msk [vmem:[#allocation2 + $0x18] sm:$0xff] %vm1751_vm4, %v430_v33 }
  0x72   :  { %464 = dma.vmem_to_hbm [thread:$0]  %s457_s5, 512, %s459_s8, [#allocation3], %s582_s2, %s582_s2, %s583_s3  }
  0x73   :  { %572 = dma.done.wait [#allocation3], 512  }
  0x74   :  { %573 = vsyncadd [#allocation3], 4294966784 }
  0x75   :  { %574 = dma.done.wait [#allocation5], 512  }
  0x76   :  { %575 = vsyncadd [#allocation5], 4294966784 }
  0x77   :  { %486 = vsyncpa [#allocation3], 1 }
  0x78   :  { %487 = vsyncpa [#allocation5], 1 }

// kernel: relu6_abstract_forward.3
= control target key start
LH: loop header
LB: loop body
LE: loop exit
PB: predicated region body
PF: predicated region fallthrough
CT: control target
= control target key end

     0   :  { %s3678_s0 = inlined_call_operand.vmem [shape: f32[1,512], index: 0, kind: input, shape index: {}]   ;;  %s3679_s1 = inlined_call_operand.vmem [shape: f32[1,512], index: 1, kind: input, shape index: {}]   ;;  %s3680_s2 = inlined_call_operand.hbm [shape: f32[257,257], index: 2, kind: output, shape index: {0}]   ;;  %s3681_s3 = inlined_call_operand.hbm [shape: f32[257,257], index: 3, kind: output, shape index: {1}]  }
   0x1   :  { %3760 = sst [smem:[#allocation10_spill]] %s3678_s0 }
   0x2   :  { %3761 = sst [smem:[#allocation11_spill]] %s3679_s1 }
   0x3   :  { %9 = vsyncpa [#allocation3], 0 }
   0x4   :  { %11 = vsyncpa [#allocation3 + $0x1], 0 }
   0x5   :  { %12 = vsyncpa [#allocation5], 0 }
   0x6   :  { %14 = vsyncpa [#allocation5 + $0x1], 0  ;;  %s1614_s12 = smov 0   ;;  %s1616_s13 = smov 0  }
   0x7   :  { %s1618_s14 = smov 0   ;;  %s1620_s15 = smov 0  }
   0x8   :  { %s1622_s16 = smov 0   ;;  %s1624_s17 = smov 0  }
   0x9   :  { %s1626_s18 = smov 0   ;;  %s1628_s19 = smov 0  }
   0xa LB: > { %s1312_s20 = sadd.s32 4294967295, %s1581_s19   ;;  %s1313_s21 = sadd.s32 4294967294, %s1581_s19   ;;  %s1581_s19 = sphi %s1628_s19, %s20_s19   ;;  %s1577_s18 = sphi %s1626_s18, %s3954_s18   ;;  %s1573_s17 = sphi %s1624_s17, %s3953_s17   ;;  %s1569_s16 = sphi %s1622_s16, %s3952_s16   ;;  %s1565_s15 = sphi %s1620_s15, %s3951_s15   ;;  %s1561_s14 = sphi %s1618_s14, %s3950_s14   ;;  %s1557_s13 = sphi %s1616_s13, %s3949_s13   ;;  %s1553_s12 = sphi %s1614_s12, %s3948_s12  }
   0xb   : > { %s29_s22 = sadd.s32 1, %s1573_s17  ;;  %s32_s23 = sadd.s32 1, %s1577_s18 }
   0xc   : > { %p30_p0 = scmp.ge.s32.totalorder %s29_s22, 2  ;;  %p103_p1 = scmp.ne.s32.totalorder %s1561_s14, %s1557_s13 }
   0xd   : > { %p104_p2 = scmp.eq.s32.totalorder %s1312_s20, 3  ;;  %p109_p5 = scmp.ne.s32.totalorder %s1557_s13, %s1553_s12 }
   0xe   : > { %s3956_s22 = smov (%p30_p0, %s29_s22), 0  ;;  %s3958_s23 = smov (!%p30_p0, %s32_s23), %s1577_s18 }
   0xf   : > { %3762 = sst [smem:[#allocation8_spill]] %s3956_s22  ;;  %s89_s24 = ssub.s32 %s1573_s17, %s3956_s22 }
  0x10   : > { %p1665_p3 = por %p104_p2, %p103_p1  ;;  %p34_p4 = scmp.ge.s32.totalorder %s3958_s23, 2 }
  0x11   : > { %p110_p6 = scmp.eq.s32.totalorder %s1313_s21, 3  ;;  %p1316_p7 = scmp.ge.s32.totalorder %s1581_s19, 1 }
  0x12   : > { %s3960_s23 = smov (%p34_p4, %s3958_s23), 0  ;;  %p172_p9 = scmp.lt.s32.totalorder %s1581_s19, 5 }
  0x13   : > { %3764 = sst [smem:[#allocation9_spill]] %s3960_s23  ;;  %p1674_p8 = por %p110_p6, %p109_p5 }
  0x14   : > { %s88_s27 = ssub.s32 %s1577_s18, %s3960_s23  ;;  %s93_s28 = sadd.s32 1, %s1561_s14 }
  0x15   : > { %s90_s29 = sor.u32 %s89_s24, %s88_s27  ;;  %p173_p10 = pnand %p1316_p7, %p172_p9 }
  0x16   : > { %p91_p11 = scmp.eq.s32.totalorder %s90_s29, 0  ;;  %s1686_s4 = sand.u32 (!%p173_p10), 1, %s1557_s13  }
  0x17   : > { %176 = sbr.rel (%p173_p10) target bundleno = 443 (0x1bb), region = 28  ;;  %s1689_s5 = sshll.u32 (!%p173_p10), %s1565_s15, 1 }
  0x18   : > { %s1683_s30 = scalar_select %p91_p11, %s1561_s14, %s93_s28  }
  0x19   : > { %s1317_s6 = sshll.u32 (!%p173_p10), %s1686_s4, 9  ;;  %p205_p12 = scmp.lt.s32.totalorder (!%p173_p10), %s1689_s5, 3 }
  0x1a   : > { %s1695_s8 = sshll.u32 (!%p173_p10), %s1569_s16, 8  ;;  %s1698_s9 = sshll.u32 (!%p173_p10), %s1565_s15, 8 }
  0x1b   : > { %s3766_s0 = sld [smem:[#allocation10_spill]] (!%p173_p10)  ;;  %s236_s28 = sadd.s32 (!%p173_p10), 256, %s1698_s9 }
  0x1c   : > { %s206_s7 = scalar_select %p205_p12, %s1689_s5, 3 }
  0x1d   : > { %s3767_s1 = sld [smem:[#allocation11_spill]]  ;;  %s238_s29 = sadd.s32 256, %s1695_s8 }
  0x1e   : > { %p237_p13 = scmp.lt.s32.totalorder %s1695_s8, %s236_s28  ;;  %p239_p0 = scmp.lt.s32.totalorder %s1698_s9, %s238_s29 }
  0x1f   : > { %p1710_p2 = scmp.gt.s32.totalorder %s238_s29, 256  ;;  %s1722_s10 = scalar_lea.vmem [#allocation2], %s1317_s6 }
  0x20   : > { %p240_p1 = pnand %p239_p0, %p237_p13 }
  0x21   : > { %s207_s20 = scalar_lea.vmem %s3766_s0, %s206_s7 }
  0x22   : > { %p1714_p4 = pneg %p240_p1 }
  0x23   : > { %s212_s27 = scalar_lea.vmem %s3767_s1, %s206_s7  ;;  %s1724_s7 = scalar_lea.vmem [#allocation4], %s1317_s6 }
  0x24   : > { %p243_p5 = por %p1710_p2, %p1714_p4 }
  0x25   : > { %v1731_v0 = vld [vmem:[%s212_s27] sm:$0x3] (%p243_p5)  ;;  %v349_v6 = vlaneseq (%p243_p5)  ;;  %v352_v8 = vstv (%p243_p5), %s1698_s9  ;;  %v1583_v17 = vmov (%p243_p5), 1.0   ;;  %v1768_v25 = vstv (%p243_p5), %s1695_s8 }
  0x26   : > { %246 = sbr.rel (!%p243_p5) target bundleno = 226 (0xe2), region = 32  ;;  %v1733_v1 = vld [vmem:[%s207_s20] sm:$0x3] (%p243_p5)  ;;  %vm308_vm0 = vcmp.ne.f32.partialorder (%p243_p5), %v1731_v0, 0.0  ;;  %vm249_vm2 = vcmp.gt.f32.partialorder (%p243_p5), %v1731_v0, 6.0  ;;  %vm250_vm5 = vcmp.gt.f32.partialorder (%p243_p5), %v1731_v0, 0.0 }
  0x27   : > { %v265_v2 = vsub.f32 (%p243_p5), %v1731_v0, %v1733_v1  ;;  %v309_v3 = vsel (%p243_p5), %vm308_vm0, %v1731_v0, 1.0  ;;  %v284_v5 = vsub.f32 (%p243_p5), 0.0, %v1733_v1  ;;  %vm259_vm3 = vcmp.gt.f32.partialorder (%p243_p5), %v1733_v1, 0.0 }
  0x28   : > { %1427 = vrcp.f32 (%p243_p5), %v309_v3  ;;  %vm260_vm6 = vcmp.le.f32.partialorder (%p243_p5), %v1733_v1, 6.0  ;;  %vm263_vm7 = vcmp.gt.f32.partialorder (%p243_p5), %v1733_v1, 6.0  ;;  %v319_v10 = vand.u32 (%p243_p5), 2147483647, %v309_v3 }
  0x29   : > { %vm266_vm1 = vcmp.ne.f32.partialorder (%p243_p5), %v265_v2, 0.0  ;;  %vm1743_vm4 = vcmp.lt.f32.partialorder (%p243_p5), %v1731_v0, %v284_v5  ;;  %v350_v11 = vand.u32 (%p243_p5), 127, %v349_v6  ;;  %v1752_v12 = vsub.f32 (%p243_p5), 6.0, %v1733_v1  ;;  %vm1774_vm15 = vmand (%p243_p5), %vm249_vm2, %vm263_vm7 }
  0x2a   : > { %v267_v4 = vsel (%p243_p5), %vm266_vm1, %v265_v2, 1.0  ;;  %v1754_v14 = vshrl.u32 (%p243_p5), %v349_v6, 7  ;;  %vm257_vm8 = vcmp.le.f32.partialorder (%p243_p5), %v1733_v1, 0.0  ;;  %v1759_v18 = vsel (%p243_p5), %vm1743_vm4, 1e-05, %v1583_v17 }
  0x2b   : > { %1429 = vrcp.f32 %v267_v4  ;;  %v277_v16 = vand.u32 2147483647, %v267_v4  ;;  %vm315_vm9 = vweird.f32 %v309_v3  ;;  %v321_v19 = vand.u32 2147483648, %v309_v3 }
  0x2c   : > { %vm273_vm11 = vweird.f32 %v267_v4  ;;  %v279_v22 = vand.u32 2147483648, %v267_v4  ;;  %vm1763_vm14 = vcmp.eq.f32.partialorder %v319_v10, 8.507059e+37  ;;  %v351_v24 = vadd.s32 128, %v350_v11 }
  0x2d   : > { %v373_v29 = vadd.s32 8, %v1754_v14  ;;  %vm1779_vm1 = vcmp.eq.f32.partialorder %v277_v16, 8.507059e+37  ;;  %v322_v32 = vor.u32 1.1754944e-38, %v321_v19  ;;  %v1788_v33 = vadd.s32 %v352_v8, %v350_v11 }
  0x2e   : > { %v1428_v9 = vpop.eup %1427  ;;  %v374_v34 = vadd.s32 16, %v1754_v14  ;;  %vm1584_vm7 = vmmov 1   ;;  %v1799_v38 = vadd.s32 %v1768_v25, %v1754_v14  ;;  %v375_v39 = vadd.s32 24, %v1754_v14 }
  0x2f   : > { %v311_v13 = vmul.f32 %v1428_v9, %v309_v3  ;;  %vm316_vm12 = vweird.f32 %v1428_v9  ;;  %vm1793_vm10 = vmxor %vm249_vm2, %vm1584_vm7  ;;  %v280_v41 = vor.u32 1.1754944e-38, %v279_v22  ;;  %v1585_v42 = vmov 0.0  }
  0x30   : > { %vm1784_vm13 = vmor %vm315_vm9, %vm316_vm12  ;;  %v1809_v43 = vsel %vm1774_vm15, 6.0, %v1585_v42  ;;  %v1811_v44 = vadd.s32 %v352_v8, %v351_v24  ;;  %v376_v45 = vadd.s32 32, %v1754_v14  ;;  %v1825_v49 = vadd.s32 %v1768_v25, %v373_v29 }
  0x31   : > { %v1430_v15 = vpop.eup %1429  ;;  %v312_v21 = vsub.f32 1.0, %v311_v13  ;;  %vm1818_vm12 = vmand %vm259_vm3, %vm260_vm6  ;;  %v377_v50 = vadd.s32 40, %v1754_v14  ;;  %v1831_v52 = vadd.s32 %v1768_v25, %v374_v34  ;;  %v378_v53 = vadd.s32 48, %v1754_v14 }
  0x32   : > { %v269_v20 = vmul.f32 %v1430_v15, %v267_v4  ;;  %vm274_vm0 = vweird.f32 %v1430_v15  ;;  %v379_v54 = vadd.s32 56, %v1754_v14  ;;  %vm1839_vm3 = vmand %vm250_vm5, %vm1793_vm10  ;;  %vm3687_vm6 = vcmp.eq.s32.totalorder %v1788_v33, 256 }
  0x33   : > { %v313_v28 = vmul.f32 %v1428_v9, %v312_v21  ;;  %vm1803_vm9 = vmor %vm273_vm11, %vm274_vm0  ;;  %vm3688_vm11 = vcmp.eq.s32.totalorder %v1788_v33, %v1799_v38  ;;  %v1849_v58 = vadd.s32 %v1768_v25, %v375_v39  ;;  %vm3685_vm10 = vcmp.eq.s32.totalorder %v1811_v44, 256 }
  0x34   : > { %v270_v27 = vsub.f32 1.0, %v269_v20  ;;  %vm1855_vm5 = vmand %vm249_vm2, %vm1818_vm12  ;;  %v1867_v61 = vadd.s32 %v1768_v25, %v376_v45  ;;  %vm3684_vm15 = vcmp.eq.s32.totalorder %v1788_v33, %v1825_v49  ;;  %v1884_v3 = vadd.s32 %v1768_v25, %v377_v50 }
  0x35   : > { %v314_v37 = vadd.f32 %v1428_v9, %v313_v28  ;;  %vm3792_vm0 = vcmp.lt.f32.partialorder %v1733_v1, 0.0  ;;  %v1901_v5 = vadd.s32 %v1768_v25, %v378_v53  ;;  %v1904_v6 = vadd.s32 %v1768_v25, %v379_v54 }
  0x36   : > { %v271_v36 = vmul.f32 %v1430_v15, %v270_v27  ;;  %v380_v11 = vadd.s32 64, %v1754_v14  ;;  %v381_v16 = vadd.s32 72, %v1754_v14  ;;  %v382_v21 = vadd.s32 80, %v1754_v14 }
  0x37   : > { %v318_v48 = vsel %vm1784_vm13, %v1428_v9, %v314_v37  ;;  %vm3683_vm13 = vcmp.eq.s32.totalorder %v1811_v44, %v1799_v38  ;;  %v383_v26 = vadd.s32 88, %v1754_v14  ;;  %vm3710_vm7 = vcmp.eq.s32.totalorder %v1904_v6, 256 }
  0x38   : > { %v272_v47 = vadd.f32 %v1430_v15, %v271_v36  ;;  %v323_v51 = vsel %vm1763_vm14, %v322_v32, %v318_v48  ;;  %vm1873_vm14 = vmand %vm249_vm2, %vm257_vm8  ;;  %vm479_vm8 = vcmp.eq.s32.totalorder %v1788_v33, %v1884_v3  ;;  %v1962_v24 = vadd.s32 %v1768_v25, %v380_v11 }
  0x39   : > { %v324_v57 = vmul.f32 6.0, %v323_v51  ;;  %vm1890_vm2 = vmand %vm1839_vm3, %vm3792_vm0  ;;  %vm3690_vm0 = vcmp.eq.s32.totalorder %v1901_v5, 256  ;;  %v1971_v28 = vadd.s32 %v1768_v25, %v381_v16  ;;  %v1974_v29 = vadd.s32 96, %v1754_v14 }
  0x3a   : > { %v276_v56 = vsel %vm1803_vm9, %v1430_v15, %v272_v47  ;;  %vm3795_vm9 = vcmp.ge.f32.partialorder %v1733_v1, 0.0  ;;  %v1977_v30 = vadd.s32 104, %v1754_v14  ;;  %v2000_v40 = vadd.s32 %v1768_v25, %v382_v21 }
  0x3b   : > { %v1861_v60 = vsel %vm1779_vm1, %v280_v41, %v276_v56  ;;  %v325_v63 = vsel %vm1743_vm4, 1e-05, %v324_v57  ;;  %vm3686_vm1 = vcmp.eq.s32.totalorder %v1811_v44, %v1825_v49  ;;  %vm1910_vm12 = vmand %vm1839_vm3, %vm3795_vm9  ;;  %vm3689_vm9 = vcmp.eq.s32.totalorder %v1788_v33, %v1901_v5 }
  0x3c   : > { %v327_v2 = vmul.f32 %v1752_v12, %v1861_v60  ;;  %vm441_vm3 = vcmp.eq.s32.totalorder %v1867_v61, 256  ;;  %vm442_vm4 = vcmp.eq.s32.totalorder %v1884_v3, 256  ;;  %v2011_v42 = vadd.s32 %v1768_v25, %v383_v26 }
  0x3e   : > { %v328_v8 = vsel %vm1855_vm5, %v327_v2, 0.0  ;;  %v337_v9 = vsub.f32 1.0, %v327_v2 }
  0x3f   : > { %v329_v10 = vsel %vm1873_vm14, %v325_v63, %v328_v8 }
  0x40   : > { %v330_v13 = vsel %vm1890_vm2, %v1759_v18, %v329_v10  ;;  %v338_v15 = vmul.f32 %v337_v9, %v1733_v1 }
  0x41   : > { %v331_v17 = vsel %vm1910_vm12, 1.0, %v330_v13 }
  0x42   : > { %v339_v18 = vsel %vm1855_vm5, %v338_v15, %v1809_v43  ;;  %v1951_v19 = vperm.slane %v331_v17, 0  ;;  %v1953_v20 = vperm.slane %v331_v17, 1 }
  0x43   : > { %v358_v22 = vperm.slane %v339_v18, 0  ;;  %v359_v23 = vperm.slane %v339_v18, 1 }
  0x44   : > { %v538_v27 = vsel %vm3688_vm11, %v1951_v19, 0.0  ;;  %v539_v34 = vsel %vm3683_vm13, %v1953_v20, 0.0  ;;  %v540_v35 = vsel %vm3684_vm15, %v1951_v19, 0.0  ;;  %v541_v39 = vsel %vm3686_vm1, %v1953_v20, 0.0 }
  0x45   : > { %v362_v31 = vsel %vm3687_vm6, 1.0, %v358_v22  ;;  %v363_v32 = vsel %vm3685_vm10, 1.0, %v359_v23  ;;  %vm3798_vm13 = vcmp.eq.s32.totalorder %v1788_v33, %v1831_v52  ;;  %vm3799_vm1 = vcmp.eq.s32.totalorder %v1799_v38, 256 }
  0x46   : > { %v1991_v36 = vperm.slane %v362_v31, 0  ;;  %v1993_v37 = vperm.slane %v363_v32, 0  ;;  %v542_v41 = vsel %vm3798_vm13, %v1951_v19, 0.0  ;;  %vm3800_vm6 = vmmov %vm3799_vm1  ;;  %vm3801_vm13 = vcmp.eq.s32.totalorder %v1825_v49, 256 }
  0x47   : > { %vm3802_vm11 = vcmp.eq.s32.totalorder %v1811_v44, %v1831_v52  ;;  %vm3697_vm15 = vcmp.eq.s32.totalorder %v1788_v33, %v1971_v28  ;;  %vm3805_vm10 = vcmp.eq.s32.totalorder %v1831_v52, 256  ;;  %v548_v63 = vsel %vm479_vm8, %v1951_v19, 0.0 }
  0x48   : > { %v668_v45 = vsel %vm3799_vm1, %v1991_v36, %v538_v27  ;;  %v669_v46 = vsel %vm3800_vm6, %v1993_v37, %v539_v34  ;;  %v670_v47 = vsel %vm3801_vm13, %v1991_v36, %v540_v35  ;;  %v543_v48 = vsel %vm3802_vm11, %v1953_v20, 0.0  ;;  %vm3803_vm1 = vmmov %vm3801_vm13 }
  0x49   : > { %732 = vst [vmem:[%s1722_s10] sm:$0xff] %v668_v45  ;;  %v671_v50 = vsel %vm3803_vm1, %v1993_v37, %v541_v39  ;;  %vm3804_vm6 = vcmp.eq.s32.totalorder %v1788_v33, %v1849_v58  ;;  %vm3694_vm11 = vcmp.eq.s32.totalorder %v1811_v44, %v1971_v28  ;;  %v672_v53 = vsel %vm3805_vm10, %v1991_v36, %v542_v41 }
  0x4a   : > { %v544_v51 = vsel %vm3804_vm6, %v1951_v19, 0.0  ;;  %733 = vst [vmem:[%s1722_s10 + $0x8] sm:$0xff] %v669_v46  ;;  %vm3806_vm1 = vcmp.eq.s32.totalorder %v1811_v44, %v1849_v58  ;;  %vm3807_vm6 = vcmp.eq.s32.totalorder %v1788_v33, %v1867_v61  ;;  %vm3808_vm13 = vcmp.eq.s32.totalorder %v1811_v44, %v1867_v61 }
  0x4b   : > { %v545_v54 = vsel %vm3806_vm1, %v1953_v20, 0.0  ;;  %v546_v55 = vsel %vm3807_vm6, %v1951_v19, 0.0  ;;  %v547_v56 = vsel %vm3808_vm13, %v1953_v20, 0.0  ;;  %734 = vst [vmem:[%s1722_s10 + $0x10] sm:$0xff] %v670_v47  ;;  %v673_v57 = vsel %vm3805_vm10, %v1993_v37, %v543_v48 }
  0x4c   : > { %vm3809_vm1 = vcmp.eq.s32.totalorder %v1811_v44, %v1884_v3  ;;  %v550_v8 = vsel %vm3689_vm9, %v1951_v19, 0.0  ;;  %735 = vst [vmem:[%s1722_s10 + $0x18] sm:$0xff] %v671_v50  ;;  %vm3810_vm13 = vcmp.eq.s32.totalorder %v1849_v58, 256  ;;  %vm3811_vm6 = vcmp.eq.s32.totalorder %v1811_v44, %v1901_v5 }
  0x4d   : > { %v549_v2 = vsel %vm3809_vm1, %v1953_v20, 0.0  ;;  %v674_v9 = vsel %vm3810_vm13, %v1991_v36, %v544_v51  ;;  %v551_v10 = vsel %vm3811_vm6, %v1953_v20, 0.0  ;;  %vm3812_vm10 = vcmp.eq.s32.totalorder %v1788_v33, %v1904_v6  ;;  %736 = vst [vmem:[%s1722_s10 + $0x20] sm:$0xff] %v672_v53  ;;  %vm3813_vm9 = vmmov %vm3810_vm13 }
  0x4e   : > { %v552_v11 = vsel %vm3812_vm10, %v1951_v19, 0.0  ;;  %vm3696_vm1 = vcmp.eq.s32.totalorder %v2000_v40, 256  ;;  %v675_v13 = vsel %vm3813_vm9, %v1993_v37, %v545_v54  ;;  %v676_v15 = vsel %vm441_vm3, %v1991_v36, %v546_v55  ;;  %737 = vst [vmem:[%s1722_s10 + $0x28] sm:$0xff] %v673_v57 }
  0x4f   : > { %vm3814_vm13 = vcmp.eq.s32.totalorder %v1811_v44, %v1904_v6  ;;  %vm3691_vm6 = vcmp.eq.s32.totalorder %v1788_v33, %v2000_v40  ;;  %v677_v17 = vsel %vm441_vm3, %v1993_v37, %v547_v56  ;;  %v678_v18 = vsel %vm442_vm4, %v1991_v36, %v548_v63  ;;  %738 = vst [vmem:[%s1722_s10 + $0x30] sm:$0xff] %v674_v9 }
  0x50   : > { %v553_v16 = vsel %vm3814_vm13, %v1953_v20, 0.0  ;;  %v679_v21 = vsel %vm442_vm4, %v1993_v37, %v549_v2  ;;  %v680_v22 = vsel %vm3690_vm0, %v1991_v36, %v550_v8  ;;  %v681_v23 = vsel %vm3690_vm0, %v1993_v37, %v551_v10  ;;  %739 = vst [vmem:[%s1722_s10 + $0x38] sm:$0xff] %v675_v13 }
  0x51   : > { %v682_v26 = vsel %vm3710_vm7, %v1991_v36, %v552_v11  ;;  %vm3692_vm9 = vcmp.eq.s32.totalorder %v1811_v44, %v2000_v40  ;;  %vm3693_vm10 = vcmp.eq.s32.totalorder %v1788_v33, %v2011_v42  ;;  %v683_v27 = vsel %vm3710_vm7, %v1993_v37, %v553_v16  ;;  %740 = vst [vmem:[%s1722_s10 + $0x40] sm:$0xff] %v676_v15 }
  0x52   : > { %vm3815_vm13 = vcmp.eq.s32.totalorder %v1788_v33, %v1962_v24  ;;  %vm3816_vm0 = vcmp.eq.s32.totalorder %v1811_v44, %v1962_v24  ;;  %v556_v34 = vsel %vm3697_vm15, %v1951_v19, 0.0  ;;  %v557_v35 = vsel %vm3694_vm11, %v1953_v20, 0.0  ;;  %741 = vst [vmem:[%s1722_s10 + $0x48] sm:$0xff] %v677_v17 }
  0x53   : > { %v554_v31 = vsel %vm3815_vm13, %v1951_v19, 0.0  ;;  %v555_v32 = vsel %vm3816_vm0, %v1953_v20, 0.0  ;;  %v558_v39 = vsel %vm3691_vm6, %v1951_v19, 0.0  ;;  %vm3700_vm13 = vcmp.eq.s32.totalorder %v2011_v42, 256  ;;  %742 = vst [vmem:[%s1722_s10 + $0x50] sm:$0xff] %v678_v18 }
  0x54   : > { %v2150_v41 = vadd.s32 %v1768_v25, %v1974_v29  ;;  %v559_v45 = vsel %vm3692_vm9, %v1953_v20, 0.0  ;;  %v560_v46 = vsel %vm3693_vm10, %v1951_v19, 0.0  ;;  %v386_v47 = vadd.s32 112, %v1754_v14  ;;  %743 = vst [vmem:[%s1722_s10 + $0x58] sm:$0xff] %v679_v21 }
  0x55   : > { %v387_v48 = vadd.s32 120, %v1754_v14  ;;  %vm3817_vm0 = vcmp.eq.s32.totalorder %v1962_v24, 256  ;;  %vm3695_vm9 = vcmp.eq.s32.totalorder %v1811_v44, %v2011_v42  ;;  %v2174_v51 = vadd.s32 %v1768_v25, %v1977_v30  ;;  %744 = vst [vmem:[%s1722_s10 + $0x60] sm:$0xff] %v680_v22 }
  0x56   : > { %v684_v29 = vsel %vm3817_vm0, %v1991_v36, %v554_v31  ;;  %vm3818_vm6 = vmmov %vm3817_vm0  ;;  %vm3819_vm10 = vcmp.eq.s32.totalorder %v1971_v28, 256  ;;  %vm3699_vm0 = vcmp.eq.s32.totalorder %v1788_v33, %v2150_v41  ;;  %vm3698_vm11 = vcmp.eq.s32.totalorder %v1811_v44, %v2150_v41  ;;  %745 = vst [vmem:[%s1722_s10 + $0x68] sm:$0xff] %v681_v23 }
  0x57   : > { %v685_v50 = vsel %vm3818_vm6, %v1993_v37, %v555_v32  ;;  %v686_v53 = vsel %vm3819_vm10, %v1991_v36, %v556_v34  ;;  %v388_v54 = vadd.s32 128, %v1754_v14  ;;  %vm3820_vm6 = vmmov %vm3819_vm10  ;;  %v688_v55 = vsel %vm3696_vm1, %v1991_v36, %v558_v39  ;;  %746 = vst [vmem:[%s1722_s10 + $0x70] sm:$0xff] %v682_v26 }
  0x58   : > { %v687_v30 = vsel %vm3820_vm6, %v1993_v37, %v557_v35  ;;  %v689_v56 = vsel %vm3696_vm1, %v1993_v37, %v559_v45  ;;  %v690_v57 = vsel %vm3700_vm13, %v1991_v36, %v560_v46  ;;  %v561_v63 = vsel %vm3695_vm9, %v1953_v20, 0.0  ;;  %747 = vst [vmem:[%s1722_s10 + $0x78] sm:$0xff] %v683_v27 }
  0x59   : > { %vm3701_vm10 = vcmp.eq.s32.totalorder %v2150_v41, 256  ;;  %v2205_v2 = vadd.s32 %v1768_v25, %v386_v47  ;;  %v2208_v8 = vadd.s32 %v1768_v25, %v387_v48  ;;  %v562_v9 = vsel %vm3699_vm0, %v1951_v19, 0.0  ;;  %748 = vst [vmem:[%s1722_s10 + $0x80] sm:$0xff] %v684_v29 }
  0x5a   : > { %v563_v10 = vsel %vm3698_vm11, %v1953_v20, 0.0  ;;  %vm3709_vm6 = vcmp.eq.s32.totalorder %v1788_v33, %v2174_v51  ;;  %vm3702_vm9 = vcmp.eq.s32.totalorder %v1811_v44, %v2174_v51  ;;  %v2229_v11 = vadd.s32 %v1768_v25, %v388_v54  ;;  %749 = vst [vmem:[%s1722_s10 + $0x88] sm:$0xff] %v685_v50 }
  0x5b   : > { %vm3703_vm1 = vcmp.eq.s32.totalorder %v1788_v33, %v2205_v2  ;;  %vm3704_vm15 = vcmp.eq.s32.totalorder %v1811_v44, %v2205_v2  ;;  %v389_v13 = vadd.s32 136, %v1754_v14  ;;  %v691_v15 = vsel %vm3700_vm13, %v1993_v37, %v561_v63  ;;  %750 = vst [vmem:[%s1722_s10 + $0x90] sm:$0xff] %v686_v53 }
  0x5c   : > { %vm3706_vm11 = vcmp.eq.s32.totalorder %v2174_v51, 256  ;;  %vm3705_vm0 = vcmp.eq.s32.totalorder %v1788_v33, %v2208_v8  ;;  %v390_v16 = vadd.s32 144, %v1754_v14  ;;  %v692_v17 = vsel %vm3701_vm10, %v1991_v36, %v562_v9  ;;  %751 = vst [vmem:[%s1722_s10 + $0x98] sm:$0xff] %v687_v30 }
  0x5d   : > { %v693_v18 = vsel %vm3701_vm10, %v1993_v37, %v563_v10  ;;  %v564_v21 = vsel %vm3709_vm6, %v1951_v19, 0.0  ;;  %v565_v22 = vsel %vm3702_vm9, %v1953_v20, 0.0  ;;  %vm3707_vm13 = vcmp.eq.s32.totalorder %v2205_v2, 256  ;;  %752 = vst [vmem:[%s1722_s10 + $0xa0] sm:$0xff] %v688_v55 }
  0x5e   : > { %v566_v23 = vsel %vm3703_vm1, %v1951_v19, 0.0  ;;  %v567_v26 = vsel %vm3704_vm15, %v1953_v20, 0.0  ;;  %vm3723_vm10 = vcmp.eq.s32.totalorder %v2208_v8, 256  ;;  %v568_v27 = vsel %vm3705_vm0, %v1951_v19, 0.0  ;;  %753 = vst [vmem:[%s1722_s10 + $0xa8] sm:$0xff] %v689_v56 }
  0x5f   : > { %vm3708_vm9 = vcmp.eq.s32.totalorder %v1811_v44, %v2208_v8  ;;  %vm3724_vm1 = vcmp.eq.s32.totalorder %v1788_v33, %v2229_v11  ;;  %v2276_v31 = vadd.s32 %v1768_v25, %v389_v13  ;;  %vm3712_vm15 = vcmp.eq.s32.totalorder %v1811_v44, %v2229_v11  ;;  %754 = vst [vmem:[%s1722_s10 + $0xb0] sm:$0xff] %v690_v57 }
  0x60   : > { %v2282_v32 = vadd.s32 %v1768_v25, %v390_v16  ;;  %v391_v34 = vadd.s32 152, %v1754_v14  ;;  %v392_v35 = vadd.s32 160, %v1754_v14  ;;  %v694_v39 = vsel %vm3706_vm11, %v1991_v36, %v564_v21  ;;  %755 = vst [vmem:[%s1722_s10 + $0xb8] sm:$0xff] %v691_v15 }
  0x61   : > { %v695_v45 = vsel %vm3706_vm11, %v1993_v37, %v565_v22  ;;  %v696_v46 = vsel %vm3707_vm13, %v1991_v36, %v566_v23  ;;  %v697_v47 = vsel %vm3707_vm13, %v1993_v37, %v567_v26  ;;  %v698_v48 = vsel %vm3723_vm10, %v1991_v36, %v568_v27  ;;  %756 = vst [vmem:[%s1722_s10 + $0xc0] sm:$0xff] %v692_v17 }
  0x62   : > { %v569_v29 = vsel %vm3708_vm9, %v1953_v20, 0.0  ;;  %vm3711_vm0 = vcmp.eq.s32.totalorder %v1788_v33, %v2276_v31  ;;  %vm3713_vm11 = vcmp.eq.s32.totalorder %v1811_v44, %v2276_v31  ;;  %vm3721_vm13 = vcmp.eq.s32.totalorder %v2229_v11, 256  ;;  %757 = vst [vmem:[%s1722_s10 + $0xc8] sm:$0xff] %v693_v18 }
  0x63   : > { %v570_v50 = vsel %vm3724_vm1, %v1951_v19, 0.0  ;;  %v571_v53 = vsel %vm3712_vm15, %v1953_v20, 0.0  ;;  %vm3717_vm9 = vcmp.eq.s32.totalorder %v2276_v31, 256  ;;  %vm3715_vm6 = vcmp.eq.s32.totalorder %v1788_v33, %v2282_v32  ;;  %758 = vst [vmem:[%s1722_s10 + $0xd0] sm:$0xff] %v694_v39 }
  0x64   : > { %vm3714_vm7 = vcmp.eq.s32.totalorder %v1811_v44, %v2282_v32  ;;  %v2328_v54 = vadd.s32 %v1768_v25, %v391_v34  ;;  %v2331_v30 = vadd.s32 %v1768_v25, %v392_v35  ;;  %v572_v55 = vsel %vm3711_vm0, %v1951_v19, 0.0  ;;  %759 = vst [vmem:[%s1722_s10 + $0xd8] sm:$0xff] %v695_v45 }
  0x65   : > { %v573_v56 = vsel %vm3713_vm11, %v1953_v20, 0.0  ;;  %v393_v57 = vadd.s32 168, %v1754_v14  ;;  %v394_v63 = vadd.s32 176, %v1754_v14  ;;  %v699_v9 = vsel %vm3723_vm10, %v1993_v37, %v569_v29  ;;  %760 = vst [vmem:[%s1722_s10 + $0xe0] sm:$0xff] %v696_v46 }
  0x66   : > { %v700_v10 = vsel %vm3721_vm13, %v1991_v36, %v570_v50  ;;  %vm3720_vm0 = vcmp.eq.s32.totalorder %v2282_v32, 256  ;;  %vm3716_vm15 = vcmp.eq.s32.totalorder %v1788_v33, %v2328_v54  ;;  %v574_v13 = vsel %vm3715_vm6, %v1951_v19, 0.0  ;;  %761 = vst [vmem:[%s1722_s10 + $0xe8] sm:$0xff] %v697_v47 }
  0x67   : > { %v575_v15 = vsel %vm3714_vm7, %v1953_v20, 0.0  ;;  %vm3718_vm11 = vcmp.eq.s32.totalorder %v1811_v44, %v2328_v54  ;;  %v395_v16 = vadd.s32 184, %v1754_v14  ;;  %v701_v17 = vsel %vm3721_vm13, %v1993_v37, %v571_v53  ;;  %762 = vst [vmem:[%s1722_s10 + $0xf0] sm:$0xff] %v698_v48 }
  0x68   : > { %v702_v18 = vsel %vm3717_vm9, %v1991_v36, %v572_v55  ;;  %v703_v21 = vsel %vm3717_vm9, %v1993_v37, %v573_v56  ;;  %vm3719_vm7 = vcmp.eq.s32.totalorder %v1788_v33, %v2331_v30  ;;  %vm3722_vm6 = vcmp.eq.s32.totalorder %v2328_v54, 256  ;;  %763 = vst [vmem:[%s1722_s10 + $0xf8] sm:$0xff] %v699_v9 }
  0x69   : > { %v576_v22 = vsel %vm3716_vm15, %v1951_v19, 0.0  ;;  %v2385_v23 = vadd.s32 %v1768_v25, %v393_v57  ;;  %v2388_v26 = vadd.s32 %v1768_v25, %v394_v63  ;;  %v704_v27 = vsel %vm3720_vm0, %v1991_v36, %v574_v13  ;;  %764 = vst [vmem:[%s1722_s10 + $0x100] sm:$0xff] %v700_v10 }
  0x6a   : > { %v705_v34 = vsel %vm3720_vm0, %v1993_v37, %v575_v15  ;;  %v577_v35 = vsel %vm3718_vm11, %v1953_v20, 0.0  ;;  %vm3731_vm15 = vcmp.eq.s32.totalorder %v2331_v30, 256  ;;  %v578_v39 = vsel %vm3719_vm7, %v1951_v19, 0.0  ;;  %765 = vst [vmem:[%s1722_s10 + $0x108] sm:$0xff] %v701_v17 }
  0x6b   : > { %vm3744_vm9 = vcmp.eq.s32.totalorder %v1811_v44, %v2331_v30  ;;  %v2410_v45 = vadd.s32 %v1768_v25, %v395_v16  ;;  %v396_v46 = vadd.s32 192, %v1754_v14  ;;  %v706_v47 = vsel %vm3722_vm6, %v1991_v36, %v576_v22  ;;  %766 = vst [vmem:[%s1722_s10 + $0x110] sm:$0xff] %v702_v18 }
  0x6c   : > { %vm3733_vm11 = vcmp.eq.s32.totalorder %v1788_v33, %v2385_v23  ;;  %vm3725_vm7 = vcmp.eq.s32.totalorder %v1811_v44, %v2385_v23  ;;  %v397_v48 = vadd.s32 200, %v1754_v14  ;;  %v707_v29 = vsel %vm3722_vm6, %v1993_v37, %v577_v35  ;;  %767 = vst [vmem:[%s1722_s10 + $0x118] sm:$0xff] %v703_v21 }
  0x6d   : > { %vm3726_vm0 = vcmp.eq.s32.totalorder %v1788_v33, %v2388_v26  ;;  %vm3727_vm13 = vcmp.eq.s32.totalorder %v1811_v44, %v2388_v26  ;;  %v398_v50 = vadd.s32 208, %v1754_v14  ;;  %v708_v53 = vsel %vm3731_vm15, %v1991_v36, %v578_v39  ;;  %768 = vst [vmem:[%s1722_s10 + $0x120] sm:$0xff] %v704_v27 }
  0x6e   : > { %v579_v55 = vsel %vm3744_vm9, %v1953_v20, 0.0  ;;  %vm3728_vm6 = vcmp.eq.s32.totalorder %v2385_v23, 256  ;;  %vm3730_vm10 = vcmp.eq.s32.totalorder %v2388_v26, 256  ;;  %v580_v56 = vsel %vm3733_vm11, %v1951_v19, 0.0  ;;  %769 = vst [vmem:[%s1722_s10 + $0x128] sm:$0xff] %v705_v34 }
  0x6f   : > { %v581_v57 = vsel %vm3725_vm7, %v1953_v20, 0.0  ;;  %vm3729_vm1 = vcmp.eq.s32.totalorder %v1788_v33, %v2410_v45  ;;  %v2453_v63 = vadd.s32 %v1768_v25, %v396_v46  ;;  %v582_v9 = vsel %vm3726_vm0, %v1951_v19, 0.0  ;;  %770 = vst [vmem:[%s1722_s10 + $0x130] sm:$0xff] %v706_v47 }
  0x70   : > { %v583_v10 = vsel %vm3727_vm13, %v1953_v20, 0.0  ;;  %vm3732_vm7 = vcmp.eq.s32.totalorder %v1811_v44, %v2410_v45  ;;  %v2467_v13 = vadd.s32 %v1768_v25, %v397_v48  ;;  %v709_v15 = vsel %vm3731_vm15, %v1993_v37, %v579_v55  ;;  %771 = vst [vmem:[%s1722_s10 + $0x138] sm:$0xff] %v707_v29 }
  0x71   : > { %vm3734_vm0 = vcmp.eq.s32.totalorder %v1788_v33, %v2453_v63  ;;  %v2476_v16 = vadd.s32 %v1768_v25, %v398_v50  ;;  %v399_v17 = vadd.s32 216, %v1754_v14  ;;  %v710_v18 = vsel %vm3728_vm6, %v1991_v36, %v580_v56  ;;  %772 = vst [vmem:[%s1722_s10 + $0x140] sm:$0xff] %v708_v53 }
  0x72   : > { %v711_v21 = vsel %vm3728_vm6, %v1993_v37, %v581_v57  ;;  %vm3743_vm13 = vcmp.eq.s32.totalorder %v2410_v45, 256  ;;  %v584_v22 = vsel %vm3729_vm1, %v1951_v19, 0.0  ;;  %v712_v27 = vsel %vm3730_vm10, %v1991_v36, %v582_v9  ;;  %773 = vst [vmem:[%s1722_s10 + $0x148] sm:$0xff] %v709_v15 }
  0x73   : > { %v713_v34 = vsel %vm3730_vm10, %v1993_v37, %v583_v10  ;;  %v585_v35 = vsel %vm3732_vm7, %v1953_v20, 0.0  ;;  %vm3735_vm6 = vcmp.eq.s32.totalorder %v1811_v44, %v2453_v63  ;;  %vm3740_vm1 = vcmp.eq.s32.totalorder %v2453_v63, 256  ;;  %774 = vst [vmem:[%s1722_s10 + $0x150] sm:$0xff] %v710_v18 }
  0x74   : > { %v586_v39 = vsel %vm3734_vm0, %v1951_v19, 0.0  ;;  %vm3739_vm10 = vcmp.eq.s32.totalorder %v1788_v33, %v2467_v13  ;;  %vm3736_vm15 = vcmp.eq.s32.totalorder %v1811_v44, %v2467_v13  ;;  %v714_v46 = vsel %vm3743_vm13, %v1991_v36, %v584_v22  ;;  %775 = vst [vmem:[%s1722_s10 + $0x158] sm:$0xff] %v711_v21 }
  0x75   : > { %vm3738_vm7 = vcmp.eq.s32.totalorder %v1788_v33, %v2476_v16  ;;  %vm3737_vm11 = vcmp.eq.s32.totalorder %v1811_v44, %v2476_v16  ;;  %v2523_v47 = vadd.s32 %v1768_v25, %v399_v17  ;;  %v715_v48 = vsel %vm3743_vm13, %v1993_v37, %v585_v35  ;;  %776 = vst [vmem:[%s1722_s10 + $0x160] sm:$0xff] %v712_v27 }
  0x76   : > { %v587_v29 = vsel %vm3735_vm6, %v1953_v20, 0.0  ;;  %v400_v50 = vadd.s32 224, %v1754_v14  ;;  %v401_v53 = vadd.s32 232, %v1754_v14  ;;  %v716_v55 = vsel %vm3740_vm1, %v1991_v36, %v586_v39  ;;  %777 = vst [vmem:[%s1722_s10 + $0x168] sm:$0xff] %v713_v34 }
  0x77   : > { %vm3741_vm0 = vcmp.eq.s32.totalorder %v2467_v13, 256  ;;  %v588_v56 = vsel %vm3739_vm10, %v1951_v19, 0.0  ;;  %v589_v57 = vsel %vm3736_vm15, %v1953_v20, 0.0  ;;  %vm3742_vm6 = vcmp.eq.s32.totalorder %v2476_v16, 256  ;;  %778 = vst [vmem:[%s1722_s10 + $0x170] sm:$0xff] %v714_v46 }
  0x78   : > { %v590_v9 = vsel %vm3738_vm7, %v1951_v19, 0.0  ;;  %v591_v10 = vsel %vm3737_vm11, %v1953_v20, 0.0  ;;  %v2559_v15 = vadd.s32 %v1768_v25, %v400_v50  ;;  %vm523_vm15 = vcmp.eq.s32.totalorder %v1788_v33, %v2523_v47  ;;  %779 = vst [vmem:[%s1722_s10 + $0x178] sm:$0xff] %v715_v48 }
  0x79   : > { %v2565_v17 = vadd.s32 %v1768_v25, %v401_v53  ;;  %v402_v18 = vadd.s32 240, %v1754_v14  ;;  %v403_v21 = vadd.s32 248, %v1754_v14  ;;  %v717_v22 = vsel %vm3740_vm1, %v1993_v37, %v587_v29  ;;  %780 = vst [vmem:[%s1722_s10 + $0x180] sm:$0xff] %v716_v55 }
  0x7a   : > { %vm3745_vm11 = vcmp.eq.s32.totalorder %v1811_v44, %v2523_v47  ;;  %v718_v27 = vsel %vm3741_vm0, %v1991_v36, %v588_v56  ;;  %v719_v34 = vsel %vm3741_vm0, %v1993_v37, %v589_v57  ;;  %vm3747_vm7 = vcmp.eq.s32.totalorder %v1788_v33, %v2559_v15  ;;  %781 = vst [vmem:[%s1722_s10 + $0x188] sm:$0xff] %v717_v22 }
  0x7b   : > { %vm3746_vm10 = vcmp.eq.s32.totalorder %v1811_v44, %v2559_v15  ;;  %v720_v14 = vsel %vm3742_vm6, %v1991_v36, %v590_v9  ;;  %v721_v35 = vsel %vm3742_vm6, %v1993_v37, %v591_v10  ;;  %vm3749_vm1 = vcmp.eq.s32.totalorder %v2523_v47, 256  ;;  %782 = vst [vmem:[%s1722_s10 + $0x190] sm:$0xff] %v718_v27 }
  0x7c   : > { %v592_v39 = vsel %vm523_vm15, %v1951_v19, 0.0  ;;  %v593_v46 = vsel %vm3745_vm11, %v1953_v20, 0.0  ;;  %vm3748_vm0 = vcmp.eq.s32.totalorder %v1788_v33, %v2565_v17  ;;  %v2606_v48 = vadd.s32 %v1768_v25, %v402_v18  ;;  %783 = vst [vmem:[%s1722_s10 + $0x198] sm:$0xff] %v719_v34 }
  0x7d   : > { %v2609_v29 = vadd.s32 %v1768_v25, %v403_v21  ;;  %vm3750_vm6 = vcmp.eq.s32.totalorder %v2559_v15, 256  ;;  %v594_v50 = vsel %vm3747_vm7, %v1951_v19, 0.0  ;;  %v595_v53 = vsel %vm3746_vm10, %v1953_v20, 0.0  ;;  %784 = vst [vmem:[%s1722_s10 + $0x1a0] sm:$0xff] %v720_v14 }
  0x7e   : > { %vm528_vm13 = vcmp.eq.s32.totalorder %v1811_v44, %v2565_v17  ;;  %v722_v25 = vsel %vm3749_vm1, %v1991_v36, %v592_v39  ;;  %vm529_vm9 = vcmp.eq.s32.totalorder %v1788_v33, %v2606_v48  ;;  %vm290_vm11 = vcmp.ne.f32.partialorder %v1752_v12, 0.0  ;;  %785 = vst [vmem:[%s1722_s10 + $0x1a8] sm:$0xff] %v721_v35 }
  0x7f   : > { %v723_v55 = vsel %vm3749_vm1, %v1993_v37, %v593_v46  ;;  %vm466_vm10 = vcmp.eq.s32.totalorder %v2565_v17, 256  ;;  %v596_v56 = vsel %vm3748_vm0, %v1951_v19, 0.0  ;;  %vm3753_vm7 = vcmp.eq.s32.totalorder %v1811_v44, %v2606_v48  ;;  %786 = vst [vmem:[%s1722_s10 + $0x1b0] sm:$0xff] %v722_v25 }
  0x80   : > { %v724_v57 = vsel %vm3750_vm6, %v1991_v36, %v594_v50  ;;  %v725_v9 = vsel %vm3750_vm6, %v1993_v37, %v595_v53  ;;  %v597_v10 = vsel %vm528_vm13, %v1953_v20, 0.0  ;;  %vm3752_vm0 = vcmp.eq.s32.totalorder %v1788_v33, %v2609_v29  ;;  %787 = vst [vmem:[%s1722_s10 + $0x1b8] sm:$0xff] %v723_v55 }
  0x81   : > { %vm3754_vm1 = vcmp.eq.s32.totalorder %v2606_v48, 256  ;;  %v598_v18 = vsel %vm529_vm9, %v1951_v19, 0.0  ;;  %vm3751_vm6 = vcmp.eq.s32.totalorder %v1811_v44, %v2609_v29  ;;  %v291_v21 = vsel %vm290_vm11, %v1752_v12, 1.0  ;;  %788 = vst [vmem:[%s1722_s10 + $0x1c0] sm:$0xff] %v724_v57 }
  0x82   : > { %v726_v22 = vsel %vm466_vm10, %v1991_v36, %v596_v56  ;;  %v599_v27 = vsel %vm3753_vm7, %v1953_v20, 0.0  ;;  %1431 = vrcp.f32 %v291_v21  ;;  %v727_v34 = vsel %vm466_vm10, %v1993_v37, %v597_v10  ;;  %789 = vst [vmem:[%s1722_s10 + $0x1c8] sm:$0xff] %v725_v9 }
  0x83   : > { %vm3755_vm11 = vcmp.eq.s32.totalorder %v2609_v29, 256  ;;  %v600_v14 = vsel %vm3752_vm0, %v1951_v19, 0.0  ;;  %v728_v35 = vsel %vm3754_vm1, %v1991_v36, %v598_v18  ;;  %v601_v39 = vsel %vm3751_vm6, %v1953_v20, 0.0  ;;  %790 = vst [vmem:[%s1722_s10 + $0x1d0] sm:$0xff] %v726_v22 }
  0x84   : > { %v729_v46 = vsel %vm3754_vm1, %v1993_v37, %v599_v27  ;;  %v1323_v50 = vadd.f32 -6.0, %v1731_v0  ;;  %791 = vst [vmem:[%s1722_s10 + $0x1d8] sm:$0xff] %v727_v34  ;;  %v730_v19 = vsel %vm3755_vm11, %v1991_v36, %v600_v14  ;;  %v731_v53 = vsel %vm3755_vm11, %v1993_v37, %v601_v39 }
  0x85   : > { %792 = vst [vmem:[%s1722_s10 + $0x1e0] sm:$0xff] %v728_v35  ;;  %v303_v55 = vand.u32 2147483648, %v291_v21  ;;  %vm297_vm0 = vweird.f32 %v291_v21  ;;  %v301_v57 = vand.u32 2147483647, %v291_v21  ;;  %v1586_v9 = vmov 1e-05  }
  0x86   : > { %793 = vst [vmem:[%s1722_s10 + $0x1e8] sm:$0xff] %v729_v46  ;;  %vm289_vm6 = vcmp.lt.f32.partialorder %v1323_v50, %v1752_v12  ;;  %v283_v37 = vmul.f32 %v1861_v60, %v1731_v0 }
  0x87   : > { %794 = vst [vmem:[%s1722_s10 + $0x1f0] sm:$0xff] %v730_v19  ;;  %v326_v36 = vsel %vm289_vm6, 1.0, %v1586_v9  ;;  %v304_v18 = vor.u32 1.1754944e-38, %v303_v55  ;;  %vm302_vm11 = vcmp.eq.f32.partialorder %v301_v57, 8.507059e+37 }
  0x88   : > { %v1432_v25 = vpop.eup %1431  ;;  %795 = vst [vmem:[%s1722_s10 + $0x1f8] sm:$0xff] %v731_v53  ;;  %v344_v27 = vsub.f32 1.0, %v326_v36  ;;  %v332_v39 = vsel %vm1855_vm5, %v326_v36, 0.0 }
  0x89   : > { %v293_v20 = vmul.f32 %v1432_v25, %v291_v21  ;;  %vm298_vm7 = vweird.f32 %v1432_v25  ;;  %v340_v21 = vsub.f32 0.0, %v283_v37 }
  0x8a   : > { %vm299_vm1 = vmor %vm297_vm0, %vm298_vm7  ;;  %v345_v46 = vmul.f32 6.0, %v344_v27  ;;  %vm3822_vm7 = vcmp.eq.s32.totalorder %v1788_v33, 256  ;;  %vm3827_vm0 = vcmp.eq.s32.totalorder %v1788_v33, %v1831_v52 }
  0x8b   : > { %v294_v56 = vsub.f32 1.0, %v293_v20  ;;  %v341_v60 = vmul.f32 %v340_v21, %v1733_v1 }
  0x8d   : > { %v295_v10 = vmul.f32 %v1432_v25, %v294_v56 }
  0x8f   : > { %v296_v22 = vadd.f32 %v1432_v25, %v295_v10 }
  0x91   : > { %v300_v34 = vsel %vm299_vm1, %v1432_v25, %v296_v22  ;;  %v346_v25 = vsel %vm1855_vm5, %v345_v46, %v1809_v43  ;;  %vm3821_vm5 = vcmp.eq.s32.totalorder %v1788_v33, %v1799_v38  ;;  %vm3826_vm1 = vcmp.eq.s32.totalorder %v1811_v44, %v1825_v49 }
  0x92   : > { %v305_v14 = vsel %vm302_vm11, %v304_v18, %v300_v34 }
  0x93   : > { %v306_v35 = vmul.f32 6.0, %v305_v14 }
  0x95   : > { %v307_v19 = vsel %vm289_vm6, %v306_v35, 1e-05  ;;  %vm3828_vm6 = vcmp.eq.s32.totalorder %v1799_v38, 256 }
  0x96   : > { %v333_v53 = vsel %vm1873_vm14, %v307_v19, %v332_v39  ;;  %v342_v20 = vsub.f32 1.0, %v307_v19  ;;  %vm3829_vm11 = vmmov %vm3828_vm6 }
  0x97   : > { %v334_v0 = vsel %vm1890_vm2, %v283_v37, %v333_v53 }
  0x98   : > { %v335_v55 = vsel %vm1910_vm12, 1.0, %v334_v0  ;;  %v343_v56 = vmul.f32 6.0, %v342_v20  ;;  %vm3823_vm12 = vcmp.eq.s32.totalorder %v1811_v44, 256 }
  0x99   : > { %v2723_v57 = vperm.slane %v335_v55, 0  ;;  %v2727_v50 = vperm.slane %v335_v55, 1 }
  0x9a   : > { %v347_v12 = vsel %vm1873_vm14, %v343_v56, %v346_v25  ;;  %vm3824_vm14 = vcmp.eq.s32.totalorder %v1811_v44, %v1799_v38 }
  0x9b   : > { %v348_v9 = vsel %vm1890_vm2, %v341_v60, %v347_v12  ;;  %v801_v43 = vsel %vm3821_vm5, %v2723_v57, 0.0  ;;  %v802_v4 = vsel %vm3824_vm14, %v2727_v50, 0.0  ;;  %vm3825_vm2 = vcmp.eq.s32.totalorder %v1788_v33, %v1825_v49 }
  0x9c   : > { %v365_v1 = vperm.slane %v348_v9, 0  ;;  %v366_v36 = vperm.slane %v348_v9, 1  ;;  %v803_v7 = vsel %vm3825_vm2, %v2723_v57, 0.0  ;;  %v804_v37 = vsel %vm3826_vm1, %v2727_v50, 0.0 }
  0x9d   : > { %v805_v22 = vsel %vm3827_vm0, %v2723_v57, 0.0  ;;  %vm3830_vm5 = vcmp.eq.s32.totalorder %v1825_v49, 256  ;;  %vm3833_vm14 = vcmp.eq.s32.totalorder %v1788_v33, %v1849_v58  ;;  %vm3834_vm2 = vcmp.eq.s32.totalorder %v1831_v52, 256 }
  0x9e   : > { %v369_v59 = vsel %vm3822_vm7, 1.0, %v365_v1  ;;  %v370_v62 = vsel %vm3823_vm12, 1.0, %v366_v36  ;;  %vm3831_vm7 = vcmp.eq.s32.totalorder %v1811_v44, %v1831_v52  ;;  %vm3832_vm12 = vmmov %vm3830_vm5  ;;  %v807_v38 = vsel %vm3833_vm14, %v2723_v57, 0.0 }
  0x9f   : > { %v2747_v10 = vperm.slane %v369_v59, 0  ;;  %v2749_v18 = vperm.slane %v370_v62, 0  ;;  %v806_v35 = vsel %vm3831_vm7, %v2727_v50, 0.0  ;;  %vm3835_vm1 = vcmp.eq.s32.totalorder %v1811_v44, %v1849_v58  ;;  %vm3836_vm0 = vmmov %vm3834_vm2 }
  0xa0   : > { %v808_v46 = vsel %vm3835_vm1, %v2727_v50, 0.0  ;;  %v811_v0 = vsel %vm479_vm8, %v2723_v57, 0.0  ;;  %vm3842_vm8 = vcmp.eq.s32.totalorder %v1788_v33, %v1901_v5  ;;  %vm3843_vm14 = vcmp.eq.s32.totalorder %v1811_v44, %v1901_v5 }
  0xa1   : > { %v867_v27 = vsel %vm3828_vm6, %v2747_v10, %v801_v43  ;;  %v868_v34 = vsel %vm3829_vm11, %v2749_v18, %v802_v4  ;;  %v869_v14 = vsel %vm3830_vm5, %v2747_v10, %v803_v7  ;;  %v870_v39 = vsel %vm3832_vm12, %v2749_v18, %v804_v37 }
  0xa2   : > { %931 = vst [vmem:[%s1724_s7] sm:$0xff] %v867_v27  ;;  %v871_v21 = vsel %vm3834_vm2, %v2747_v10, %v805_v22  ;;  %v872_v49 = vsel %vm3836_vm0, %v2749_v18, %v806_v35  ;;  %vm3837_vm6 = vcmp.eq.s32.totalorder %v1788_v33, %v1867_v61  ;;  %vm3838_vm11 = vcmp.eq.s32.totalorder %v1849_v58, 256 }
  0xa3   : > { %932 = vst [vmem:[%s1724_s7 + $0x8] sm:$0xff] %v868_v34  ;;  %v809_v19 = vsel %vm3837_vm6, %v2723_v57, 0.0  ;;  %v873_v53 = vsel %vm3838_vm11, %v2747_v10, %v807_v38  ;;  %vm3839_vm5 = vcmp.eq.s32.totalorder %v1811_v44, %v1867_v61  ;;  %vm3840_vm7 = vmmov %vm3838_vm11  ;;  %vm3841_vm12 = vcmp.eq.s32.totalorder %v1811_v44, %v1884_v3 }
  0xa4   : > { %933 = vst [vmem:[%s1724_s7 + $0x10] sm:$0xff] %v869_v14  ;;  %v810_v20 = vsel %vm3839_vm5, %v2727_v50, 0.0  ;;  %v874_v52 = vsel %vm3840_vm7, %v2749_v18, %v808_v46  ;;  %v875_v60 = vsel %vm441_vm3, %v2747_v10, %v809_v19  ;;  %v812_v25 = vsel %vm3841_vm12, %v2727_v50, 0.0 }
  0xa5   : > { %934 = vst [vmem:[%s1724_s7 + $0x18] sm:$0xff] %v870_v39  ;;  %v876_v58 = vsel %vm441_vm3, %v2749_v18, %v810_v20  ;;  %v813_v55 = vsel %vm3842_vm8, %v2723_v57, 0.0  ;;  %v877_v56 = vsel %vm442_vm4, %v2747_v10, %v811_v0  ;;  %v814_v12 = vsel %vm3843_vm14, %v2727_v50, 0.0 }
  0xa6   : > { %935 = vst [vmem:[%s1724_s7 + $0x20] sm:$0xff] %v871_v21  ;;  %v878_v61 = vsel %vm442_vm4, %v2749_v18, %v812_v25  ;;  %vm3844_vm3 = vcmp.eq.s32.totalorder %v1788_v33, %v1904_v6  ;;  %vm3845_vm2 = vcmp.eq.s32.totalorder %v1901_v5, 256  ;;  %vm3846_vm1 = vcmp.eq.s32.totalorder %v1811_v44, %v1904_v6 }
  0xa7   : > { %936 = vst [vmem:[%s1724_s7 + $0x28] sm:$0xff] %v872_v49  ;;  %v815_v9 = vsel %vm3844_vm3, %v2723_v57, 0.0  ;;  %v879_v1 = vsel %vm3845_vm2, %v2747_v10, %v813_v55  ;;  %v816_v36 = vsel %vm3846_vm1, %v2727_v50, 0.0  ;;  %vm3847_vm4 = vmmov %vm3845_vm2  ;;  %vm3848_vm0 = vcmp.eq.s32.totalorder %v1788_v33, %v1962_v24 }
  0xa8   : > { %937 = vst [vmem:[%s1724_s7 + $0x30] sm:$0xff] %v873_v53  ;;  %v880_v3 = vsel %vm3847_vm4, %v2749_v18, %v814_v12  ;;  %v817_v43 = vsel %vm3848_vm0, %v2723_v57, 0.0  ;;  %vm3849_vm6 = vcmp.eq.s32.totalorder %v1904_v6, 256  ;;  %vm3850_vm11 = vcmp.eq.s32.totalorder %v1811_v44, %v1962_v24 }
  0xa9   : > { %938 = vst [vmem:[%s1724_s7 + $0x38] sm:$0xff] %v874_v52  ;;  %v881_v59 = vsel %vm3849_vm6, %v2747_v10, %v815_v9  ;;  %v818_v62 = vsel %vm3850_vm11, %v2727_v50, 0.0  ;;  %vm3851_vm5 = vmmov %vm3849_vm6  ;;  %vm3852_vm7 = vcmp.eq.s32.totalorder %v1788_v33, %v1971_v28  ;;  %vm3853_vm12 = vcmp.eq.s32.totalorder %v1962_v24, 256 }
  0xaa   : > { %939 = vst [vmem:[%s1724_s7 + $0x40] sm:$0xff] %v875_v60  ;;  %v882_v5 = vsel %vm3851_vm5, %v2749_v18, %v816_v36  ;;  %v819_v4 = vsel %vm3852_vm7, %v2723_v57, 0.0  ;;  %v883_v7 = vsel %vm3853_vm12, %v2747_v10, %v817_v43  ;;  %vm3854_vm8 = vcmp.eq.s32.totalorder %v1811_v44, %v1971_v28  ;;  %vm3855_vm14 = vmmov %vm3853_vm12 }
  0xab   : > { %940 = vst [vmem:[%s1724_s7 + $0x48] sm:$0xff] %v876_v58  ;;  %v820_v37 = vsel %vm3854_vm8, %v2727_v50, 0.0  ;;  %v884_v6 = vsel %vm3855_vm14, %v2749_v18, %v818_v62  ;;  %vm3856_vm3 = vcmp.eq.s32.totalorder %v1788_v33, %v2000_v40  ;;  %vm3857_vm2 = vcmp.eq.s32.totalorder %v1971_v28, 256 }
  0xac   : > { %941 = vst [vmem:[%s1724_s7 + $0x50] sm:$0xff] %v877_v56  ;;  %v821_v22 = vsel %vm3856_vm3, %v2723_v57, 0.0  ;;  %v885_v27 = vsel %vm3857_vm2, %v2747_v10, %v819_v4  ;;  %vm3858_vm1 = vcmp.eq.s32.totalorder %v1811_v44, %v2000_v40  ;;  %vm3859_vm4 = vmmov %vm3857_vm2  ;;  %vm3860_vm0 = vcmp.eq.s32.totalorder %v1788_v33, %v2011_v42 }
  0xad   : > { %942 = vst [vmem:[%s1724_s7 + $0x58] sm:$0xff] %v878_v61  ;;  %v822_v34 = vsel %vm3858_vm1, %v2727_v50, 0.0  ;;  %v886_v24 = vsel %vm3859_vm4, %v2749_v18, %v820_v37  ;;  %v823_v14 = vsel %vm3860_vm0, %v2723_v57, 0.0  ;;  %vm3861_vm6 = vcmp.eq.s32.totalorder %v2000_v40, 256 }
  0xae   : > { %943 = vst [vmem:[%s1724_s7 + $0x60] sm:$0xff] %v879_v1  ;;  %v887_v35 = vsel %vm3861_vm6, %v2747_v10, %v821_v22  ;;  %vm3862_vm11 = vcmp.eq.s32.totalorder %v1811_v44, %v2011_v42  ;;  %vm3863_vm5 = vcmp.eq.s32.totalorder %v1788_v33, %v2150_v41  ;;  %vm3864_vm7 = vcmp.eq.s32.totalorder %v1811_v44, %v2150_v41  ;;  %vm3865_vm12 = vmmov %vm3861_vm6 }
  0xaf   : > { %944 = vst [vmem:[%s1724_s7 + $0x68] sm:$0xff] %v880_v3  ;;  %v824_v39 = vsel %vm3862_vm11, %v2727_v50, 0.0  ;;  %v825_v28 = vsel %vm3863_vm5, %v2723_v57, 0.0  ;;  %v826_v38 = vsel %vm3864_vm7, %v2727_v50, 0.0  ;;  %v888_v21 = vsel %vm3865_vm12, %v2749_v18, %v822_v34 }
  0xb0   : > { %945 = vst [vmem:[%s1724_s7 + $0x70] sm:$0xff] %v881_v59  ;;  %vm3866_vm8 = vcmp.eq.s32.totalorder %v1788_v33, %v2174_v51  ;;  %vm3867_vm14 = vcmp.eq.s32.totalorder %v1811_v44, %v2174_v51  ;;  %vm3868_vm3 = vcmp.eq.s32.totalorder %v2011_v42, 256  ;;  %vm3870_vm1 = vcmp.eq.s32.totalorder %v2150_v41, 256 }
  0xb1   : > { %946 = vst [vmem:[%s1724_s7 + $0x78] sm:$0xff] %v882_v5  ;;  %v827_v46 = vsel %vm3866_vm8, %v2723_v57, 0.0  ;;  %v828_v49 = vsel %vm3867_vm14, %v2727_v50, 0.0  ;;  %v889_v19 = vsel %vm3868_vm3, %v2747_v10, %v823_v14  ;;  %vm3869_vm2 = vmmov %vm3868_vm3  ;;  %v891_v53 = vsel %vm3870_vm1, %v2747_v10, %v825_v28 }
  0xb2   : > { %947 = vst [vmem:[%s1724_s7 + $0x80] sm:$0xff] %v883_v7  ;;  %v890_v40 = vsel %vm3869_vm2, %v2749_v18, %v824_v39  ;;  %vm3871_vm4 = vmmov %vm3870_vm1  ;;  %vm3872_vm0 = vcmp.eq.s32.totalorder %v2174_v51, 256  ;;  %v855_v42 = vsel %vm523_vm15, %v2723_v57, 0.0  ;;  %vm3874_vm11 = vcmp.eq.s32.totalorder %v1811_v44, %v2523_v47 }
  0xb3   : > { %948 = vst [vmem:[%s1724_s7 + $0x88] sm:$0xff] %v884_v6  ;;  %v892_v20 = vsel %vm3871_vm4, %v2749_v18, %v826_v38  ;;  %v893_v52 = vsel %vm3872_vm0, %v2747_v10, %v827_v46  ;;  %vm3873_vm6 = vmmov %vm3872_vm0  ;;  %v856_v41 = vsel %vm3874_vm11, %v2727_v50, 0.0  ;;  %vm3875_vm5 = vcmp.eq.s32.totalorder %v1788_v33, %v2205_v2 }
  0xb4   : > { %949 = vst [vmem:[%s1724_s7 + $0x90] sm:$0xff] %v885_v27  ;;  %v894_v0 = vsel %vm3873_vm6, %v2749_v18, %v828_v49  ;;  %v829_v60 = vsel %vm3875_vm5, %v2723_v57, 0.0  ;;  %vm3876_vm7 = vcmp.eq.s32.totalorder %v2523_v47, 256  ;;  %vm3878_vm12 = vcmp.eq.s32.totalorder %v1788_v33, %v2559_v15 }
  0xb5   : > { %950 = vst [vmem:[%s1724_s7 + $0x98] sm:$0xff] %v886_v24  ;;  %v2973_v51 = vsel %vm3876_vm7, %v2747_v10, %v855_v42  ;;  %vm3877_vm15 = vmmov %vm3876_vm7  ;;  %v857_v58 = vsel %vm3878_vm12, %v2723_v57, 0.0  ;;  %vm3879_vm8 = vcmp.eq.s32.totalorder %v1811_v44, %v2205_v2  ;;  %vm3880_vm14 = vcmp.eq.s32.totalorder %v2559_v15, 256 }
  0xb6   : > { %951 = vst [vmem:[%s1724_s7 + $0xa0] sm:$0xff] %v887_v35  ;;  %v2978_v25 = vsel %vm3877_vm15, %v2749_v18, %v856_v41  ;;  %v830_v55 = vsel %vm3879_vm8, %v2727_v50, 0.0  ;;  %v2992_v56 = vsel %vm3880_vm14, %v2747_v10, %v857_v58  ;;  %vm3881_vm3 = vcmp.eq.s32.totalorder %v1811_v44, %v2559_v15  ;;  %vm3884_vm4 = vmmov %vm3880_vm14 }
  0xb7   : > { %952 = vst [vmem:[%s1724_s7 + $0xa8] sm:$0xff] %v888_v21  ;;  %v858_v47 = vsel %vm3881_vm3, %v2727_v50, 0.0  ;;  %vm3882_vm2 = vcmp.eq.s32.totalorder %v1788_v33, %v2565_v17  ;;  %vm3883_vm1 = vcmp.eq.s32.totalorder %v1788_v33, %v2208_v8  ;;  %v860_v36 = vsel %vm528_vm13, %v2727_v50, 0.0 }
  0xb8   : > { %953 = vst [vmem:[%s1724_s7 + $0xb0] sm:$0xff] %v889_v19  ;;  %v859_v12 = vsel %vm3882_vm2, %v2723_v57, 0.0  ;;  %v831_v61 = vsel %vm3883_vm1, %v2723_v57, 0.0  ;;  %v3010_v9 = vsel %vm3884_vm4, %v2749_v18, %v858_v47  ;;  %vm3885_vm0 = vcmp.eq.s32.totalorder %v2205_v2, 256 }
  0xb9   : > { %954 = vst [vmem:[%s1724_s7 + $0xb8] sm:$0xff] %v890_v40  ;;  %v3015_v1 = vsel %vm466_vm10, %v2747_v10, %v859_v12  ;;  %v895_v3 = vsel %vm3885_vm0, %v2747_v10, %v829_v60  ;;  %vm3886_vm6 = vcmp.eq.s32.totalorder %v1811_v44, %v2208_v8  ;;  %v3032_v43 = vsel %vm466_vm10, %v2749_v18, %v860_v36  ;;  %vm3887_vm13 = vmmov %vm3885_vm0 }
  0xba   : > { %955 = vst [vmem:[%s1724_s7 + $0xc0] sm:$0xff] %v891_v53  ;;  %v832_v15 = vsel %vm3886_vm6, %v2727_v50, 0.0  ;;  %v861_v59 = vsel %vm529_vm9, %v2723_v57, 0.0  ;;  %v896_v62 = vsel %vm3887_vm13, %v2749_v18, %v830_v55  ;;  %vm3888_vm11 = vcmp.eq.s32.totalorder %v1788_v33, %v2229_v11 }
  0xbb   : > { %956 = vst [vmem:[%s1724_s7 + $0xc8] sm:$0xff] %v892_v20  ;;  %v833_v5 = vsel %vm3888_vm11, %v2723_v57, 0.0  ;;  %vm3889_vm10 = vcmp.eq.s32.totalorder %v2606_v48, 256  ;;  %vm3890_vm9 = vcmp.eq.s32.totalorder %v1811_v44, %v2606_v48  ;;  %vm3891_vm5 = vcmp.eq.s32.totalorder %v2208_v8, 256 }
  0xbc   : > { %957 = vst [vmem:[%s1724_s7 + $0xd0] sm:$0xff] %v893_v52  ;;  %v3049_v17 = vsel %vm3889_vm10, %v2747_v10, %v861_v59  ;;  %v862_v4 = vsel %vm3890_vm9, %v2727_v50, 0.0  ;;  %v897_v2 = vsel %vm3891_vm5, %v2747_v10, %v831_v61  ;;  %vm3892_vm7 = vcmp.eq.s32.totalorder %v1811_v44, %v2229_v11  ;;  %vm3893_vm15 = vmmov %vm3889_vm10 }
  0xbd   : > { %958 = vst [vmem:[%s1724_s7 + $0xd8] sm:$0xff] %v894_v0  ;;  %v834_v7 = vsel %vm3892_vm7, %v2727_v50, 0.0  ;;  %v3066_v37 = vsel %vm3893_vm15, %v2749_v18, %v862_v4  ;;  %vm3894_vm12 = vcmp.eq.s32.totalorder %v1788_v33, %v2609_v29  ;;  %vm3895_vm8 = vmmov %vm3891_vm5  ;;  %vm3896_vm14 = vcmp.eq.s32.totalorder %v1788_v33, %v2276_v31 }
  0xbe   : > { %v863_v6 = vsel %vm3894_vm12, %v2723_v57, 0.0  ;;  %959 = vst [vmem:[%s1724_s7 + $0xe0] sm:$0xff] %v895_v3  ;;  %v898_v22 = vsel %vm3895_vm8, %v2749_v18, %v832_v15  ;;  %v835_v27 = vsel %vm3896_vm14, %v2723_v57, 0.0  ;;  %vm3897_vm3 = vcmp.eq.s32.totalorder %v2609_v29, 256 }
  0xbf   : > { %v3083_v48 = vsel %vm3897_vm3, %v2747_v10, %v863_v6  ;;  %vm3898_vm2 = vcmp.eq.s32.totalorder %v1811_v44, %v2609_v29  ;;  %960 = vst [vmem:[%s1724_s7 + $0xe8] sm:$0xff] %v896_v62  ;;  %vm3899_vm1 = vcmp.eq.s32.totalorder %v2229_v11, 256  ;;  %vm3900_vm4 = vcmp.eq.s32.totalorder %v1811_v44, %v2276_v31  ;;  %vm3901_vm0 = vmmov %vm3897_vm3 }
  0xc0   : > { %v864_v34 = vsel %vm3898_vm2, %v2727_v50, 0.0  ;;  %v899_v8 = vsel %vm3899_vm1, %v2747_v10, %v833_v5  ;;  %v836_v24 = vsel %vm3900_vm4, %v2727_v50, 0.0  ;;  %961 = vst [vmem:[%s1724_s7 + $0xf0] sm:$0xff] %v897_v2  ;;  %vm3902_vm6 = vmmov %vm3899_vm1  ;;  %vm3903_vm13 = vcmp.eq.s32.totalorder %v1788_v33, %v2282_v32 }
  0xc1   : > { %v3100_v14 = vsel %vm3901_vm0, %v2749_v18, %v864_v34  ;;  %v900_v35 = vsel %vm3902_vm6, %v2749_v18, %v834_v7  ;;  %v837_v39 = vsel %vm3903_vm13, %v2723_v57, 0.0  ;;  %962 = vst [vmem:[%s1724_s7 + $0xf8] sm:$0xff] %v898_v22  ;;  %vm3904_vm11 = vcmp.eq.s32.totalorder %v2276_v31, 256 }
  0xc2   : > { %v901_v28 = vsel %vm3904_vm11, %v2747_v10, %v835_v27  ;;  %vm3905_vm10 = vcmp.eq.s32.totalorder %v1811_v44, %v2282_v32  ;;  %963 = vst [vmem:[%s1724_s7 + $0x100] sm:$0xff] %v899_v8  ;;  %vm3906_vm9 = vmmov %vm3904_vm11  ;;  %vm3907_vm5 = vcmp.eq.s32.totalorder %v1788_v33, %v2328_v54  ;;  %vm3908_vm7 = vcmp.eq.s32.totalorder %v2282_v32, 256 }
  0xc3   : > { %v838_v29 = vsel %vm3905_vm10, %v2727_v50, 0.0  ;;  %v902_v11 = vsel %vm3906_vm9, %v2749_v18, %v836_v24  ;;  %v839_v38 = vsel %vm3907_vm5, %v2723_v57, 0.0  ;;  %964 = vst [vmem:[%s1724_s7 + $0x108] sm:$0xff] %v900_v35  ;;  %v903_v21 = vsel %vm3908_vm7, %v2747_v10, %v837_v39  ;;  %vm3910_vm12 = vmmov %vm3908_vm7 }
  0xc4   : > { %vm3909_vm15 = vcmp.eq.s32.totalorder %v1811_v44, %v2328_v54  ;;  %965 = vst [vmem:[%s1724_s7 + $0x110] sm:$0xff] %v901_v28  ;;  %v904_v31 = vsel %vm3910_vm12, %v2749_v18, %v838_v29  ;;  %vm3911_vm8 = vcmp.eq.s32.totalorder %v1788_v33, %v2331_v30  ;;  %vm3912_vm14 = vcmp.eq.s32.totalorder %v2328_v54, 256 }
  0xc5   : > { %v840_v46 = vsel %vm3909_vm15, %v2727_v50, 0.0  ;;  %v841_v49 = vsel %vm3911_vm8, %v2723_v57, 0.0  ;;  %966 = vst [vmem:[%s1724_s7 + $0x118] sm:$0xff] %v902_v11  ;;  %v905_v19 = vsel %vm3912_vm14, %v2747_v10, %v839_v38  ;;  %vm3913_vm3 = vcmp.eq.s32.totalorder %v1811_v44, %v2331_v30  ;;  %vm3914_vm2 = vmmov %vm3912_vm14 }
  0xc6   : > { %v842_v40 = vsel %vm3913_vm3, %v2727_v50, 0.0  ;;  %967 = vst [vmem:[%s1724_s7 + $0x120] sm:$0xff] %v903_v21  ;;  %v906_v32 = vsel %vm3914_vm2, %v2749_v18, %v840_v46  ;;  %vm3915_vm1 = vcmp.eq.s32.totalorder %v1788_v33, %v2385_v23  ;;  %vm3916_vm4 = vcmp.eq.s32.totalorder %v2331_v30, 256 }
  0xc7   : > { %v843_v53 = vsel %vm3915_vm1, %v2723_v57, 0.0  ;;  %968 = vst [vmem:[%s1724_s7 + $0x128] sm:$0xff] %v904_v31  ;;  %v907_v20 = vsel %vm3916_vm4, %v2747_v10, %v841_v49  ;;  %vm3917_vm0 = vcmp.eq.s32.totalorder %v1811_v44, %v2385_v23  ;;  %vm3918_vm6 = vmmov %vm3916_vm4  ;;  %vm3919_vm13 = vcmp.eq.s32.totalorder %v1788_v33, %v2388_v26 }
  0xc8   : > { %v844_v52 = vsel %vm3917_vm0, %v2727_v50, 0.0  ;;  %969 = vst [vmem:[%s1724_s7 + $0x130] sm:$0xff] %v905_v19  ;;  %v908_v54 = vsel %vm3918_vm6, %v2749_v18, %v842_v40  ;;  %v845_v0 = vsel %vm3919_vm13, %v2723_v57, 0.0  ;;  %vm3920_vm11 = vcmp.eq.s32.totalorder %v2385_v23, 256 }
  0xc9   : > { %970 = vst [vmem:[%s1724_s7 + $0x138] sm:$0xff] %v906_v32  ;;  %v909_v42 = vsel %vm3920_vm11, %v2747_v10, %v843_v53  ;;  %vm3921_vm10 = vcmp.eq.s32.totalorder %v1811_v44, %v2388_v26  ;;  %vm3922_vm9 = vmmov %vm3920_vm11  ;;  %vm3923_vm5 = vcmp.eq.s32.totalorder %v1788_v33, %v2410_v45  ;;  %vm3924_vm7 = vcmp.eq.s32.totalorder %v2388_v26, 256 }
  0xca   : > { %v846_v41 = vsel %vm3921_vm10, %v2727_v50, 0.0  ;;  %971 = vst [vmem:[%s1724_s7 + $0x140] sm:$0xff] %v907_v20  ;;  %v910_v30 = vsel %vm3922_vm9, %v2749_v18, %v844_v52  ;;  %v847_v60 = vsel %vm3923_vm5, %v2723_v57, 0.0  ;;  %v911_v58 = vsel %vm3924_vm7, %v2747_v10, %v845_v0  ;;  %vm3926_vm12 = vmmov %vm3924_vm7 }
  0xcb   : > { %972 = vst [vmem:[%s1724_s7 + $0x148] sm:$0xff] %v908_v54  ;;  %vm3925_vm15 = vcmp.eq.s32.totalorder %v1811_v44, %v2410_v45  ;;  %v912_v23 = vsel %vm3926_vm12, %v2749_v18, %v846_v41  ;;  %vm3927_vm8 = vcmp.eq.s32.totalorder %v1788_v33, %v2453_v63  ;;  %vm3928_vm14 = vcmp.eq.s32.totalorder %v2410_v45, 256 }
  0xcc   : > { %v848_v55 = vsel %vm3925_vm15, %v2727_v50, 0.0  ;;  %973 = vst [vmem:[%s1724_s7 + $0x150] sm:$0xff] %v909_v42  ;;  %v849_v47 = vsel %vm3927_vm8, %v2723_v57, 0.0  ;;  %v913_v12 = vsel %vm3928_vm14, %v2747_v10, %v847_v60  ;;  %vm3929_vm3 = vcmp.eq.s32.totalorder %v1811_v44, %v2453_v63  ;;  %vm3930_vm2 = vmmov %vm3928_vm14 }
  0xcd   : > { %974 = vst [vmem:[%s1724_s7 + $0x158] sm:$0xff] %v910_v30  ;;  %v850_v61 = vsel %vm3929_vm3, %v2727_v50, 0.0  ;;  %v914_v26 = vsel %vm3930_vm2, %v2749_v18, %v848_v55  ;;  %vm3931_vm1 = vcmp.eq.s32.totalorder %v1788_v33, %v2467_v13  ;;  %vm3932_vm4 = vcmp.eq.s32.totalorder %v2453_v63, 256 }
  0xce   : > { %975 = vst [vmem:[%s1724_s7 + $0x160] sm:$0xff] %v911_v58  ;;  %v851_v36 = vsel %vm3931_vm1, %v2723_v57, 0.0  ;;  %v915_v3 = vsel %vm3932_vm4, %v2747_v10, %v849_v47  ;;  %vm3933_vm0 = vcmp.eq.s32.totalorder %v1811_v44, %v2467_v13  ;;  %vm3934_vm6 = vmmov %vm3932_vm4  ;;  %vm3935_vm13 = vcmp.eq.s32.totalorder %v1788_v33, %v2476_v16 }
  0xcf   : > { %976 = vst [vmem:[%s1724_s7 + $0x168] sm:$0xff] %v912_v23  ;;  %v852_v45 = vsel %vm3933_vm0, %v2727_v50, 0.0  ;;  %v916_v15 = vsel %vm3934_vm6, %v2749_v18, %v850_v61  ;;  %v853_v59 = vsel %vm3935_vm13, %v2723_v57, 0.0  ;;  %vm3936_vm11 = vcmp.eq.s32.totalorder %v2467_v13, 256 }
  0xd0   : > { %977 = vst [vmem:[%s1724_s7 + $0x170] sm:$0xff] %v913_v12  ;;  %v917_v62 = vsel %vm3936_vm11, %v2747_v10, %v851_v36  ;;  %vm3937_vm10 = vcmp.eq.s32.totalorder %v1811_v44, %v2476_v16  ;;  %vm3938_vm9 = vmmov %vm3936_vm11  ;;  %vm3939_vm5 = vcmp.eq.s32.totalorder %v2476_v16, 256 }
  0xd1   : > { %978 = vst [vmem:[%s1724_s7 + $0x178] sm:$0xff] %v914_v26  ;;  %v854_v63 = vsel %vm3937_vm10, %v2727_v50, 0.0  ;;  %v918_v33 = vsel %vm3938_vm9, %v2749_v18, %v852_v45  ;;  %v919_v57 = vsel %vm3939_vm5, %v2747_v10, %v853_v59  ;;  %vm3940_vm7 = vmmov %vm3939_vm5 }
  0xd2   : > { %979 = vst [vmem:[%s1724_s7 + $0x180] sm:$0xff] %v915_v3  ;;  %v920_v44 = vsel %vm3940_vm7, %v2749_v18, %v854_v63 }
  0xd3   : > { %980 = vst [vmem:[%s1724_s7 + $0x188] sm:$0xff] %v916_v15 }
  0xd4   : > { %981 = vst [vmem:[%s1724_s7 + $0x190] sm:$0xff] %v917_v62 }
  0xd5   : > { %982 = vst [vmem:[%s1724_s7 + $0x198] sm:$0xff] %v918_v33 }
  0xd6   : > { %983 = vst [vmem:[%s1724_s7 + $0x1a0] sm:$0xff] %v919_v57 }
  0xd7   : > { %984 = vst [vmem:[%s1724_s7 + $0x1a8] sm:$0xff] %v920_v44 }
  0xd8   : > { %985 = vst [vmem:[%s1724_s7 + $0x1b0] sm:$0xff] %v2973_v51 }
  0xd9   : > { %986 = vst [vmem:[%s1724_s7 + $0x1b8] sm:$0xff] %v2978_v25 }
  0xda   : > { %987 = vst [vmem:[%s1724_s7 + $0x1c0] sm:$0xff] %v2992_v56 }
  0xdb   : > { %988 = vst [vmem:[%s1724_s7 + $0x1c8] sm:$0xff] %v3010_v9 }
  0xdc   : > { %989 = vst [vmem:[%s1724_s7 + $0x1d0] sm:$0xff] %v3015_v1 }
  0xdd   : > { %990 = vst [vmem:[%s1724_s7 + $0x1d8] sm:$0xff] %v3032_v43 }
  0xde   : > { %991 = vst [vmem:[%s1724_s7 + $0x1e0] sm:$0xff] %v3049_v17 }
  0xdf   : > { %992 = vst [vmem:[%s1724_s7 + $0x1e8] sm:$0xff] %v3066_v37 }
  0xe0   : > { %993 = vst [vmem:[%s1724_s7 + $0x1f0] sm:$0xff] %v3083_v48 }
  0xe1   : > { %994 = vst [vmem:[%s1724_s7 + $0x1f8] sm:$0xff] %v3100_v14 }
  0xe2 PF: > { %997 = sbr.rel (%p243_p5) target bundleno = 360 (0x168), region = 36 }
  0xe7   : > { %v1587_v13 = vmov 0.0  }
  0xe8   : > { %998 = vst [vmem:[%s1722_s10] sm:$0xff] %v1587_v13 }
  0xe9   : > { %999 = vst [vmem:[%s1722_s10 + $0x8] sm:$0xff] %v1587_v13 }
  0xea   : > { %1000 = vst [vmem:[%s1722_s10 + $0x10] sm:$0xff] %v1587_v13 }
  0xeb   : > { %1001 = vst [vmem:[%s1722_s10 + $0x18] sm:$0xff] %v1587_v13 }
  0xec   : > { %1002 = vst [vmem:[%s1722_s10 + $0x20] sm:$0xff] %v1587_v13 }
  0xed   : > { %1003 = vst [vmem:[%s1722_s10 + $0x28] sm:$0xff] %v1587_v13 }
  0xee   : > { %1004 = vst [vmem:[%s1722_s10 + $0x30] sm:$0xff] %v1587_v13 }
  0xef   : > { %1005 = vst [vmem:[%s1722_s10 + $0x38] sm:$0xff] %v1587_v13 }
  0xf0   : > { %1006 = vst [vmem:[%s1722_s10 + $0x40] sm:$0xff] %v1587_v13 }
  0xf1   : > { %1007 = vst [vmem:[%s1722_s10 + $0x48] sm:$0xff] %v1587_v13 }
  0xf2   : > { %1008 = vst [vmem:[%s1722_s10 + $0x50] sm:$0xff] %v1587_v13 }
  0xf3   : > { %1009 = vst [vmem:[%s1722_s10 + $0x58] sm:$0xff] %v1587_v13 }
  0xf4   : > { %1010 = vst [vmem:[%s1722_s10 + $0x60] sm:$0xff] %v1587_v13 }
  0xf5   : > { %1011 = vst [vmem:[%s1722_s10 + $0x68] sm:$0xff] %v1587_v13 }
  0xf6   : > { %1012 = vst [vmem:[%s1722_s10 + $0x70] sm:$0xff] %v1587_v13 }
  0xf7   : > { %1013 = vst [vmem:[%s1722_s10 + $0x78] sm:$0xff] %v1587_v13 }
  0xf8   : > { %1014 = vst [vmem:[%s1722_s10 + $0x80] sm:$0xff] %v1587_v13 }
  0xf9   : > { %1015 = vst [vmem:[%s1722_s10 + $0x88] sm:$0xff] %v1587_v13 }
  0xfa   : > { %1016 = vst [vmem:[%s1722_s10 + $0x90] sm:$0xff] %v1587_v13 }
  0xfb   : > { %1017 = vst [vmem:[%s1722_s10 + $0x98] sm:$0xff] %v1587_v13 }
  0xfc   : > { %1018 = vst [vmem:[%s1722_s10 + $0xa0] sm:$0xff] %v1587_v13 }
  0xfd   : > { %1019 = vst [vmem:[%s1722_s10 + $0xa8] sm:$0xff] %v1587_v13 }
  0xfe   : > { %1020 = vst [vmem:[%s1722_s10 + $0xb0] sm:$0xff] %v1587_v13 }
  0xff   : > { %1021 = vst [vmem:[%s1722_s10 + $0xb8] sm:$0xff] %v1587_v13 }
 0x100   : > { %1022 = vst [vmem:[%s1722_s10 + $0xc0] sm:$0xff] %v1587_v13 }
 0x101   : > { %1023 = vst [vmem:[%s1722_s10 + $0xc8] sm:$0xff] %v1587_v13 }
 0x102   : > { %1024 = vst [vmem:[%s1722_s10 + $0xd0] sm:$0xff] %v1587_v13 }
 0x103   : > { %1025 = vst [vmem:[%s1722_s10 + $0xd8] sm:$0xff] %v1587_v13 }
 0x104   : > { %1026 = vst [vmem:[%s1722_s10 + $0xe0] sm:$0xff] %v1587_v13 }
 0x105   : > { %1027 = vst [vmem:[%s1722_s10 + $0xe8] sm:$0xff] %v1587_v13 }
 0x106   : > { %1028 = vst [vmem:[%s1722_s10 + $0xf0] sm:$0xff] %v1587_v13 }
 0x107   : > { %1029 = vst [vmem:[%s1722_s10 + $0xf8] sm:$0xff] %v1587_v13 }
 0x108   : > { %1030 = vst [vmem:[%s1722_s10 + $0x100] sm:$0xff] %v1587_v13 }
 0x109   : > { %1031 = vst [vmem:[%s1722_s10 + $0x108] sm:$0xff] %v1587_v13 }
 0x10a   : > { %1032 = vst [vmem:[%s1722_s10 + $0x110] sm:$0xff] %v1587_v13 }
 0x10b   : > { %1033 = vst [vmem:[%s1722_s10 + $0x118] sm:$0xff] %v1587_v13 }
 0x10c   : > { %1034 = vst [vmem:[%s1722_s10 + $0x120] sm:$0xff] %v1587_v13 }
 0x10d   : > { %1035 = vst [vmem:[%s1722_s10 + $0x128] sm:$0xff] %v1587_v13 }
 0x10e   : > { %1036 = vst [vmem:[%s1722_s10 + $0x130] sm:$0xff] %v1587_v13 }
 0x10f   : > { %1037 = vst [vmem:[%s1722_s10 + $0x138] sm:$0xff] %v1587_v13 }
 0x110   : > { %1038 = vst [vmem:[%s1722_s10 + $0x140] sm:$0xff] %v1587_v13 }
 0x111   : > { %1039 = vst [vmem:[%s1722_s10 + $0x148] sm:$0xff] %v1587_v13 }
 0x112   : > { %1040 = vst [vmem:[%s1722_s10 + $0x150] sm:$0xff] %v1587_v13 }
 0x113   : > { %1041 = vst [vmem:[%s1722_s10 + $0x158] sm:$0xff] %v1587_v13 }
 0x114   : > { %1042 = vst [vmem:[%s1722_s10 + $0x160] sm:$0xff] %v1587_v13 }
 0x115   : > { %1043 = vst [vmem:[%s1722_s10 + $0x168] sm:$0xff] %v1587_v13 }
 0x116   : > { %1044 = vst [vmem:[%s1722_s10 + $0x170] sm:$0xff] %v1587_v13 }
 0x117   : > { %1045 = vst [vmem:[%s1722_s10 + $0x178] sm:$0xff] %v1587_v13 }
 0x118   : > { %1046 = vst [vmem:[%s1722_s10 + $0x180] sm:$0xff] %v1587_v13 }
 0x119   : > { %1047 = vst [vmem:[%s1722_s10 + $0x188] sm:$0xff] %v1587_v13 }
 0x11a   : > { %1048 = vst [vmem:[%s1722_s10 + $0x190] sm:$0xff] %v1587_v13 }
 0x11b   : > { %1049 = vst [vmem:[%s1722_s10 + $0x198] sm:$0xff] %v1587_v13 }
 0x11c   : > { %1050 = vst [vmem:[%s1722_s10 + $0x1a0] sm:$0xff] %v1587_v13 }
 0x11d   : > { %1051 = vst [vmem:[%s1722_s10 + $0x1a8] sm:$0xff] %v1587_v13 }
 0x11e   : > { %1052 = vst [vmem:[%s1722_s10 + $0x1b0] sm:$0xff] %v1587_v13 }
 0x11f   : > { %1053 = vst [vmem:[%s1722_s10 + $0x1b8] sm:$0xff] %v1587_v13 }
 0x120   : > { %1054 = vst [vmem:[%s1722_s10 + $0x1c0] sm:$0xff] %v1587_v13 }
 0x121   : > { %1055 = vst [vmem:[%s1722_s10 + $0x1c8] sm:$0xff] %v1587_v13 }
 0x122   : > { %1056 = vst [vmem:[%s1722_s10 + $0x1d0] sm:$0xff] %v1587_v13 }
 0x123   : > { %1057 = vst [vmem:[%s1722_s10 + $0x1d8] sm:$0xff] %v1587_v13 }
 0x124   : > { %1058 = vst [vmem:[%s1722_s10 + $0x1e0] sm:$0xff] %v1587_v13 }
 0x125   : > { %1059 = vst [vmem:[%s1722_s10 + $0x1e8] sm:$0xff] %v1587_v13 }
 0x126   : > { %1060 = vst [vmem:[%s1722_s10 + $0x1f0] sm:$0xff] %v1587_v13 }
 0x127   : > { %1061 = vst [vmem:[%s1722_s10 + $0x1f8] sm:$0xff] %v1587_v13 }
 0x128   : > { %1062 = vst [vmem:[%s1724_s7] sm:$0xff] %v1587_v13 }
 0x129   : > { %1063 = vst [vmem:[%s1724_s7 + $0x8] sm:$0xff] %v1587_v13 }
 0x12a   : > { %1064 = vst [vmem:[%s1724_s7 + $0x10] sm:$0xff] %v1587_v13 }
 0x12b   : > { %1065 = vst [vmem:[%s1724_s7 + $0x18] sm:$0xff] %v1587_v13 }
 0x12c   : > { %1066 = vst [vmem:[%s1724_s7 + $0x20] sm:$0xff] %v1587_v13 }
 0x12d   : > { %1067 = vst [vmem:[%s1724_s7 + $0x28] sm:$0xff] %v1587_v13 }
 0x12e   : > { %1068 = vst [vmem:[%s1724_s7 + $0x30] sm:$0xff] %v1587_v13 }
 0x12f   : > { %1069 = vst [vmem:[%s1724_s7 + $0x38] sm:$0xff] %v1587_v13 }
 0x130   : > { %1070 = vst [vmem:[%s1724_s7 + $0x40] sm:$0xff] %v1587_v13 }
 0x131   : > { %1071 = vst [vmem:[%s1724_s7 + $0x48] sm:$0xff] %v1587_v13 }
 0x132   : > { %1072 = vst [vmem:[%s1724_s7 + $0x50] sm:$0xff] %v1587_v13 }
 0x133   : > { %1073 = vst [vmem:[%s1724_s7 + $0x58] sm:$0xff] %v1587_v13 }
 0x134   : > { %1074 = vst [vmem:[%s1724_s7 + $0x60] sm:$0xff] %v1587_v13 }
 0x135   : > { %1075 = vst [vmem:[%s1724_s7 + $0x68] sm:$0xff] %v1587_v13 }
 0x136   : > { %1076 = vst [vmem:[%s1724_s7 + $0x70] sm:$0xff] %v1587_v13 }
 0x137   : > { %1077 = vst [vmem:[%s1724_s7 + $0x78] sm:$0xff] %v1587_v13 }
 0x138   : > { %1078 = vst [vmem:[%s1724_s7 + $0x80] sm:$0xff] %v1587_v13 }
 0x139   : > { %1079 = vst [vmem:[%s1724_s7 + $0x88] sm:$0xff] %v1587_v13 }
 0x13a   : > { %1080 = vst [vmem:[%s1724_s7 + $0x90] sm:$0xff] %v1587_v13 }
 0x13b   : > { %1081 = vst [vmem:[%s1724_s7 + $0x98] sm:$0xff] %v1587_v13 }
 0x13c   : > { %1082 = vst [vmem:[%s1724_s7 + $0xa0] sm:$0xff] %v1587_v13 }
 0x13d   : > { %1083 = vst [vmem:[%s1724_s7 + $0xa8] sm:$0xff] %v1587_v13 }
 0x13e   : > { %1084 = vst [vmem:[%s1724_s7 + $0xb0] sm:$0xff] %v1587_v13 }
 0x13f   : > { %1085 = vst [vmem:[%s1724_s7 + $0xb8] sm:$0xff] %v1587_v13 }
 0x140   : > { %1086 = vst [vmem:[%s1724_s7 + $0xc0] sm:$0xff] %v1587_v13 }
 0x141   : > { %1087 = vst [vmem:[%s1724_s7 + $0xc8] sm:$0xff] %v1587_v13 }
 0x142   : > { %1088 = vst [vmem:[%s1724_s7 + $0xd0] sm:$0xff] %v1587_v13 }
 0x143   : > { %1089 = vst [vmem:[%s1724_s7 + $0xd8] sm:$0xff] %v1587_v13 }
 0x144   : > { %1090 = vst [vmem:[%s1724_s7 + $0xe0] sm:$0xff] %v1587_v13 }
 0x145   : > { %1091 = vst [vmem:[%s1724_s7 + $0xe8] sm:$0xff] %v1587_v13 }
 0x146   : > { %1092 = vst [vmem:[%s1724_s7 + $0xf0] sm:$0xff] %v1587_v13 }
 0x147   : > { %1093 = vst [vmem:[%s1724_s7 + $0xf8] sm:$0xff] %v1587_v13 }
 0x148   : > { %1094 = vst [vmem:[%s1724_s7 + $0x100] sm:$0xff] %v1587_v13 }
 0x149   : > { %1095 = vst [vmem:[%s1724_s7 + $0x108] sm:$0xff] %v1587_v13 }
 0x14a   : > { %1096 = vst [vmem:[%s1724_s7 + $0x110] sm:$0xff] %v1587_v13 }
 0x14b   : > { %1097 = vst [vmem:[%s1724_s7 + $0x118] sm:$0xff] %v1587_v13 }
 0x14c   : > { %1098 = vst [vmem:[%s1724_s7 + $0x120] sm:$0xff] %v1587_v13 }
 0x14d   : > { %1099 = vst [vmem:[%s1724_s7 + $0x128] sm:$0xff] %v1587_v13 }
 0x14e   : > { %1100 = vst [vmem:[%s1724_s7 + $0x130] sm:$0xff] %v1587_v13 }
 0x14f   : > { %1101 = vst [vmem:[%s1724_s7 + $0x138] sm:$0xff] %v1587_v13 }
 0x150   : > { %1102 = vst [vmem:[%s1724_s7 + $0x140] sm:$0xff] %v1587_v13 }
 0x151   : > { %1103 = vst [vmem:[%s1724_s7 + $0x148] sm:$0xff] %v1587_v13 }
 0x152   : > { %1104 = vst [vmem:[%s1724_s7 + $0x150] sm:$0xff] %v1587_v13 }
 0x153   : > { %1105 = vst [vmem:[%s1724_s7 + $0x158] sm:$0xff] %v1587_v13 }
 0x154   : > { %1106 = vst [vmem:[%s1724_s7 + $0x160] sm:$0xff] %v1587_v13 }
 0x155   : > { %1107 = vst [vmem:[%s1724_s7 + $0x168] sm:$0xff] %v1587_v13 }
 0x156   : > { %1108 = vst [vmem:[%s1724_s7 + $0x170] sm:$0xff] %v1587_v13 }
 0x157   : > { %1109 = vst [vmem:[%s1724_s7 + $0x178] sm:$0xff] %v1587_v13 }
 0x158   : > { %1110 = vst [vmem:[%s1724_s7 + $0x180] sm:$0xff] %v1587_v13 }
 0x159   : > { %1111 = vst [vmem:[%s1724_s7 + $0x188] sm:$0xff] %v1587_v13 }
 0x15a   : > { %1112 = vst [vmem:[%s1724_s7 + $0x190] sm:$0xff] %v1587_v13 }
 0x15b   : > { %1113 = vst [vmem:[%s1724_s7 + $0x198] sm:$0xff] %v1587_v13 }
 0x15c   : > { %1114 = vst [vmem:[%s1724_s7 + $0x1a0] sm:$0xff] %v1587_v13 }
 0x15d   : > { %1115 = vst [vmem:[%s1724_s7 + $0x1a8] sm:$0xff] %v1587_v13 }
 0x15e   : > { %1116 = vst [vmem:[%s1724_s7 + $0x1b0] sm:$0xff] %v1587_v13 }
 0x15f   : > { %1117 = vst [vmem:[%s1724_s7 + $0x1b8] sm:$0xff] %v1587_v13 }
 0x160   : > { %1118 = vst [vmem:[%s1724_s7 + $0x1c0] sm:$0xff] %v1587_v13 }
 0x161   : > { %1119 = vst [vmem:[%s1724_s7 + $0x1c8] sm:$0xff] %v1587_v13 }
 0x162   : > { %1120 = vst [vmem:[%s1724_s7 + $0x1d0] sm:$0xff] %v1587_v13 }
 0x163   : > { %1121 = vst [vmem:[%s1724_s7 + $0x1d8] sm:$0xff] %v1587_v13 }
 0x164   : > { %1122 = vst [vmem:[%s1724_s7 + $0x1e0] sm:$0xff] %v1587_v13 }
 0x165   : > { %1123 = vst [vmem:[%s1724_s7 + $0x1e8] sm:$0xff] %v1587_v13 }
 0x166   : > { %1124 = vst [vmem:[%s1724_s7 + $0x1f0] sm:$0xff] %v1587_v13 }
 0x167   : > { %1125 = vst [vmem:[%s1724_s7 + $0x1f8] sm:$0xff] %v1587_v13 }
 0x168 PF: > { %s3756_s23 = scalar_lea.sflag [#allocation3], %s1686_s4  ;;  %1138 = sbr.rel (!%p1665_p3) target bundleno = 402 (0x192), region = 40 }
 0x169   : > { %s1326_s8 = sshll.u32 (%p1665_p3), %s1569_s16, 5  ;;  %s1145_s9 = ssub.s32 (%p1665_p3), 3, %s1689_s5 }
 0x16a   : > { %s1141_s11 = ssub.s32 (%p1665_p3), 33, %s1326_s8  ;;  %p1146_p6 = scmp.lt.s32.totalorder (%p1665_p3), %s1145_s9, 2 }
 0x16b   : > { %p1142_p7 = scmp.lt.s32.totalorder (%p1665_p3), %s1141_s11, 32 }
 0x16d   : > { %s3962_s9 = smov (!%p1146_p6, %s1145_s9), 2  ;;  %s3964_s11 = smov (!%p1142_p7, %s1141_s11), 32 }
 0x16e   : > { %s1328_s20 = sshll.u32 %s3964_s11, 3 }
 0x16f   : > { %s3551_s21 = smul.u32 %s1328_s20, %s3962_s9 }
 0x171   : > { %s1149_s24 = ssub.s32 512, %s3551_s21 }
 0x172   : > { %s1150_s27 = sshll.u32 %s1149_s24, 4 }
 0x173   : > { %1151 = vsyncadd %s3756_s23, %s1150_s27  ;;  %p1329_p9 = scmp.ne.s32.totalorder %s3551_s21, 0  ;;  %s1342_s28 = smul.u32 96, %s1569_s16 }
 0x174   : > { %s3759_s29 = sshll.u32 %s3962_s9, 3  ;;  %s1159_s15 = sshll.u32 %s1722_s10, 4  ;;  %s3565_s15 = int_to_ptr.vmem [resolvable:$true] %s1159_s15 }
 0x175   : > { %s1154_s8 = sadd.s32 %s1342_s28, %s1689_s5  ;;  %s3563_s20 = smul.u32 %s3759_s29, %s3964_s11 }
 0x176   : > { %s1331_s24 = sshll.u32 %s1154_s8, 3  ;;  %s1433_s22 = sshra.s32 %s3565_s15, 4  ;;  %s1434_s22 = int_to_ptr.vmem [resolvable:$true] %s1433_s22 }
 0x177   : > { %s1156_s23 = scalar_lea.hbm %s3680_s2, %s1331_s24  ;;  %s3758_s0 = sshll.u32 %s3563_s20, 4 }
 0x178   : > { %s1161_s1 = sshll.u32 %s1156_s23, 4  ;;  %s1435_s10 = sshrl.u32 %s3758_s0, 4  ;;  %s3571_s1 = int_to_ptr.hbm [resolvable:$true] %s1161_s1 }
 0x179   : > { %s1440_s11 = scalar_lea.vmem %s1434_s22, %s1435_s10  ;;  %s1588_s28 = smov [#allocation2]  }
 0x17a   : > { %p1441_p10 = scmp.ne.s32.totalorder %s1434_s22, %s1440_s11  ;;  %s1444_s8 = scalar_lea.vmem %s1588_s28, 1024 }
 0x17b   : > { %p1446_p13 = scmp.lt.s32.totalorder %s1444_s8, %s1440_s11 }
 0x17c   : > { %p1442_p11 = pnand %p1441_p10, %p1329_p9 }
 0x17e   : > { %p1443_p12 = pneg %p1442_p11 }
 0x180   : > { %p1448_p0 = pnand %p1446_p13, %p1443_p12 }
 0x182   : > { %1451 = shalt.err (!%p1448_p0)
}
 0x183   : > { %s1452_s6 = sshra.s32 %s3571_s1, 4  ;;  %s1463_s22 = scalar_lea.hbm %s3680_s2, 792  ;;  %s1453_s6 = int_to_ptr.hbm [resolvable:$true] %s1452_s6 }
 0x184   : > { %s1459_s23 = scalar_lea.hbm %s1453_s6, %s1435_s10  ;;  %p1464_p5 = scmp.lt.s32.totalorder %s1453_s6, %s3680_s2 }
 0x185   : > { %p1460_p1 = scmp.ne.s32.totalorder %s1453_s6, %s1459_s23  ;;  %p1465_p6 = scmp.lt.s32.totalorder %s1463_s22, %s1459_s23 }
 0x187   : > { %p1461_p2 = pnand %p1460_p1, %p1329_p9  ;;  %p1466_p7 = por %p1465_p6, %p1464_p5 }
 0x189   : > { %p1462_p4 = pneg %p1461_p2 }
 0x18b   : > { %p1467_p10 = pnand %p1466_p7, %p1462_p4 }
 0x18d   : > { %1470 = shalt.err (!%p1467_p10)
}
 0x18e   : > { %s1589_s11 = smov 256   ;;  %s1590_s10 = smov 384  }
 0x18f   : > { %s3941_s28 = sshll.u32 %s3962_s9, 3  ;;  %s3942_s8 = scalar_lea.sflag [#allocation3], %s1686_s4 }
 0x190   : > { %s3943_s24 = sshll.u32 %s3563_s20, 4 }
 0x191   : > { %1167 = dma.vmem_to_hbm [thread:$0]  (%p1329_p9), %s3565_s15, %s3943_s24, %s3571_s1, %s3942_s8, %s1589_s11, %s1590_s10, %s3941_s28  }
 0x192 PF: > { %1170 = sbr.rel (!%p1665_p3) target bundleno = 443 (0x1bb), region = 44  ;;  %s1333_s0 = sshll.u32 (%p1665_p3), %s1569_s16, 5 }
 0x193   : > { %s1177_s29 = ssub.s32 (%p1665_p3), 3, %s1689_s5  ;;  %s1173_s6 = ssub.s32 (%p1665_p3), 33, %s1333_s0 }
 0x194   : > { %p1178_p11 = scmp.lt.s32.totalorder (%p1665_p3), %s1177_s29, 2  ;;  %p1174_p12 = scmp.lt.s32.totalorder (%p1665_p3), %s1173_s6, 32 }
 0x195   : > { %s3944_s25 = scalar_lea.sflag (%p1665_p3), [#allocation5], %s1686_s4 }
 0x197   : > { %s3966_s29 = smov (!%p1178_p11, %s1177_s29), 2  ;;  %s3968_s6 = smov (!%p1174_p12, %s1173_s6), 32 }
 0x198   : > { %s1335_s9 = sshll.u32 %s3968_s6, 3 }
 0x199   : > { %s3604_s21 = smul.u32 %s1335_s9, %s3966_s29 }
 0x19b   : > { %s1181_s1 = ssub.s32 512, %s3604_s21 }
 0x19c   : > { %s1182_s15 = sshll.u32 %s1181_s1, 4 }
 0x19d   : > { %1183 = vsyncadd %s3944_s25, %s1182_s15  ;;  %p1336_p3 = scmp.ne.s32.totalorder %s3604_s21, 0  ;;  %s1343_s20 = smul.u32 96, %s1569_s16 }
 0x19e   : > { %s1339_s23 = sshll.u32 %s3966_s29, 3  ;;  %s1191_s27 = sshll.u32 %s1724_s7, 4  ;;  %s3618_s27 = int_to_ptr.vmem [resolvable:$true] %s1191_s27 }
 0x19f   : > { %s1186_s22 = sadd.s32 %s1343_s20, %s1689_s5  ;;  %s3616_s11 = smul.u32 %s1339_s23, %s3968_s6 }
 0x1a0   : > { %s1338_s10 = sshll.u32 %s1186_s22, 3  ;;  %s1472_s16 = sshra.s32 %s3618_s27, 4  ;;  %s1473_s16 = int_to_ptr.vmem [resolvable:$true] %s1472_s16 }
 0x1a1   : > { %s1188_s24 = scalar_lea.hbm %s3681_s3, %s1338_s10  ;;  %s1195_s0 = sshll.u32 %s3616_s11, 4 }
 0x1a2   : > { %s1193_s9 = sshll.u32 %s1188_s24, 4  ;;  %s1474_s5 = sshrl.u32 %s1195_s0, 4  ;;  %s3624_s9 = int_to_ptr.hbm [resolvable:$true] %s1193_s9 }
 0x1a3   : > { %s1479_s7 = scalar_lea.vmem %s1473_s16, %s1474_s5  ;;  %s1591_s6 = smov [#allocation4]  }
 0x1a4   : > { %p1480_p9 = scmp.ne.s32.totalorder %s1473_s16, %s1479_s7  ;;  %s1483_s1 = scalar_lea.vmem %s1591_s6, 1024 }
 0x1a5   : > { %p1485_p1 = scmp.lt.s32.totalorder %s1483_s1, %s1479_s7 }
 0x1a6   : > { %p1481_p13 = pnand %p1480_p9, %p1336_p3 }
 0x1a8   : > { %p1482_p0 = pneg %p1481_p13 }
 0x1aa   : > { %p1487_p2 = pnand %p1485_p1, %p1482_p0 }
 0x1ac   : > { %1490 = shalt.err (!%p1487_p2)
}
 0x1ad   : > { %s1491_s15 = sshra.s32 %s3624_s9, 4  ;;  %s1502_s10 = scalar_lea.hbm %s3681_s3, 792  ;;  %s1492_s15 = int_to_ptr.hbm [resolvable:$true] %s1491_s15 }
 0x1ae   : > { %s1498_s25 = scalar_lea.hbm %s1492_s15, %s1474_s5  ;;  %p1503_p7 = scmp.lt.s32.totalorder %s1492_s15, %s3681_s3 }
 0x1af   : > { %p1499_p4 = scmp.ne.s32.totalorder %s1492_s15, %s1498_s25  ;;  %p1504_p10 = scmp.lt.s32.totalorder %s1502_s10, %s1498_s25 }
 0x1b1   : > { %p1500_p5 = pnand %p1499_p4, %p1336_p3  ;;  %p1505_p11 = por %p1504_p10, %p1503_p7 }
 0x1b3   : > { %p1501_p6 = pneg %p1500_p5 }
 0x1b5   : > { %p1506_p12 = pnand %p1505_p11, %p1501_p6 }
 0x1b7   : > { %1509 = shalt.err (!%p1506_p12)
}
 0x1b8   : > { %s1592_s24 = smov 256   ;;  %s1593_s16 = smov 384  }
 0x1b9   : > { %s3945_s5 = scalar_lea.sflag [#allocation5], %s1686_s4 }
 0x1ba   : > { %1199 = dma.vmem_to_hbm [thread:$0]  (%p1336_p3), %s3618_s27, %s1195_s0, %s3624_s9, %s3945_s5, %s1592_s24, %s1593_s16, %s1339_s23  }
 0x1bb PF: > { %p1353_p9 = scmp.ge.s32.totalorder %s1581_s19, 2  ;;  %s1208_s7 = sand.u32 1, %s1553_s12  }
 0x1bc   : > { %s1209_s6 = scalar_lea.sflag [#allocation3], %s1208_s7 }
 0x1bd   : > { %p1347_p13 = pnand %p1353_p9, %p1674_p8 }
 0x1bf   : > { %p1348_p0 = pneg %p1347_p13 }
 0x1c1   : > { %1544 = dma.done.wait (%p1348_p0), %s1209_s6, 8192  }
 0x1c2   : > { %1546 = vsyncadd (%p1348_p0), %s1209_s6, 4294959104  ;;  %s1219_s1 = scalar_lea.sflag [#allocation5], %s1208_s7 }
 0x1c3   : > { %1548 = dma.done.wait (%p1348_p0), %s1219_s1, 8192  }
 0x1c4   : > { %1550 = vsyncadd (%p1348_p0), %s1219_s1, 4294959104  ;;  %s20_s19 = sadd.s32 1, %s1581_s19   ;;  %s3946_s4 = sld [smem:[#allocation8_spill]] }
 0x1c5   : > { %p17_p1 = scmp.ge.s32.totalorder %s20_s19, 6   ;;  %s3947_s29 = sld [smem:[#allocation9_spill]] }
 0x1c6   : > { %s3948_s12 = smov %s1557_s13  ;;  %s3949_s13 = smov %s1561_s14 }
 0x1c7   : > { %s3950_s14 = smov %s1683_s30  ;;  %s3951_s15 = smov %s1573_s17 }
 0x1c8   : > { %s3952_s16 = smov %s1577_s18  ;;  %19 = sbr.rel (!%p17_p1) target bundleno = 10 (0xa), region = 91 }
 0x1ca   : > { %s3953_s17 = smov %s3946_s4 }
 0x1cb   : > { %s3954_s18 = smov %s3947_s29 }
 0x1cd   :  { %1225 = vsyncpa [#allocation3], 1 }
 0x1ce   :  { %1227 = vsyncpa [#allocation3 + $0x1], 1 }
 0x1cf   :  { %1228 = vsyncpa [#allocation5], 1 }
 0x1d0   :  { %1230 = vsyncpa [#allocation5 + $0x1], 1 }

</bundles_post_ra>
